<compile_context>
chip_gen: v7x
topology: tpu7x:2x2x1
jax: 0.10.0
libtpu: 0.0.40
codegen_flags: <defaults>
</compile_context>

<pallas_src>
from functools import partial

import jax
import jax.numpy as jnp
from jax.experimental import pallas as pl
from jax.experimental.pallas import tpu as pltpu


# ----------------------------------------------------------------------------
# Generic fused kernel:
#   out = tile_over_reps( concat_g( sum_{(x,w) in group g} relu?(x) @ w + shift_g ) )
# Groups land in disjoint column ranges (written with static column-slice stores,
# no in-kernel lane concatenation), so FactorizedReduce / node-stacked weights stay
# fully dense.  ReLU can be applied to the f32 accumulator in the epilogue.
# ----------------------------------------------------------------------------
def _fused_group_kernel(*refs, n_x, n_w, plan, pre_relu, post_relu, reps):
    x_refs = refs[:n_x]
    w_refs = refs[n_x:n_x + n_w]
    shift_ref = refs[n_x + n_w]
    o_ref = refs[n_x + n_w + 1]

    xs = []
    for xr in x_refs:
        x = xr[...]
        if pre_relu:
            x = jnp.maximum(x, 0)
        xs.append(x.astype(jnp.bfloat16))

    outs = []
    gcol = 0
    for group in plan:
        acc = None
        for (xi, wi) in group:
            y = jnp.dot(xs[xi], w_refs[wi][...],
                        preferred_element_type=jnp.float32)   # MXU, f32 accumulate
            acc = y if acc is None else acc + y
        gw = acc.shape[-1]
        acc = acc + shift_ref[:, gcol:gcol + gw]               # folded BN shift (f32)
        if post_relu:
            acc = jnp.maximum(acc, 0.0)                        # ReLU in f32 epilogue
        outs.append(acc.astype(o_ref.dtype))
        gcol += gw

    # Store the group results (and their node replicas) into disjoint column ranges.
    col = 0
    for _ in range(reps):
        for og in outs:
            gw = og.shape[-1]
            o_ref[:, col:col + gw] = og
            col += gw


def _pick_tm(M, N):
    """Largest tile that divides M exactly (no pad/slice copies around the kernel),
    keeps the (TM, N) f32 accumulator well inside the 256 KB vreg file, and yields an
    even grid (=2) on the big layers so both v7x TensorCores get work."""
    for tm in (256, 128, 64, 32, 16, 8):
        if M % tm == 0 and tm * N * 4 <= 128 * 1024:
            return tm
    return M


def fused_groups(xs, ws, plan, shift, *, pre_relu=False, post_relu=False, reps=1,
                 out_dtype=jnp.bfloat16):
    """One pallas_call computing the fused group matmul described above.

    xs:    list of (M, K_i) bf16 activations (already ReLU'd by their producer).
    ws:    list of bf16 weights with BN scale folded in.
    plan:  tuple of groups; each group is a tuple of (x_index, w_index) pairs that
           are summed; groups occupy consecutive output column ranges.
    shift: (N_base,) f32 folded BatchNorm shift / bias; output width = N_base * reps.
    """
    M = xs[0].shape[0]
    n_base = int(shift.shape[0])
    widths = [ws[g[0][1]].shape[1] for g in plan]
    assert sum(widths) == n_base, (widths, n_base)
    N = n_base * reps
    TM = _pick_tm(M, N)

    in_specs = [pl.BlockSpec((TM, x.shape[1]), lambda i: (i, 0)) for x in xs]
    in_specs += [pl.BlockSpec(w.shape, lambda i: (0, 0)) for w in ws]
    in_specs += [pl.BlockSpec((1, n_base), lambda i: (0, 0))]

    kern = partial(_fused_group_kernel, n_x=len(xs), n_w=len(ws), plan=plan,
                   pre_relu=pre_relu, post_relu=post_relu, reps=reps)

    return pl.pallas_call(
        kern,
        out_shape=jax.ShapeDtypeStruct((M, N), out_dtype),
        grid=(M // TM,),
        in_specs=in_specs,
        out_specs=pl.BlockSpec((TM, N), lambda i: (i, 0)),
        compiler_params=pltpu.CompilerParams(
            dimension_semantics=("parallel",),        # shard M across v7x's 2 TCs
            vmem_limit_bytes=32 << 20),               # explicit, safe under v7x 64 MiB
    )(*xs, *ws, shift.reshape(1, n_base))


# ----------------------------------------------------------------------------
# Head kernel: global average pool + Linear in one tiny pallas_call.
# Plain (C, n_classes) weight -- no H*W-replicated weight, no huge K.
# ----------------------------------------------------------------------------
def _gap_linear_kernel(x_ref, w_ref, b_ref, o_ref, *, inv_hw):
    B = x_ref.shape[0]
    for b in range(B):                                  # B is tiny and static
        g = jnp.sum(x_ref[b].astype(jnp.float32), axis=0, keepdims=True) * inv_hw
        y = jnp.dot(g.astype(jnp.bfloat16), w_ref[...],
                    preferred_element_type=jnp.float32)
        o_ref[b:b + 1, :] = y + b_ref[...]


def head_forward(x, p):
    B, H, W, C = x.shape
    HW = H * W
    N = p["w"].shape[1]
    return pl.pallas_call(
        partial(_gap_linear_kernel, inv_hw=1.0 / float(HW)),
        out_shape=jax.ShapeDtypeStruct((B, N), jnp.float32),
        grid=(1,),
        in_specs=[pl.BlockSpec((B, HW, C), lambda i: (0, 0, 0)),
                  pl.BlockSpec((C, N), lambda i: (0, 0)),
                  pl.BlockSpec((1, N), lambda i: (0, 0))],
        out_specs=pl.BlockSpec((B, N), lambda i: (0, 0)),
        compiler_params=pltpu.CompilerParams(vmem_limit_bytes=32 << 20),
    )(x.reshape(B, HW, C), p["w"], p["b"].reshape(1, N))


# ----------------------------------------------------------------------------
# Op glue (free reshapes / cheap slices only; all compute is in the kernels)
# ----------------------------------------------------------------------------
def _fr_split(x):
    """Even-even / odd-odd stride-2 spatial subsamples, flattened to (B*H/2*W/2, C).
    These are the two branches of FactorizedReduce (conv1 on x, conv2 on x[:,1:,1:])."""
    B, H, W, C = x.shape
    x_ee = x[:, 0::2, 0::2, :].reshape(-1, C)
    x_oo = x[:, 1::2, 1::2, :].reshape(-1, C)
    return x_ee, x_oo


def stem_forward(x, p):
    """3x3 conv (stride 1, pad 1, no bias) + folded BatchNorm.  The 9 taps are stacked
    along K into one deep dot.  ReLU of the downstream preprocs is folded in."""
    B, H, W, C = x.shape
    xp = jnp.pad(x, ((0, 0), (1, 1), (1, 1), (0, 0)))
    taps = [xp[:, dh:dh + H, dw:dw + W, :] for dh in range(3) for dw in range(3)]
    xcat = jnp.concatenate(taps, axis=-1).reshape(B * H * W, 9 * C)
    y = fused_groups([xcat], [p["w"]], (((0, 0),),), p["shift"], post_relu=True)
    return y.reshape(B, H, W, -1)


def apply_preproc(pp, x, *, post_relu):
    """StdConv (1x1 conv + BN) or FactorizedReduce, input already ReLU'd by producer."""
    B, H, W, _ = x.shape
    if "w" in pp:                                   # StdConv
        y = fused_groups([x.reshape(B * H * W, -1)], [pp["w"]], (((0, 0),),),
                         pp["shift"], post_relu=post_relu)
        return y.reshape(B, H, W, -1)
    x_ee, x_oo = _fr_split(x)                       # FactorizedReduce (dense halves)
    y = fused_groups([x_ee, x_oo], [pp["w1"], pp["w2"]], (((0, 0),), ((1, 1),)),
                     pp["shift"], post_relu=post_relu)
    return y.reshape(B, H // 2, W // 2, -1)


def normal_cell_forward(cell, s0, s1, n_nodes, *, post_relu):
    # With 'skipconnect' fixed, every node output equals preproc0(s0)+preproc1(s1):
    # compute it ONCE per tile and replicate across node columns in the epilogue.
    B, H1, W1, _ = s1.shape
    M = B * H1 * W1
    if len(cell["ws"]) == 4:                        # preproc0 is FactorizedReduce
        s0_ee, s0_oo = _fr_split(s0)
        xs = [s0_ee, s0_oo, s1.reshape(M, -1)]
        plan = (((0, 0), (2, 2)), ((1, 1), (2, 3)))
    else:                                           # preproc0 is StdConv
        xs = [s0.reshape(M, -1), s1.reshape(M, -1)]
        plan = (((0, 0), (1, 1)),)
    y = fused_groups(xs, cell["ws"], plan, cell["shift"],
                     post_relu=post_relu, reps=n_nodes)
    return y.reshape(B, H1, W1, -1)


def _reduce_node_plan(n_nodes):
    plan = []
    for n in range(n_nodes):
        b = 4 * n
        plan.append(((0, b), (2, b + 1)))           # even-parity half of node n
        plan.append(((1, b + 2), (3, b + 3)))       # odd-parity half of node n
    return tuple(plan)


def reduction_cell_forward(cell, s0, s1, n_nodes, *, post_relu):
    # preproc0/preproc1 must materialize (the node FRs re-subsample them spatially);
    # then ALL node FactorizedReduce ops + InputChoice sums + the cell channel concat
    # collapse into ONE pallas_call with 4 dense inputs and dense half-width weights.
    t0 = apply_preproc(cell["preproc0"], s0, post_relu=True)
    t1 = apply_preproc(cell["preproc1"], s1, post_relu=True)
    t0_ee, t0_oo = _fr_split(t0)
    t1_ee, t1_oo = _fr_split(t1)
    y = fused_groups([t0_ee, t0_oo, t1_ee, t1_oo], cell["node_ws"],
                     _reduce_node_plan(n_nodes), cell["node_shift"],
                     post_relu=post_relu)
    B, Hc, Wc, _ = t1.shape
    return y.reshape(B, Hc // 2, Wc // 2, -1)


# ----------------------------------------------------------------------------
# Parameter construction (deterministic; mirrors CNN.__init__ bookkeeping; BN folded;
# all per-call constant work -- scale folding, shift sums, column splits -- hoisted here)
# ----------------------------------------------------------------------------
class _KeyGen:
    def __init__(self, key):
        self.key = key

    def __call__(self):
        self.key, k = jax.random.split(self.key)
        return k


_BN_EPS = 1e-5


def _bn_scale(c):
    # Fresh eval-mode BatchNorm: gamma=1 (or affine=False), beta=0, mean=0, var=1.
    return jnp.full((c,), 1.0 / (1.0 + _BN_EPS) ** 0.5, jnp.float32)


def _std_params(kg, cin, cout):
    w = 0.1 * jax.random.normal(kg(), (cin, cout), jnp.float32)
    return {"w": (w * _bn_scale(cout)).astype(jnp.bfloat16),
            "shift": jnp.zeros((cout,), jnp.float32)}


def _fr_params(kg, cin, cout):
    half = cout // 2
    s = _bn_scale(cout)
    w1 = 0.1 * jax.random.normal(kg(), (cin, half), jnp.float32) * s[:half]
    w2 = 0.1 * jax.random.normal(kg(), (cin, half), jnp.float32) * s[half:]
    return {"w1": w1.astype(jnp.bfloat16), "w2": w2.astype(jnp.bfloat16),
            "shift": jnp.zeros((cout,), jnp.float32)}


def build_params(key, *, in_channels, channels, n_classes, n_layers, n_nodes,
                 stem_multiplier):
    kg = _KeyGen(key)
    params = {}

    c_cur = stem_multiplier * channels
    w_stem = 0.1 * jax.random.normal(kg(), (9 * in_channels, c_cur), jnp.float32)
    params["stem"] = {"w": (w_stem * _bn_scale(c_cur)).astype(jnp.bfloat16),
                      "shift": jnp.zeros((c_cur,), jnp.float32)}

    channels_pp, channels_p, c_cur = c_cur, c_cur, channels
    cells = []
    reduction_p, reduction = False, False
    for i in range(n_layers):
        reduction_p, reduction = reduction, False
        if i in (n_layers // 3, 2 * n_layers // 3):
            c_cur *= 2
            reduction = True
        p0 = (_fr_params(kg, channels_pp, c_cur) if reduction_p
              else _std_params(kg, channels_pp, c_cur))
        p1 = _std_params(kg, channels_p, c_cur)
        if reduction:
            # 'skipconnect' on the two stride-2 edges of every node (own FR params per
            # edge), dense half-width weights, stacked along the node/weight list.
            node_ws = []
            for _n in range(n_nodes):
                e0 = _fr_params(kg, c_cur, c_cur)    # edge from t0
                e1 = _fr_params(kg, c_cur, c_cur)    # edge from t1
                node_ws += [e0["w1"], e1["w1"], e0["w2"], e1["w2"]]
            cell = {"preproc0": p0, "preproc1": p1,
                    "node_ws": node_ws,
                    "node_shift": jnp.zeros((n_nodes * c_cur,), jnp.float32)}
        else:
            half = c_cur // 2
            if reduction_p:
                # preproc0 = FR (dense halves), preproc1 = StdConv split into column
                # halves at build time so the node sum stays dense per parity group.
                cell = {"ws": [p0["w1"], p0["w2"],
                               p1["w"][:, :half], p1["w"][:, half:]],
                        "shift": p0["shift"] + p1["shift"]}
            else:
                cell = {"ws": [p0["w"], p1["w"]],
                        "shift": p0["shift"] + p1["shift"]}
        cells.append(cell)
        channels_pp, channels_p = channels_p, c_cur * n_nodes
    params["cells"] = cells

    params["head"] = {
        "w": (0.1 * jax.random.normal(kg(), (channels_p, n_classes), jnp.float32)
              ).astype(jnp.bfloat16),
        "b": jnp.zeros((n_classes,), jnp.float32),
    }
    return params


# ----------------------------------------------------------------------------
# Forward pass (eval mode)
# ----------------------------------------------------------------------------
@partial(jax.jit, static_argnames=("n_nodes",))
def cnn_forward(params, x_nchw, *, n_nodes):
    x = jnp.transpose(x_nchw, (0, 2, 3, 1)).astype(jnp.bfloat16)   # NCHW -> NHWC, bf16
    s0 = s1 = stem_forward(x, params["stem"])
    cells = params["cells"]
    n_cells = len(cells)
    for idx, cell in enumerate(cells):
        # Every cell output feeds only ReLU-first consumers except the last one,
        # which feeds GAP+Linear un-ReLU'd -> fold ReLU into the producer epilogue.
        post_relu = idx != n_cells - 1
        if "node_ws" in cell:                        # reduction cell
            out = reduction_cell_forward(cell, s0, s1, n_nodes, post_relu=post_relu)
        else:                                        # normal cell
            out = normal_cell_forward(cell, s0, s1, n_nodes, post_relu=post_relu)
        s0, s1 = s1, out
    return head_forward(s1, params["head"])


# ----------------------------------------------------------------------------
if __name__ == "__main__":
    key = jax.random.PRNGKey(0)
    kx, kp = jax.random.split(key)

    B, Cin, H, W = 2, 4, 16, 16
    channels, n_classes, n_layers, n_nodes = 8, 10, 4, 2   # exercises normal, reduction
                                                           # and FR-preproc normal cells

    x = jax.random.normal(kx, (B, Cin, H, W), jnp.float32)
    params = build_params(kp, in_channels=Cin, channels=channels,
                          n_classes=n_classes, n_layers=n_layers,
                          n_nodes=n_nodes, stem_multiplier=3)

    logits = cnn_forward(params, x, n_nodes=n_nodes)
    jax.block_until_ready(logits)
    assert logits.shape == (B, n_classes), logits.shape
    assert bool(jnp.all(jnp.isfinite(logits)))
    print("KERNEL_OK")
</pallas_src>

<mosaic_0001>
module attributes {stable_mosaic.version = 11 : i64} {
  func.func @_fused_group_kernel(%arg0: i32, %arg1: memref<256x24xbf16, #tpu.memory_space<vmem>>, %arg2: memref<256x24xbf16, #tpu.memory_space<vmem>>, %arg3: memref<24x8xbf16, #tpu.memory_space<vmem>>, %arg4: memref<24x8xbf16, #tpu.memory_space<vmem>>, %arg5: memref<1x8xf32, #tpu.memory_space<vmem>>, %arg6: memref<256x16xbf16, #tpu.memory_space<vmem>>) attributes {dimension_semantics = [#tpu.dimension_semantics<parallel>], iteration_bounds = array<i64: 2>, scalar_prefetch = 0 : i64, scratch_operands = 0 : i64, tpu.core_type = #tpu.core_type<tc>, window_params = [{transform_indices = @transform_0, window_bounds = array<i64: 256, 24>}, {transform_indices = @transform_1, window_bounds = array<i64: 256, 24>}, {pipeline_mode = #tpu.pipeline_mode<synchronous>, transform_indices = @transform_2, window_bounds = array<i64: 24, 8>}, {pipeline_mode = #tpu.pipeline_mode<synchronous>, transform_indices = @transform_3, window_bounds = array<i64: 24, 8>}, {pipeline_mode = #tpu.pipeline_mode<synchronous>, transform_indices = @transform_4, window_bounds = array<i64: 1, 8>}, {transform_indices = @transform_5, window_bounds = array<i64: 256, 16>}]} {
    %c0 = arith.constant 0 : index
    %c0_0 = arith.constant 0 : index
    %0 = vector.load %arg1[%c0, %c0_0] : memref<256x24xbf16, #tpu.memory_space<vmem>>, vector<256x24xbf16>
    %c0_1 = arith.constant 0 : index
    %c0_2 = arith.constant 0 : index
    %1 = vector.load %arg2[%c0_1, %c0_2] : memref<256x24xbf16, #tpu.memory_space<vmem>>, vector<256x24xbf16>
    %c0_3 = arith.constant 0 : index
    %c0_4 = arith.constant 0 : index
    %2 = vector.load %arg3[%c0_3, %c0_4] : memref<24x8xbf16, #tpu.memory_space<vmem>>, vector<24x8xbf16>
    %cst = arith.constant dense<0.000000e+00> : vector<256x8xf32>
    %3 = tpu.matmul %0, %2, %cst {dimension_numbers = #tpu.dot_dimension_numbers<[1], [0], [0], [1], [0, 0, 1, 1], [], []>} : vector<256x24xbf16>, vector<24x8xbf16>, vector<256x8xf32> -> vector<256x8xf32>
    %c0_5 = arith.constant 0 : index
    %c0_6 = arith.constant 0 : index
    %4 = vector.load %arg4[%c0_5, %c0_6] : memref<24x8xbf16, #tpu.memory_space<vmem>>, vector<24x8xbf16>
    %cst_7 = arith.constant dense<0.000000e+00> : vector<256x8xf32>
    %5 = tpu.matmul %1, %4, %cst_7 {dimension_numbers = #tpu.dot_dimension_numbers<[1], [0], [0], [1], [0, 0, 1, 1], [], []>} : vector<256x24xbf16>, vector<24x8xbf16>, vector<256x8xf32> -> vector<256x8xf32>
    %6 = arith.addf %3, %5 : vector<256x8xf32>
    %c0_8 = arith.constant 0 : index
    %c0_9 = arith.constant 0 : index
    %7 = vector.load %arg5[%c0_8, %c0_9] : memref<1x8xf32, #tpu.memory_space<vmem>>, vector<1x8xf32>
    %8 = vector.broadcast %7 : vector<1x8xf32> to vector<256x8xf32>
    %9 = arith.addf %6, %8 : vector<256x8xf32>
    %cst_10 = arith.constant 0.000000e+00 : f32
    %10 = vector.broadcast %cst_10 : f32 to vector<256x8xf32>
    %11 = arith.maximumf %9, %10 : vector<256x8xf32>
    %12 = arith.truncf %11 : vector<256x8xf32> to vector<256x8xbf16>
    %c0_11 = arith.constant 0 : index
    %c0_12 = arith.constant 0 : index
    %13 = vector.load %arg6[%c0_11, %c0_12] : memref<256x16xbf16, #tpu.memory_space<vmem>>, vector<256x8xbf16>
    tpu.vector_store %arg6[%c0_11, %c0_12], %12 {strides = array<i32>} : memref<256x16xbf16, #tpu.memory_space<vmem>>, vector<256x8xbf16>,
    %c0_13 = arith.constant 0 : index
    %c8 = arith.constant 8 : index
    %14 = vector.load %arg6[%c0_13, %c8] : memref<256x16xbf16, #tpu.memory_space<vmem>>, vector<256x8xbf16>
    tpu.vector_store %arg6[%c0_13, %c8], %12 {strides = array<i32>} : memref<256x16xbf16, #tpu.memory_space<vmem>>, vector<256x8xbf16>,
    return
  }
  func.func @transform_0(%arg0: i32) -> (i32, i32) {
    %c0_i32 = arith.constant 0 : i32
    %c0_i32_0 = arith.constant 0 : i32
    return %arg0, %c0_i32 : i32, i32
  }
  func.func @transform_1(%arg0: i32) -> (i32, i32) {
    %c0_i32 = arith.constant 0 : i32
    %c0_i32_0 = arith.constant 0 : i32
    return %arg0, %c0_i32 : i32, i32
  }
  func.func @transform_2(%arg0: i32) -> (i32, i32) {
    %c0_i32 = arith.constant 0 : i32
    %c0_i32_0 = arith.constant 0 : i32
    %c0_i32_1 = arith.constant 0 : i32
    return %c0_i32, %c0_i32_0 : i32, i32
  }
  func.func @transform_3(%arg0: i32) -> (i32, i32) {
    %c0_i32 = arith.constant 0 : i32
    %c0_i32_0 = arith.constant 0 : i32
    %c0_i32_1 = arith.constant 0 : i32
    return %c0_i32, %c0_i32_0 : i32, i32
  }
  func.func @transform_4(%arg0: i32) -> (i32, i32) {
    %c0_i32 = arith.constant 0 : i32
    %c0_i32_0 = arith.constant 0 : i32
    %c0_i32_1 = arith.constant 0 : i32
    return %c0_i32, %c0_i32_0 : i32, i32
  }
  func.func @transform_5(%arg0: i32) -> (i32, i32) {
    %c0_i32 = arith.constant 0 : i32
    %c0_i32_0 = arith.constant 0 : i32
    return %arg0, %c0_i32 : i32, i32
  }
}

module attributes {stable_mosaic.version = 11 : i64} {
  func.func @_fused_group_kernel(%arg0: i32, %arg1: memref<256x36xbf16, #tpu.memory_space<vmem>>, %arg2: memref<36x24xbf16, #tpu.memory_space<vmem>>, %arg3: memref<1x24xf32, #tpu.memory_space<vmem>>, %arg4: memref<256x24xbf16, #tpu.memory_space<vmem>>) attributes {dimension_semantics = [#tpu.dimension_semantics<parallel>], iteration_bounds = array<i64: 2>, scalar_prefetch = 0 : i64, scratch_operands = 0 : i64, tpu.core_type = #tpu.core_type<tc>, window_params = [{transform_indices = @transform_0, window_bounds = array<i64: 256, 36>}, {pipeline_mode = #tpu.pipeline_mode<synchronous>, transform_indices = @transform_1, window_bounds = array<i64: 36, 24>}, {pipeline_mode = #tpu.pipeline_mode<synchronous>, transform_indices = @transform_2, window_bounds = array<i64: 1, 24>}, {transform_indices = @transform_3, window_bounds = array<i64: 256, 24>}]} {
    %c0 = arith.constant 0 : index
    %c0_0 = arith.constant 0 : index
    %0 = vector.load %arg1[%c0, %c0_0] : memref<256x36xbf16, #tpu.memory_space<vmem>>, vector<256x36xbf16>
    %c0_1 = arith.constant 0 : index
    %c0_2 = arith.constant 0 : index
    %1 = vector.load %arg2[%c0_1, %c0_2] : memref<36x24xbf16, #tpu.memory_space<vmem>>, vector<36x24xbf16>
    %cst = arith.constant dense<0.000000e+00> : vector<256x24xf32>
    %2 = tpu.matmul %0, %1, %cst {dimension_numbers = #tpu.dot_dimension_numbers<[1], [0], [0], [1], [0, 0, 1, 1], [], []>} : vector<256x36xbf16>, vector<36x24xbf16>, vector<256x24xf32> -> vector<256x24xf32>
    %c0_3 = arith.constant 0 : index
    %c0_4 = arith.constant 0 : index
    %3 = vector.load %arg3[%c0_3, %c0_4] : memref<1x24xf32, #tpu.memory_space<vmem>>, vector<1x24xf32>
    %4 = vector.broadcast %3 : vector<1x24xf32> to vector<256x24xf32>
    %5 = arith.addf %2, %4 : vector<256x24xf32>
    %cst_5 = arith.constant 0.000000e+00 : f32
    %6 = vector.broadcast %cst_5 : f32 to vector<256x24xf32>
    %7 = arith.maximumf %5, %6 : vector<256x24xf32>
    %8 = arith.truncf %7 : vector<256x24xf32> to vector<256x24xbf16>
    %c0_6 = arith.constant 0 : index
    %c0_7 = arith.constant 0 : index
    %9 = vector.load %arg4[%c0_6, %c0_7] : memref<256x24xbf16, #tpu.memory_space<vmem>>, vector<256x24xbf16>
    tpu.vector_store %arg4[%c0_6, %c0_7], %8 {strides = array<i32>} : memref<256x24xbf16, #tpu.memory_space<vmem>>, vector<256x24xbf16>,
    return
  }
  func.func @transform_0(%arg0: i32) -> (i32, i32) {
    %c0_i32 = arith.constant 0 : i32
    %c0_i32_0 = arith.constant 0 : i32
    return %arg0, %c0_i32 : i32, i32
  }
  func.func @transform_1(%arg0: i32) -> (i32, i32) {
    %c0_i32 = arith.constant 0 : i32
    %c0_i32_0 = arith.constant 0 : i32
    %c0_i32_1 = arith.constant 0 : i32
    return %c0_i32, %c0_i32_0 : i32, i32
  }
  func.func @transform_2(%arg0: i32) -> (i32, i32) {
    %c0_i32 = arith.constant 0 : i32
    %c0_i32_0 = arith.constant 0 : i32
    %c0_i32_1 = arith.constant 0 : i32
    return %c0_i32, %c0_i32_0 : i32, i32
  }
  func.func @transform_3(%arg0: i32) -> (i32, i32) {
    %c0_i32 = arith.constant 0 : i32
    %c0_i32_0 = arith.constant 0 : i32
    return %arg0, %c0_i32 : i32, i32
  }
}

module attributes {stable_mosaic.version = 11 : i64} {
  func.func @_fused_group_kernel(%arg0: i32, %arg1: memref<128x16xbf16, #tpu.memory_space<vmem>>, %arg2: memref<128x16xbf16, #tpu.memory_space<vmem>>, %arg3: memref<16x16xbf16, #tpu.memory_space<vmem>>, %arg4: memref<16x16xbf16, #tpu.memory_space<vmem>>, %arg5: memref<1x32xf32, #tpu.memory_space<vmem>>, %arg6: memref<128x32xbf16, #tpu.memory_space<vmem>>) attributes {dimension_semantics = [#tpu.dimension_semantics<parallel>], iteration_bounds = array<i64: 1>, scalar_prefetch = 0 : i64, scratch_operands = 0 : i64, tpu.core_type = #tpu.core_type<tc>, window_params = [{transform_indices = @transform_0, window_bounds = array<i64: 128, 16>}, {transform_indices = @transform_1, window_bounds = array<i64: 128, 16>}, {pipeline_mode = #tpu.pipeline_mode<synchronous>, transform_indices = @transform_2, window_bounds = array<i64: 16, 16>}, {pipeline_mode = #tpu.pipeline_mode<synchronous>, transform_indices = @transform_3, window_bounds = array<i64: 16, 16>}, {pipeline_mode = #tpu.pipeline_mode<synchronous>, transform_indices = @transform_4, window_bounds = array<i64: 1, 32>}, {transform_indices = @transform_5, window_bounds = array<i64: 128, 32>}]} {
    %c0 = arith.constant 0 : index
    %c0_0 = arith.constant 0 : index
    %0 = vector.load %arg1[%c0, %c0_0] : memref<128x16xbf16, #tpu.memory_space<vmem>>, vector<128x16xbf16>
    %c0_1 = arith.constant 0 : index
    %c0_2 = arith.constant 0 : index
    %1 = vector.load %arg2[%c0_1, %c0_2] : memref<128x16xbf16, #tpu.memory_space<vmem>>, vector<128x16xbf16>
    %c0_3 = arith.constant 0 : index
    %c0_4 = arith.constant 0 : index
    %2 = vector.load %arg3[%c0_3, %c0_4] : memref<16x16xbf16, #tpu.memory_space<vmem>>, vector<16x16xbf16>
    %cst = arith.constant dense<0.000000e+00> : vector<128x16xf32>
    %3 = tpu.matmul %0, %2, %cst {dimension_numbers = #tpu.dot_dimension_numbers<[1], [0], [0], [1], [0, 0, 1, 1], [], []>} : vector<128x16xbf16>, vector<16x16xbf16>, vector<128x16xf32> -> vector<128x16xf32>
    %c0_5 = arith.constant 0 : index
    %c0_6 = arith.constant 0 : index
    %4 = vector.load %arg5[%c0_5, %c0_6] : memref<1x32xf32, #tpu.memory_space<vmem>>, vector<1x16xf32>
    %5 = vector.broadcast %4 : vector<1x16xf32> to vector<128x16xf32>
    %6 = arith.addf %3, %5 : vector<128x16xf32>
    %cst_7 = arith.constant 0.000000e+00 : f32
    %7 = vector.broadcast %cst_7 : f32 to vector<128x16xf32>
    %8 = arith.maximumf %6, %7 : vector<128x16xf32>
    %9 = arith.truncf %8 : vector<128x16xf32> to vector<128x16xbf16>
    %c0_8 = arith.constant 0 : index
    %c0_9 = arith.constant 0 : index
    %10 = vector.load %arg4[%c0_8, %c0_9] : memref<16x16xbf16, #tpu.memory_space<vmem>>, vector<16x16xbf16>
    %cst_10 = arith.constant dense<0.000000e+00> : vector<128x16xf32>
    %11 = tpu.matmul %1, %10, %cst_10 {dimension_numbers = #tpu.dot_dimension_numbers<[1], [0], [0], [1], [0, 0, 1, 1], [], []>} : vector<128x16xbf16>, vector<16x16xbf16>, vector<128x16xf32> -> vector<128x16xf32>
    %c0_11 = arith.constant 0 : index
    %c16 = arith.constant 16 : index
    %12 = vector.load %arg5[%c0_11, %c16] : memref<1x32xf32, #tpu.memory_space<vmem>>, vector<1x16xf32>
    %13 = vector.broadcast %12 : vector<1x16xf32> to vector<128x16xf32>
    %14 = arith.addf %11, %13 : vector<128x16xf32>
    %cst_12 = arith.constant 0.000000e+00 : f32
    %15 = vector.broadcast %cst_12 : f32 to vector<128x16xf32>
    %16 = arith.maximumf %14, %15 : vector<128x16xf32>
    %17 = arith.truncf %16 : vector<128x16xf32> to vector<128x16xbf16>
    %c0_13 = arith.constant 0 : index
    %c0_14 = arith.constant 0 : index
    %18 = vector.load %arg6[%c0_13, %c0_14] : memref<128x32xbf16, #tpu.memory_space<vmem>>, vector<128x16xbf16>
    tpu.vector_store %arg6[%c0_13, %c0_14], %9 {strides = array<i32>} : memref<128x32xbf16, #tpu.memory_space<vmem>>, vector<128x16xbf16>,
    %c0_15 = arith.constant 0 : index
    %c16_16 = arith.constant 16 : index
    %19 = vector.load %arg6[%c0_15, %c16_16] : memref<128x32xbf16, #tpu.memory_space<vmem>>, vector<128x16xbf16>
    tpu.vector_store %arg6[%c0_15, %c16_16], %17 {strides = array<i32>} : memref<128x32xbf16, #tpu.memory_space<vmem>>, vector<128x16xbf16>,
    return
  }
  func.func @transform_0(%arg0: i32) -> (i32, i32) {
    %c0_i32 = arith.constant 0 : i32
    %c0_i32_0 = arith.constant 0 : i32
    return %arg0, %c0_i32 : i32, i32
  }
  func.func @transform_1(%arg0: i32) -> (i32, i32) {
    %c0_i32 = arith.constant 0 : i32
    %c0_i32_0 = arith.constant 0 : i32
    return %arg0, %c0_i32 : i32, i32
  }
  func.func @transform_2(%arg0: i32) -> (i32, i32) {
    %c0_i32 = arith.constant 0 : i32
    %c0_i32_0 = arith.constant 0 : i32
    %c0_i32_1 = arith.constant 0 : i32
    return %c0_i32, %c0_i32_0 : i32, i32
  }
  func.func @transform_3(%arg0: i32) -> (i32, i32) {
    %c0_i32 = arith.constant 0 : i32
    %c0_i32_0 = arith.constant 0 : i32
    %c0_i32_1 = arith.constant 0 : i32
    return %c0_i32, %c0_i32_0 : i32, i32
  }
  func.func @transform_4(%arg0: i32) -> (i32, i32) {
    %c0_i32 = arith.constant 0 : i32
    %c0_i32_0 = arith.constant 0 : i32
    %c0_i32_1 = arith.constant 0 : i32
    return %c0_i32, %c0_i32_0 : i32, i32
  }
  func.func @transform_5(%arg0: i32) -> (i32, i32) {
    %c0_i32 = arith.constant 0 : i32
    %c0_i32_0 = arith.constant 0 : i32
    return %arg0, %c0_i32 : i32, i32
  }
}

module attributes {stable_mosaic.version = 11 : i64} {
  func.func @_fused_group_kernel(%arg0: i32, %arg1: memref<256x16xbf16, #tpu.memory_space<vmem>>, %arg2: memref<16x16xbf16, #tpu.memory_space<vmem>>, %arg3: memref<1x16xf32, #tpu.memory_space<vmem>>, %arg4: memref<256x16xbf16, #tpu.memory_space<vmem>>) attributes {dimension_semantics = [#tpu.dimension_semantics<parallel>], iteration_bounds = array<i64: 2>, scalar_prefetch = 0 : i64, scratch_operands = 0 : i64, tpu.core_type = #tpu.core_type<tc>, window_params = [{transform_indices = @transform_0, window_bounds = array<i64: 256, 16>}, {pipeline_mode = #tpu.pipeline_mode<synchronous>, transform_indices = @transform_1, window_bounds = array<i64: 16, 16>}, {pipeline_mode = #tpu.pipeline_mode<synchronous>, transform_indices = @transform_2, window_bounds = array<i64: 1, 16>}, {transform_indices = @transform_3, window_bounds = array<i64: 256, 16>}]} {
    %c0 = arith.constant 0 : index
    %c0_0 = arith.constant 0 : index
    %0 = vector.load %arg1[%c0, %c0_0] : memref<256x16xbf16, #tpu.memory_space<vmem>>, vector<256x16xbf16>
    %c0_1 = arith.constant 0 : index
    %c0_2 = arith.constant 0 : index
    %1 = vector.load %arg2[%c0_1, %c0_2] : memref<16x16xbf16, #tpu.memory_space<vmem>>, vector<16x16xbf16>
    %cst = arith.constant dense<0.000000e+00> : vector<256x16xf32>
    %2 = tpu.matmul %0, %1, %cst {dimension_numbers = #tpu.dot_dimension_numbers<[1], [0], [0], [1], [0, 0, 1, 1], [], []>} : vector<256x16xbf16>, vector<16x16xbf16>, vector<256x16xf32> -> vector<256x16xf32>
    %c0_3 = arith.constant 0 : index
    %c0_4 = arith.constant 0 : index
    %3 = vector.load %arg3[%c0_3, %c0_4] : memref<1x16xf32, #tpu.memory_space<vmem>>, vector<1x16xf32>
    %4 = vector.broadcast %3 : vector<1x16xf32> to vector<256x16xf32>
    %5 = arith.addf %2, %4 : vector<256x16xf32>
    %cst_5 = arith.constant 0.000000e+00 : f32
    %6 = vector.broadcast %cst_5 : f32 to vector<256x16xf32>
    %7 = arith.maximumf %5, %6 : vector<256x16xf32>
    %8 = arith.truncf %7 : vector<256x16xf32> to vector<256x16xbf16>
    %c0_6 = arith.constant 0 : index
    %c0_7 = arith.constant 0 : index
    %9 = vector.load %arg4[%c0_6, %c0_7] : memref<256x16xbf16, #tpu.memory_space<vmem>>, vector<256x16xbf16>
    tpu.vector_store %arg4[%c0_6, %c0_7], %8 {strides = array<i32>} : memref<256x16xbf16, #tpu.memory_space<vmem>>, vector<256x16xbf16>,
    return
  }
  func.func @transform_0(%arg0: i32) -> (i32, i32) {
    %c0_i32 = arith.constant 0 : i32
    %c0_i32_0 = arith.constant 0 : i32
    return %arg0, %c0_i32 : i32, i32
  }
  func.func @transform_1(%arg0: i32) -> (i32, i32) {
    %c0_i32 = arith.constant 0 : i32
    %c0_i32_0 = arith.constant 0 : i32
    %c0_i32_1 = arith.constant 0 : i32
    return %c0_i32, %c0_i32_0 : i32, i32
  }
  func.func @transform_2(%arg0: i32) -> (i32, i32) {
    %c0_i32 = arith.constant 0 : i32
    %c0_i32_0 = arith.constant 0 : i32
    %c0_i32_1 = arith.constant 0 : i32
    return %c0_i32, %c0_i32_0 : i32, i32
  }
  func.func @transform_3(%arg0: i32) -> (i32, i32) {
    %c0_i32 = arith.constant 0 : i32
    %c0_i32_0 = arith.constant 0 : i32
    return %arg0, %c0_i32 : i32, i32
  }
}

module attributes {stable_mosaic.version = 11 : i64} {
  func.func @_fused_group_kernel(%arg0: i32, %arg1: memref<256x24xbf16, #tpu.memory_space<vmem>>, %arg2: memref<24x16xbf16, #tpu.memory_space<vmem>>, %arg3: memref<1x16xf32, #tpu.memory_space<vmem>>, %arg4: memref<256x16xbf16, #tpu.memory_space<vmem>>) attributes {dimension_semantics = [#tpu.dimension_semantics<parallel>], iteration_bounds = array<i64: 2>, scalar_prefetch = 0 : i64, scratch_operands = 0 : i64, tpu.core_type = #tpu.core_type<tc>, window_params = [{transform_indices = @transform_0, window_bounds = array<i64: 256, 24>}, {pipeline_mode = #tpu.pipeline_mode<synchronous>, transform_indices = @transform_1, window_bounds = array<i64: 24, 16>}, {pipeline_mode = #tpu.pipeline_mode<synchronous>, transform_indices = @transform_2, window_bounds = array<i64: 1, 16>}, {transform_indices = @transform_3, window_bounds = array<i64: 256, 16>}]} {
    %c0 = arith.constant 0 : index
    %c0_0 = arith.constant 0 : index
    %0 = vector.load %arg1[%c0, %c0_0] : memref<256x24xbf16, #tpu.memory_space<vmem>>, vector<256x24xbf16>
    %c0_1 = arith.constant 0 : index
    %c0_2 = arith.constant 0 : index
    %1 = vector.load %arg2[%c0_1, %c0_2] : memref<24x16xbf16, #tpu.memory_space<vmem>>, vector<24x16xbf16>
    %cst = arith.constant dense<0.000000e+00> : vector<256x16xf32>
    %2 = tpu.matmul %0, %1, %cst {dimension_numbers = #tpu.dot_dimension_numbers<[1], [0], [0], [1], [0, 0, 1, 1], [], []>} : vector<256x24xbf16>, vector<24x16xbf16>, vector<256x16xf32> -> vector<256x16xf32>
    %c0_3 = arith.constant 0 : index
    %c0_4 = arith.constant 0 : index
    %3 = vector.load %arg3[%c0_3, %c0_4] : memref<1x16xf32, #tpu.memory_space<vmem>>, vector<1x16xf32>
    %4 = vector.broadcast %3 : vector<1x16xf32> to vector<256x16xf32>
    %5 = arith.addf %2, %4 : vector<256x16xf32>
    %cst_5 = arith.constant 0.000000e+00 : f32
    %6 = vector.broadcast %cst_5 : f32 to vector<256x16xf32>
    %7 = arith.maximumf %5, %6 : vector<256x16xf32>
    %8 = arith.truncf %7 : vector<256x16xf32> to vector<256x16xbf16>
    %c0_6 = arith.constant 0 : index
    %c0_7 = arith.constant 0 : index
    %9 = vector.load %arg4[%c0_6, %c0_7] : memref<256x16xbf16, #tpu.memory_space<vmem>>, vector<256x16xbf16>
    tpu.vector_store %arg4[%c0_6, %c0_7], %8 {strides = array<i32>} : memref<256x16xbf16, #tpu.memory_space<vmem>>, vector<256x16xbf16>,
    return
  }
  func.func @transform_0(%arg0: i32) -> (i32, i32) {
    %c0_i32 = arith.constant 0 : i32
    %c0_i32_0 = arith.constant 0 : i32
    return %arg0, %c0_i32 : i32, i32
  }
  func.func @transform_1(%arg0: i32) -> (i32, i32) {
    %c0_i32 = arith.constant 0 : i32
    %c0_i32_0 = arith.constant 0 : i32
    %c0_i32_1 = arith.constant 0 : i32
    return %c0_i32, %c0_i32_0 : i32, i32
  }
  func.func @transform_2(%arg0: i32) -> (i32, i32) {
    %c0_i32 = arith.constant 0 : i32
    %c0_i32_0 = arith.constant 0 : i32
    %c0_i32_1 = arith.constant 0 : i32
    return %c0_i32, %c0_i32_0 : i32, i32
  }
  func.func @transform_3(%arg0: i32) -> (i32, i32) {
    %c0_i32 = arith.constant 0 : i32
    %c0_i32_0 = arith.constant 0 : i32
    return %arg0, %c0_i32 : i32, i32
  }
}

module attributes {stable_mosaic.version = 11 : i64} {
  func.func @_fused_group_kernel(%arg0: i32, %arg1: memref<128x16xbf16, #tpu.memory_space<vmem>>, %arg2: memref<128x16xbf16, #tpu.memory_space<vmem>>, %arg3: memref<128x16xbf16, #tpu.memory_space<vmem>>, %arg4: memref<128x16xbf16, #tpu.memory_space<vmem>>, %arg5: memref<16x8xbf16, #tpu.memory_space<vmem>>, %arg6: memref<16x8xbf16, #tpu.memory_space<vmem>>, %arg7: memref<16x8xbf16, #tpu.memory_space<vmem>>, %arg8: memref<16x8xbf16, #tpu.memory_space<vmem>>, %arg9: memref<16x8xbf16, #tpu.memory_space<vmem>>, %arg10: memref<16x8xbf16, #tpu.memory_space<vmem>>, %arg11: memref<16x8xbf16, #tpu.memory_space<vmem>>, %arg12: memref<16x8xbf16, #tpu.memory_space<vmem>>, %arg13: memref<1x32xf32, #tpu.memory_space<vmem>>, %arg14: memref<128x32xbf16, #tpu.memory_space<vmem>>) attributes {dimension_semantics = [#tpu.dimension_semantics<parallel>], iteration_bounds = array<i64: 1>, scalar_prefetch = 0 : i64, scratch_operands = 0 : i64, tpu.core_type = #tpu.core_type<tc>, window_params = [{transform_indices = @transform_0, window_bounds = array<i64: 128, 16>}, {transform_indices = @transform_1, window_bounds = array<i64: 128, 16>}, {transform_indices = @transform_2, window_bounds = array<i64: 128, 16>}, {transform_indices = @transform_3, window_bounds = array<i64: 128, 16>}, {pipeline_mode = #tpu.pipeline_mode<synchronous>, transform_indices = @transform_4, window_bounds = array<i64: 16, 8>}, {pipeline_mode = #tpu.pipeline_mode<synchronous>, transform_indices = @transform_5, window_bounds = array<i64: 16, 8>}, {pipeline_mode = #tpu.pipeline_mode<synchronous>, transform_indices = @transform_6, window_bounds = array<i64: 16, 8>}, {pipeline_mode = #tpu.pipeline_mode<synchronous>, transform_indices = @transform_7, window_bounds = array<i64: 16, 8>}, {pipeline_mode = #tpu.pipeline_mode<synchronous>, transform_indices = @transform_8, window_bounds = array<i64: 16, 8>}, {pipeline_mode = #tpu.pipeline_mode<synchronous>, transform_indices = @transform_9, window_bounds = array<i64: 16, 8>}, {pipeline_mode = #tpu.pipeline_mode<synchronous>, transform_indices = @transform_10, window_bounds = array<i64: 16, 8>}, {pipeline_mode = #tpu.pipeline_mode<synchronous>, transform_indices = @transform_11, window_bounds = array<i64: 16, 8>}, {pipeline_mode = #tpu.pipeline_mode<synchronous>, transform_indices = @transform_12, window_bounds = array<i64: 1, 32>}, {transform_indices = @transform_13, window_bounds = array<i64: 128, 32>}]} {
    %c0 = arith.constant 0 : index
    %c0_0 = arith.constant 0 : index
    %0 = vector.load %arg1[%c0, %c0_0] : memref<128x16xbf16, #tpu.memory_space<vmem>>, vector<128x16xbf16>
    %c0_1 = arith.constant 0 : index
    %c0_2 = arith.constant 0 : index
    %1 = vector.load %arg2[%c0_1, %c0_2] : memref<128x16xbf16, #tpu.memory_space<vmem>>, vector<128x16xbf16>
    %c0_3 = arith.constant 0 : index
    %c0_4 = arith.constant 0 : index
    %2 = vector.load %arg3[%c0_3, %c0_4] : memref<128x16xbf16, #tpu.memory_space<vmem>>, vector<128x16xbf16>
    %c0_5 = arith.constant 0 : index
    %c0_6 = arith.constant 0 : index
    %3 = vector.load %arg4[%c0_5, %c0_6] : memref<128x16xbf16, #tpu.memory_space<vmem>>, vector<128x16xbf16>
    %c0_7 = arith.constant 0 : index
    %c0_8 = arith.constant 0 : index
    %4 = vector.load %arg5[%c0_7, %c0_8] : memref<16x8xbf16, #tpu.memory_space<vmem>>, vector<16x8xbf16>
    %cst = arith.constant dense<0.000000e+00> : vector<128x8xf32>
    %5 = tpu.matmul %0, %4, %cst {dimension_numbers = #tpu.dot_dimension_numbers<[1], [0], [0], [1], [0, 0, 1, 1], [], []>} : vector<128x16xbf16>, vector<16x8xbf16>, vector<128x8xf32> -> vector<128x8xf32>
    %c0_9 = arith.constant 0 : index
    %c0_10 = arith.constant 0 : index
    %6 = vector.load %arg6[%c0_9, %c0_10] : memref<16x8xbf16, #tpu.memory_space<vmem>>, vector<16x8xbf16>
    %cst_11 = arith.constant dense<0.000000e+00> : vector<128x8xf32>
    %7 = tpu.matmul %2, %6, %cst_11 {dimension_numbers = #tpu.dot_dimension_numbers<[1], [0], [0], [1], [0, 0, 1, 1], [], []>} : vector<128x16xbf16>, vector<16x8xbf16>, vector<128x8xf32> -> vector<128x8xf32>
    %8 = arith.addf %5, %7 : vector<128x8xf32>
    %c0_12 = arith.constant 0 : index
    %c0_13 = arith.constant 0 : index
    %9 = vector.load %arg13[%c0_12, %c0_13] : memref<1x32xf32, #tpu.memory_space<vmem>>, vector<1x8xf32>
    %10 = vector.broadcast %9 : vector<1x8xf32> to vector<128x8xf32>
    %11 = arith.addf %8, %10 : vector<128x8xf32>
    %cst_14 = arith.constant 0.000000e+00 : f32
    %12 = vector.broadcast %cst_14 : f32 to vector<128x8xf32>
    %13 = arith.maximumf %11, %12 : vector<128x8xf32>
    %14 = arith.truncf %13 : vector<128x8xf32> to vector<128x8xbf16>
    %c0_15 = arith.constant 0 : index
    %c0_16 = arith.constant 0 : index
    %15 = vector.load %arg7[%c0_15, %c0_16] : memref<16x8xbf16, #tpu.memory_space<vmem>>, vector<16x8xbf16>
    %cst_17 = arith.constant dense<0.000000e+00> : vector<128x8xf32>
    %16 = tpu.matmul %1, %15, %cst_17 {dimension_numbers = #tpu.dot_dimension_numbers<[1], [0], [0], [1], [0, 0, 1, 1], [], []>} : vector<128x16xbf16>, vector<16x8xbf16>, vector<128x8xf32> -> vector<128x8xf32>
    %c0_18 = arith.constant 0 : index
    %c0_19 = arith.constant 0 : index
    %17 = vector.load %arg8[%c0_18, %c0_19] : memref<16x8xbf16, #tpu.memory_space<vmem>>, vector<16x8xbf16>
    %cst_20 = arith.constant dense<0.000000e+00> : vector<128x8xf32>
    %18 = tpu.matmul %3, %17, %cst_20 {dimension_numbers = #tpu.dot_dimension_numbers<[1], [0], [0], [1], [0, 0, 1, 1], [], []>} : vector<128x16xbf16>, vector<16x8xbf16>, vector<128x8xf32> -> vector<128x8xf32>
    %19 = arith.addf %16, %18 : vector<128x8xf32>
    %c0_21 = arith.constant 0 : index
    %c8 = arith.constant 8 : index
    %20 = vector.load %arg13[%c0_21, %c8] : memref<1x32xf32, #tpu.memory_space<vmem>>, vector<1x8xf32>
    %21 = vector.broadcast %20 : vector<1x8xf32> to vector<128x8xf32>
    %22 = arith.addf %19, %21 : vector<128x8xf32>
    %cst_22 = arith.constant 0.000000e+00 : f32
    %23 = vector.broadcast %cst_22 : f32 to vector<128x8xf32>
    %24 = arith.maximumf %22, %23 : vector<128x8xf32>
    %25 = arith.truncf %24 : vector<128x8xf32> to vector<128x8xbf16>
    %c0_23 = arith.constant 0 : index
    %c0_24 = arith.constant 0 : index
    %26 = vector.load %arg9[%c0_23, %c0_24] : memref<16x8xbf16, #tpu.memory_space<vmem>>, vector<16x8xbf16>
    %cst_25 = arith.constant dense<0.000000e+00> : vector<128x8xf32>
    %27 = tpu.matmul %0, %26, %cst_25 {dimension_numbers = #tpu.dot_dimension_numbers<[1], [0], [0], [1], [0, 0, 1, 1], [], []>} : vector<128x16xbf16>, vector<16x8xbf16>, vector<128x8xf32> -> vector<128x8xf32>
    %c0_26 = arith.constant 0 : index
    %c0_27 = arith.constant 0 : index
    %28 = vector.load %arg10[%c0_26, %c0_27] : memref<16x8xbf16, #tpu.memory_space<vmem>>, vector<16x8xbf16>
    %cst_28 = arith.constant dense<0.000000e+00> : vector<128x8xf32>
    %29 = tpu.matmul %2, %28, %cst_28 {dimension_numbers = #tpu.dot_dimension_numbers<[1], [0], [0], [1], [0, 0, 1, 1], [], []>} : vector<128x16xbf16>, vector<16x8xbf16>, vector<128x8xf32> -> vector<128x8xf32>
    %30 = arith.addf %27, %29 : vector<128x8xf32>
    %c0_29 = arith.constant 0 : index
    %c16 = arith.constant 16 : index
    %31 = vector.load %arg13[%c0_29, %c16] : memref<1x32xf32, #tpu.memory_space<vmem>>, vector<1x8xf32>
    %32 = vector.broadcast %31 : vector<1x8xf32> to vector<128x8xf32>
    %33 = arith.addf %30, %32 : vector<128x8xf32>
    %cst_30 = arith.constant 0.000000e+00 : f32
    %34 = vector.broadcast %cst_30 : f32 to vector<128x8xf32>
    %35 = arith.maximumf %33, %34 : vector<128x8xf32>
    %36 = arith.truncf %35 : vector<128x8xf32> to vector<128x8xbf16>
    %c0_31 = arith.constant 0 : index
    %c0_32 = arith.constant 0 : index
    %37 = vector.load %arg11[%c0_31, %c0_32] : memref<16x8xbf16, #tpu.memory_space<vmem>>, vector<16x8xbf16>
    %cst_33 = arith.constant dense<0.000000e+00> : vector<128x8xf32>
    %38 = tpu.matmul %1, %37, %cst_33 {dimension_numbers = #tpu.dot_dimension_numbers<[1], [0], [0], [1], [0, 0, 1, 1], [], []>} : vector<128x16xbf16>, vector<16x8xbf16>, vector<128x8xf32> -> vector<128x8xf32>
    %c0_34 = arith.constant 0 : index
    %c0_35 = arith.constant 0 : index
    %39 = vector.load %arg12[%c0_34, %c0_35] : memref<16x8xbf16, #tpu.memory_space<vmem>>, vector<16x8xbf16>
    %cst_36 = arith.constant dense<0.000000e+00> : vector<128x8xf32>
    %40 = tpu.matmul %3, %39, %cst_36 {dimension_numbers = #tpu.dot_dimension_numbers<[1], [0], [0], [1], [0, 0, 1, 1], [], []>} : vector<128x16xbf16>, vector<16x8xbf16>, vector<128x8xf32> -> vector<128x8xf32>
    %41 = arith.addf %38, %40 : vector<128x8xf32>
    %c0_37 = arith.constant 0 : index
    %c24 = arith.constant 24 : index
    %42 = vector.load %arg13[%c0_37, %c24] : memref<1x32xf32, #tpu.memory_space<vmem>>, vector<1x8xf32>
    %43 = vector.broadcast %42 : vector<1x8xf32> to vector<128x8xf32>
    %44 = arith.addf %41, %43 : vector<128x8xf32>
    %cst_38 = arith.constant 0.000000e+00 : f32
    %45 = vector.broadcast %cst_38 : f32 to vector<128x8xf32>
    %46 = arith.maximumf %44, %45 : vector<128x8xf32>
    %47 = arith.truncf %46 : vector<128x8xf32> to vector<128x8xbf16>
    %c0_39 = arith.constant 0 : index
    %c0_40 = arith.constant 0 : index
    %48 = vector.load %arg14[%c0_39, %c0_40] : memref<128x32xbf16, #tpu.memory_space<vmem>>, vector<128x8xbf16>
    tpu.vector_store %arg14[%c0_39, %c0_40], %14 {strides = array<i32>} : memref<128x32xbf16, #tpu.memory_space<vmem>>, vector<128x8xbf16>,
    %c0_41 = arith.constant 0 : index
    %c8_42 = arith.constant 8 : index
    %49 = vector.load %arg14[%c0_41, %c8_42] : memref<128x32xbf16, #tpu.memory_space<vmem>>, vector<128x8xbf16>
    tpu.vector_store %arg14[%c0_41, %c8_42], %25 {strides = array<i32>} : memref<128x32xbf16, #tpu.memory_space<vmem>>, vector<128x8xbf16>,
    %c0_43 = arith.constant 0 : index
    %c16_44 = arith.constant 16 : index
    %50 = vector.load %arg14[%c0_43, %c16_44] : memref<128x32xbf16, #tpu.memory_space<vmem>>, vector<128x8xbf16>
    tpu.vector_store %arg14[%c0_43, %c16_44], %36 {strides = array<i32>} : memref<128x32xbf16, #tpu.memory_space<vmem>>, vector<128x8xbf16>,
    %c0_45 = arith.constant 0 : index
    %c24_46 = arith.constant 24 : index
    %51 = vector.load %arg14[%c0_45, %c24_46] : memref<128x32xbf16, #tpu.memory_space<vmem>>, vector<128x8xbf16>
    tpu.vector_store %arg14[%c0_45, %c24_46], %47 {strides = array<i32>} : memref<128x32xbf16, #tpu.memory_space<vmem>>, vector<128x8xbf16>,
    return
  }
  func.func @transform_0(%arg0: i32) -> (i32, i32) {
    %c0_i32 = arith.constant 0 : i32
    %c0_i32_0 = arith.constant 0 : i32
    return %arg0, %c0_i32 : i32, i32
  }
  func.func @transform_1(%arg0: i32) -> (i32, i32) {
    %c0_i32 = arith.constant 0 : i32
    %c0_i32_0 = arith.constant 0 : i32
    return %arg0, %c0_i32 : i32, i32
  }
  func.func @transform_2(%arg0: i32) -> (i32, i32) {
    %c0_i32 = arith.constant 0 : i32
    %c0_i32_0 = arith.constant 0 : i32
    return %arg0, %c0_i32 : i32, i32
  }
  func.func @transform_3(%arg0: i32) -> (i32, i32) {
    %c0_i32 = arith.constant 0 : i32
    %c0_i32_0 = arith.constant 0 : i32
    return %arg0, %c0_i32 : i32, i32
  }
  func.func @transform_4(%arg0: i32) -> (i32, i32) {
    %c0_i32 = arith.constant 0 : i32
    %c0_i32_0 = arith.constant 0 : i32
    %c0_i32_1 = arith.constant 0 : i32
    return %c0_i32, %c0_i32_0 : i32, i32
  }
  func.func @transform_5(%arg0: i32) -> (i32, i32) {
    %c0_i32 = arith.constant 0 : i32
    %c0_i32_0 = arith.constant 0 : i32
    %c0_i32_1 = arith.constant 0 : i32
    return %c0_i32, %c0_i32_0 : i32, i32
  }
  func.func @transform_6(%arg0: i32) -> (i32, i32) {
    %c0_i32 = arith.constant 0 : i32
    %c0_i32_0 = arith.constant 0 : i32
    %c0_i32_1 = arith.constant 0 : i32
    return %c0_i32, %c0_i32_0 : i32, i32
  }
  func.func @transform_7(%arg0: i32) -> (i32, i32) {
    %c0_i32 = arith.constant 0 : i32
    %c0_i32_0 = arith.constant 0 : i32
    %c0_i32_1 = arith.constant 0 : i32
    return %c0_i32, %c0_i32_0 : i32, i32
  }
  func.func @transform_8(%arg0: i32) -> (i32, i32) {
    %c0_i32 = arith.constant 0 : i32
    %c0_i32_0 = arith.constant 0 : i32
    %c0_i32_1 = arith.constant 0 : i32
    return %c0_i32, %c0_i32_0 : i32, i32
  }
  func.func @transform_9(%arg0: i32) -> (i32, i32) {
    %c0_i32 = arith.constant 0 : i32
    %c0_i32_0 = arith.constant 0 : i32
    %c0_i32_1 = arith.constant 0 : i32
    return %c0_i32, %c0_i32_0 : i32, i32
  }
  func.func @transform_10(%arg0: i32) -> (i32, i32) {
    %c0_i32 = arith.constant 0 : i32
    %c0_i32_0 = arith.constant 0 : i32
    %c0_i32_1 = arith.constant 0 : i32
    return %c0_i32, %c0_i32_0 : i32, i32
  }
  func.func @transform_11(%arg0: i32) -> (i32, i32) {
    %c0_i32 = arith.constant 0 : i32
    %c0_i32_0 = arith.constant 0 : i32
    %c0_i32_1 = arith.constant 0 : i32
    return %c0_i32, %c0_i32_0 : i32, i32
  }
  func.func @transform_12(%arg0: i32) -> (i32, i32) {
    %c0_i32 = arith.constant 0 : i32
    %c0_i32_0 = arith.constant 0 : i32
    %c0_i32_1 = arith.constant 0 : i32
    return %c0_i32, %c0_i32_0 : i32, i32
  }
  func.func @transform_13(%arg0: i32) -> (i32, i32) {
    %c0_i32 = arith.constant 0 : i32
    %c0_i32_0 = arith.constant 0 : i32
    return %arg0, %c0_i32 : i32, i32
  }
}

module attributes {stable_mosaic.version = 11 : i64} {
  func.func @_fused_group_kernel(%arg0: i32, %arg1: memref<128x32xbf16, #tpu.memory_space<vmem>>, %arg2: memref<32x32xbf16, #tpu.memory_space<vmem>>, %arg3: memref<1x32xf32, #tpu.memory_space<vmem>>, %arg4: memref<128x32xbf16, #tpu.memory_space<vmem>>) attributes {dimension_semantics = [#tpu.dimension_semantics<parallel>], iteration_bounds = array<i64: 1>, scalar_prefetch = 0 : i64, scratch_operands = 0 : i64, tpu.core_type = #tpu.core_type<tc>, window_params = [{transform_indices = @transform_0, window_bounds = array<i64: 128, 32>}, {pipeline_mode = #tpu.pipeline_mode<synchronous>, transform_indices = @transform_1, window_bounds = array<i64: 32, 32>}, {pipeline_mode = #tpu.pipeline_mode<synchronous>, transform_indices = @transform_2, window_bounds = array<i64: 1, 32>}, {transform_indices = @transform_3, window_bounds = array<i64: 128, 32>}]} {
    %c0 = arith.constant 0 : index
    %c0_0 = arith.constant 0 : index
    %0 = vector.load %arg1[%c0, %c0_0] : memref<128x32xbf16, #tpu.memory_space<vmem>>, vector<128x32xbf16>
    %c0_1 = arith.constant 0 : index
    %c0_2 = arith.constant 0 : index
    %1 = vector.load %arg2[%c0_1, %c0_2] : memref<32x32xbf16, #tpu.memory_space<vmem>>, vector<32x32xbf16>
    %cst = arith.constant dense<0.000000e+00> : vector<128x32xf32>
    %2 = tpu.matmul %0, %1, %cst {dimension_numbers = #tpu.dot_dimension_numbers<[1], [0], [0], [1], [0, 0, 1, 1], [], []>} : vector<128x32xbf16>, vector<32x32xbf16>, vector<128x32xf32> -> vector<128x32xf32>
    %c0_3 = arith.constant 0 : index
    %c0_4 = arith.constant 0 : index
    %3 = vector.load %arg3[%c0_3, %c0_4] : memref<1x32xf32, #tpu.memory_space<vmem>>, vector<1x32xf32>
    %4 = vector.broadcast %3 : vector<1x32xf32> to vector<128x32xf32>
    %5 = arith.addf %2, %4 : vector<128x32xf32>
    %cst_5 = arith.constant 0.000000e+00 : f32
    %6 = vector.broadcast %cst_5 : f32 to vector<128x32xf32>
    %7 = arith.maximumf %5, %6 : vector<128x32xf32>
    %8 = arith.truncf %7 : vector<128x32xf32> to vector<128x32xbf16>
    %c0_6 = arith.constant 0 : index
    %c0_7 = arith.constant 0 : index
    %9 = vector.load %arg4[%c0_6, %c0_7] : memref<128x32xbf16, #tpu.memory_space<vmem>>, vector<128x32xbf16>
    tpu.vector_store %arg4[%c0_6, %c0_7], %8 {strides = array<i32>} : memref<128x32xbf16, #tpu.memory_space<vmem>>, vector<128x32xbf16>,
    return
  }
  func.func @transform_0(%arg0: i32) -> (i32, i32) {
    %c0_i32 = arith.constant 0 : i32
    %c0_i32_0 = arith.constant 0 : i32
    return %arg0, %c0_i32 : i32, i32
  }
  func.func @transform_1(%arg0: i32) -> (i32, i32) {
    %c0_i32 = arith.constant 0 : i32
    %c0_i32_0 = arith.constant 0 : i32
    %c0_i32_1 = arith.constant 0 : i32
    return %c0_i32, %c0_i32_0 : i32, i32
  }
  func.func @transform_2(%arg0: i32) -> (i32, i32) {
    %c0_i32 = arith.constant 0 : i32
    %c0_i32_0 = arith.constant 0 : i32
    %c0_i32_1 = arith.constant 0 : i32
    return %c0_i32, %c0_i32_0 : i32, i32
  }
  func.func @transform_3(%arg0: i32) -> (i32, i32) {
    %c0_i32 = arith.constant 0 : i32
    %c0_i32_0 = arith.constant 0 : i32
    return %arg0, %c0_i32 : i32, i32
  }
}

module attributes {stable_mosaic.version = 11 : i64} {
  func.func @_fused_group_kernel(%arg0: i32, %arg1: memref<32x32xbf16, #tpu.memory_space<vmem>>, %arg2: memref<32x32xbf16, #tpu.memory_space<vmem>>, %arg3: memref<32x32xbf16, #tpu.memory_space<vmem>>, %arg4: memref<32x32xbf16, #tpu.memory_space<vmem>>, %arg5: memref<32x16xbf16, #tpu.memory_space<vmem>>, %arg6: memref<32x16xbf16, #tpu.memory_space<vmem>>, %arg7: memref<32x16xbf16, #tpu.memory_space<vmem>>, %arg8: memref<32x16xbf16, #tpu.memory_space<vmem>>, %arg9: memref<32x16xbf16, #tpu.memory_space<vmem>>, %arg10: memref<32x16xbf16, #tpu.memory_space<vmem>>, %arg11: memref<32x16xbf16, #tpu.memory_space<vmem>>, %arg12: memref<32x16xbf16, #tpu.memory_space<vmem>>, %arg13: memref<1x64xf32, #tpu.memory_space<vmem>>, %arg14: memref<32x64xbf16, #tpu.memory_space<vmem>>) attributes {dimension_semantics = [#tpu.dimension_semantics<parallel>], iteration_bounds = array<i64: 1>, scalar_prefetch = 0 : i64, scratch_operands = 0 : i64, tpu.core_type = #tpu.core_type<tc>, window_params = [{transform_indices = @transform_0, window_bounds = array<i64: 32, 32>}, {transform_indices = @transform_1, window_bounds = array<i64: 32, 32>}, {transform_indices = @transform_2, window_bounds = array<i64: 32, 32>}, {transform_indices = @transform_3, window_bounds = array<i64: 32, 32>}, {pipeline_mode = #tpu.pipeline_mode<synchronous>, transform_indices = @transform_4, window_bounds = array<i64: 32, 16>}, {pipeline_mode = #tpu.pipeline_mode<synchronous>, transform_indices = @transform_5, window_bounds = array<i64: 32, 16>}, {pipeline_mode = #tpu.pipeline_mode<synchronous>, transform_indices = @transform_6, window_bounds = array<i64: 32, 16>}, {pipeline_mode = #tpu.pipeline_mode<synchronous>, transform_indices = @transform_7, window_bounds = array<i64: 32, 16>}, {pipeline_mode = #tpu.pipeline_mode<synchronous>, transform_indices = @transform_8, window_bounds = array<i64: 32, 16>}, {pipeline_mode = #tpu.pipeline_mode<synchronous>, transform_indices = @transform_9, window_bounds = array<i64: 32, 16>}, {pipeline_mode = #tpu.pipeline_mode<synchronous>, transform_indices = @transform_10, window_bounds = array<i64: 32, 16>}, {pipeline_mode = #tpu.pipeline_mode<synchronous>, transform_indices = @transform_11, window_bounds = array<i64: 32, 16>}, {pipeline_mode = #tpu.pipeline_mode<synchronous>, transform_indices = @transform_12, window_bounds = array<i64: 1, 64>}, {transform_indices = @transform_13, window_bounds = array<i64: 32, 64>}]} {
    %c0 = arith.constant 0 : index
    %c0_0 = arith.constant 0 : index
    %0 = vector.load %arg1[%c0, %c0_0] : memref<32x32xbf16, #tpu.memory_space<vmem>>, vector<32x32xbf16>
    %c0_1 = arith.constant 0 : index
    %c0_2 = arith.constant 0 : index
    %1 = vector.load %arg2[%c0_1, %c0_2] : memref<32x32xbf16, #tpu.memory_space<vmem>>, vector<32x32xbf16>
    %c0_3 = arith.constant 0 : index
    %c0_4 = arith.constant 0 : index
    %2 = vector.load %arg3[%c0_3, %c0_4] : memref<32x32xbf16, #tpu.memory_space<vmem>>, vector<32x32xbf16>
    %c0_5 = arith.constant 0 : index
    %c0_6 = arith.constant 0 : index
    %3 = vector.load %arg4[%c0_5, %c0_6] : memref<32x32xbf16, #tpu.memory_space<vmem>>, vector<32x32xbf16>
    %c0_7 = arith.constant 0 : index
    %c0_8 = arith.constant 0 : index
    %4 = vector.load %arg5[%c0_7, %c0_8] : memref<32x16xbf16, #tpu.memory_space<vmem>>, vector<32x16xbf16>
    %cst = arith.constant dense<0.000000e+00> : vector<32x16xf32>
    %5 = tpu.matmul %0, %4, %cst {dimension_numbers = #tpu.dot_dimension_numbers<[1], [0], [0], [1], [0, 0, 1, 1], [], []>} : vector<32x32xbf16>, vector<32x16xbf16>, vector<32x16xf32> -> vector<32x16xf32>
    %c0_9 = arith.constant 0 : index
    %c0_10 = arith.constant 0 : index
    %6 = vector.load %arg6[%c0_9, %c0_10] : memref<32x16xbf16, #tpu.memory_space<vmem>>, vector<32x16xbf16>
    %cst_11 = arith.constant dense<0.000000e+00> : vector<32x16xf32>
    %7 = tpu.matmul %2, %6, %cst_11 {dimension_numbers = #tpu.dot_dimension_numbers<[1], [0], [0], [1], [0, 0, 1, 1], [], []>} : vector<32x32xbf16>, vector<32x16xbf16>, vector<32x16xf32> -> vector<32x16xf32>
    %8 = arith.addf %5, %7 : vector<32x16xf32>
    %c0_12 = arith.constant 0 : index
    %c0_13 = arith.constant 0 : index
    %9 = vector.load %arg13[%c0_12, %c0_13] : memref<1x64xf32, #tpu.memory_space<vmem>>, vector<1x16xf32>
    %10 = vector.broadcast %9 : vector<1x16xf32> to vector<32x16xf32>
    %11 = arith.addf %8, %10 : vector<32x16xf32>
    %cst_14 = arith.constant 0.000000e+00 : f32
    %12 = vector.broadcast %cst_14 : f32 to vector<32x16xf32>
    %13 = arith.maximumf %11, %12 : vector<32x16xf32>
    %14 = arith.truncf %13 : vector<32x16xf32> to vector<32x16xbf16>
    %c0_15 = arith.constant 0 : index
    %c0_16 = arith.constant 0 : index
    %15 = vector.load %arg7[%c0_15, %c0_16] : memref<32x16xbf16, #tpu.memory_space<vmem>>, vector<32x16xbf16>
    %cst_17 = arith.constant dense<0.000000e+00> : vector<32x16xf32>
    %16 = tpu.matmul %1, %15, %cst_17 {dimension_numbers = #tpu.dot_dimension_numbers<[1], [0], [0], [1], [0, 0, 1, 1], [], []>} : vector<32x32xbf16>, vector<32x16xbf16>, vector<32x16xf32> -> vector<32x16xf32>
    %c0_18 = arith.constant 0 : index
    %c0_19 = arith.constant 0 : index
    %17 = vector.load %arg8[%c0_18, %c0_19] : memref<32x16xbf16, #tpu.memory_space<vmem>>, vector<32x16xbf16>
    %cst_20 = arith.constant dense<0.000000e+00> : vector<32x16xf32>
    %18 = tpu.matmul %3, %17, %cst_20 {dimension_numbers = #tpu.dot_dimension_numbers<[1], [0], [0], [1], [0, 0, 1, 1], [], []>} : vector<32x32xbf16>, vector<32x16xbf16>, vector<32x16xf32> -> vector<32x16xf32>
    %19 = arith.addf %16, %18 : vector<32x16xf32>
    %c0_21 = arith.constant 0 : index
    %c16 = arith.constant 16 : index
    %20 = vector.load %arg13[%c0_21, %c16] : memref<1x64xf32, #tpu.memory_space<vmem>>, vector<1x16xf32>
    %21 = vector.broadcast %20 : vector<1x16xf32> to vector<32x16xf32>
    %22 = arith.addf %19, %21 : vector<32x16xf32>
    %cst_22 = arith.constant 0.000000e+00 : f32
    %23 = vector.broadcast %cst_22 : f32 to vector<32x16xf32>
    %24 = arith.maximumf %22, %23 : vector<32x16xf32>
    %25 = arith.truncf %24 : vector<32x16xf32> to vector<32x16xbf16>
    %c0_23 = arith.constant 0 : index
    %c0_24 = arith.constant 0 : index
    %26 = vector.load %arg9[%c0_23, %c0_24] : memref<32x16xbf16, #tpu.memory_space<vmem>>, vector<32x16xbf16>
    %cst_25 = arith.constant dense<0.000000e+00> : vector<32x16xf32>
    %27 = tpu.matmul %0, %26, %cst_25 {dimension_numbers = #tpu.dot_dimension_numbers<[1], [0], [0], [1], [0, 0, 1, 1], [], []>} : vector<32x32xbf16>, vector<32x16xbf16>, vector<32x16xf32> -> vector<32x16xf32>
    %c0_26 = arith.constant 0 : index
    %c0_27 = arith.constant 0 : index
    %28 = vector.load %arg10[%c0_26, %c0_27] : memref<32x16xbf16, #tpu.memory_space<vmem>>, vector<32x16xbf16>
    %cst_28 = arith.constant dense<0.000000e+00> : vector<32x16xf32>
    %29 = tpu.matmul %2, %28, %cst_28 {dimension_numbers = #tpu.dot_dimension_numbers<[1], [0], [0], [1], [0, 0, 1, 1], [], []>} : vector<32x32xbf16>, vector<32x16xbf16>, vector<32x16xf32> -> vector<32x16xf32>
    %30 = arith.addf %27, %29 : vector<32x16xf32>
    %c0_29 = arith.constant 0 : index
    %c32 = arith.constant 32 : index
    %31 = vector.load %arg13[%c0_29, %c32] : memref<1x64xf32, #tpu.memory_space<vmem>>, vector<1x16xf32>
    %32 = vector.broadcast %31 : vector<1x16xf32> to vector<32x16xf32>
    %33 = arith.addf %30, %32 : vector<32x16xf32>
    %cst_30 = arith.constant 0.000000e+00 : f32
    %34 = vector.broadcast %cst_30 : f32 to vector<32x16xf32>
    %35 = arith.maximumf %33, %34 : vector<32x16xf32>
    %36 = arith.truncf %35 : vector<32x16xf32> to vector<32x16xbf16>
    %c0_31 = arith.constant 0 : index
    %c0_32 = arith.constant 0 : index
    %37 = vector.load %arg11[%c0_31, %c0_32] : memref<32x16xbf16, #tpu.memory_space<vmem>>, vector<32x16xbf16>
    %cst_33 = arith.constant dense<0.000000e+00> : vector<32x16xf32>
    %38 = tpu.matmul %1, %37, %cst_33 {dimension_numbers = #tpu.dot_dimension_numbers<[1], [0], [0], [1], [0, 0, 1, 1], [], []>} : vector<32x32xbf16>, vector<32x16xbf16>, vector<32x16xf32> -> vector<32x16xf32>
    %c0_34 = arith.constant 0 : index
    %c0_35 = arith.constant 0 : index
    %39 = vector.load %arg12[%c0_34, %c0_35] : memref<32x16xbf16, #tpu.memory_space<vmem>>, vector<32x16xbf16>
    %cst_36 = arith.constant dense<0.000000e+00> : vector<32x16xf32>
    %40 = tpu.matmul %3, %39, %cst_36 {dimension_numbers = #tpu.dot_dimension_numbers<[1], [0], [0], [1], [0, 0, 1, 1], [], []>} : vector<32x32xbf16>, vector<32x16xbf16>, vector<32x16xf32> -> vector<32x16xf32>
    %41 = arith.addf %38, %40 : vector<32x16xf32>
    %c0_37 = arith.constant 0 : index
    %c48 = arith.constant 48 : index
    %42 = vector.load %arg13[%c0_37, %c48] : memref<1x64xf32, #tpu.memory_space<vmem>>, vector<1x16xf32>
    %43 = vector.broadcast %42 : vector<1x16xf32> to vector<32x16xf32>
    %44 = arith.addf %41, %43 : vector<32x16xf32>
    %cst_38 = arith.constant 0.000000e+00 : f32
    %45 = vector.broadcast %cst_38 : f32 to vector<32x16xf32>
    %46 = arith.maximumf %44, %45 : vector<32x16xf32>
    %47 = arith.truncf %46 : vector<32x16xf32> to vector<32x16xbf16>
    %c0_39 = arith.constant 0 : index
    %c0_40 = arith.constant 0 : index
    %48 = vector.load %arg14[%c0_39, %c0_40] : memref<32x64xbf16, #tpu.memory_space<vmem>>, vector<32x16xbf16>
    tpu.vector_store %arg14[%c0_39, %c0_40], %14 {strides = array<i32>} : memref<32x64xbf16, #tpu.memory_space<vmem>>, vector<32x16xbf16>,
    %c0_41 = arith.constant 0 : index
    %c16_42 = arith.constant 16 : index
    %49 = vector.load %arg14[%c0_41, %c16_42] : memref<32x64xbf16, #tpu.memory_space<vmem>>, vector<32x16xbf16>
    tpu.vector_store %arg14[%c0_41, %c16_42], %25 {strides = array<i32>} : memref<32x64xbf16, #tpu.memory_space<vmem>>, vector<32x16xbf16>,
    %c0_43 = arith.constant 0 : index
    %c32_44 = arith.constant 32 : index
    %50 = vector.load %arg14[%c0_43, %c32_44] : memref<32x64xbf16, #tpu.memory_space<vmem>>, vector<32x16xbf16>
    tpu.vector_store %arg14[%c0_43, %c32_44], %36 {strides = array<i32>} : memref<32x64xbf16, #tpu.memory_space<vmem>>, vector<32x16xbf16>,
    %c0_45 = arith.constant 0 : index
    %c48_46 = arith.constant 48 : index
    %51 = vector.load %arg14[%c0_45, %c48_46] : memref<32x64xbf16, #tpu.memory_space<vmem>>, vector<32x16xbf16>
    tpu.vector_store %arg14[%c0_45, %c48_46], %47 {strides = array<i32>} : memref<32x64xbf16, #tpu.memory_space<vmem>>, vector<32x16xbf16>,
    return
  }
  func.func @transform_0(%arg0: i32) -> (i32, i32) {
    %c0_i32 = arith.constant 0 : i32
    %c0_i32_0 = arith.constant 0 : i32
    return %arg0, %c0_i32 : i32, i32
  }
  func.func @transform_1(%arg0: i32) -> (i32, i32) {
    %c0_i32 = arith.constant 0 : i32
    %c0_i32_0 = arith.constant 0 : i32
    return %arg0, %c0_i32 : i32, i32
  }
  func.func @transform_2(%arg0: i32) -> (i32, i32) {
    %c0_i32 = arith.constant 0 : i32
    %c0_i32_0 = arith.constant 0 : i32
    return %arg0, %c0_i32 : i32, i32
  }
  func.func @transform_3(%arg0: i32) -> (i32, i32) {
    %c0_i32 = arith.constant 0 : i32
    %c0_i32_0 = arith.constant 0 : i32
    return %arg0, %c0_i32 : i32, i32
  }
  func.func @transform_4(%arg0: i32) -> (i32, i32) {
    %c0_i32 = arith.constant 0 : i32
    %c0_i32_0 = arith.constant 0 : i32
    %c0_i32_1 = arith.constant 0 : i32
    return %c0_i32, %c0_i32_0 : i32, i32
  }
  func.func @transform_5(%arg0: i32) -> (i32, i32) {
    %c0_i32 = arith.constant 0 : i32
    %c0_i32_0 = arith.constant 0 : i32
    %c0_i32_1 = arith.constant 0 : i32
    return %c0_i32, %c0_i32_0 : i32, i32
  }
  func.func @transform_6(%arg0: i32) -> (i32, i32) {
    %c0_i32 = arith.constant 0 : i32
    %c0_i32_0 = arith.constant 0 : i32
    %c0_i32_1 = arith.constant 0 : i32
    return %c0_i32, %c0_i32_0 : i32, i32
  }
  func.func @transform_7(%arg0: i32) -> (i32, i32) {
    %c0_i32 = arith.constant 0 : i32
    %c0_i32_0 = arith.constant 0 : i32
    %c0_i32_1 = arith.constant 0 : i32
    return %c0_i32, %c0_i32_0 : i32, i32
  }
  func.func @transform_8(%arg0: i32) -> (i32, i32) {
    %c0_i32 = arith.constant 0 : i32
    %c0_i32_0 = arith.constant 0 : i32
    %c0_i32_1 = arith.constant 0 : i32
    return %c0_i32, %c0_i32_0 : i32, i32
  }
  func.func @transform_9(%arg0: i32) -> (i32, i32) {
    %c0_i32 = arith.constant 0 : i32
    %c0_i32_0 = arith.constant 0 : i32
    %c0_i32_1 = arith.constant 0 : i32
    return %c0_i32, %c0_i32_0 : i32, i32
  }
  func.func @transform_10(%arg0: i32) -> (i32, i32) {
    %c0_i32 = arith.constant 0 : i32
    %c0_i32_0 = arith.constant 0 : i32
    %c0_i32_1 = arith.constant 0 : i32
    return %c0_i32, %c0_i32_0 : i32, i32
  }
  func.func @transform_11(%arg0: i32) -> (i32, i32) {
    %c0_i32 = arith.constant 0 : i32
    %c0_i32_0 = arith.constant 0 : i32
    %c0_i32_1 = arith.constant 0 : i32
    return %c0_i32, %c0_i32_0 : i32, i32
  }
  func.func @transform_12(%arg0: i32) -> (i32, i32) {
    %c0_i32 = arith.constant 0 : i32
    %c0_i32_0 = arith.constant 0 : i32
    %c0_i32_1 = arith.constant 0 : i32
    return %c0_i32, %c0_i32_0 : i32, i32
  }
  func.func @transform_13(%arg0: i32) -> (i32, i32) {
    %c0_i32 = arith.constant 0 : i32
    %c0_i32_0 = arith.constant 0 : i32
    return %arg0, %c0_i32 : i32, i32
  }
}

module attributes {stable_mosaic.version = 11 : i64} {
  func.func @_fused_group_kernel(%arg0: i32, %arg1: memref<32x32xbf16, #tpu.memory_space<vmem>>, %arg2: memref<32x32xbf16, #tpu.memory_space<vmem>>, %arg3: memref<32x64xbf16, #tpu.memory_space<vmem>>, %arg4: memref<32x16xbf16, #tpu.memory_space<vmem>>, %arg5: memref<32x16xbf16, #tpu.memory_space<vmem>>, %arg6: memref<64x16xbf16, #tpu.memory_space<vmem>>, %arg7: memref<64x16xbf16, #tpu.memory_space<vmem>>, %arg8: memref<1x32xf32, #tpu.memory_space<vmem>>, %arg9: memref<32x64xbf16, #tpu.memory_space<vmem>>) attributes {dimension_semantics = [#tpu.dimension_semantics<parallel>], iteration_bounds = array<i64: 1>, scalar_prefetch = 0 : i64, scratch_operands = 0 : i64, tpu.core_type = #tpu.core_type<tc>, window_params = [{transform_indices = @transform_0, window_bounds = array<i64: 32, 32>}, {transform_indices = @transform_1, window_bounds = array<i64: 32, 32>}, {transform_indices = @transform_2, window_bounds = array<i64: 32, 64>}, {pipeline_mode = #tpu.pipeline_mode<synchronous>, transform_indices = @transform_3, window_bounds = array<i64: 32, 16>}, {pipeline_mode = #tpu.pipeline_mode<synchronous>, transform_indices = @transform_4, window_bounds = array<i64: 32, 16>}, {pipeline_mode = #tpu.pipeline_mode<synchronous>, transform_indices = @transform_5, window_bounds = array<i64: 64, 16>}, {pipeline_mode = #tpu.pipeline_mode<synchronous>, transform_indices = @transform_6, window_bounds = array<i64: 64, 16>}, {pipeline_mode = #tpu.pipeline_mode<synchronous>, transform_indices = @transform_7, window_bounds = array<i64: 1, 32>}, {transform_indices = @transform_8, window_bounds = array<i64: 32, 64>}]} {
    %c0 = arith.constant 0 : index
    %c0_0 = arith.constant 0 : index
    %0 = vector.load %arg1[%c0, %c0_0] : memref<32x32xbf16, #tpu.memory_space<vmem>>, vector<32x32xbf16>
    %c0_1 = arith.constant 0 : index
    %c0_2 = arith.constant 0 : index
    %1 = vector.load %arg2[%c0_1, %c0_2] : memref<32x32xbf16, #tpu.memory_space<vmem>>, vector<32x32xbf16>
    %c0_3 = arith.constant 0 : index
    %c0_4 = arith.constant 0 : index
    %2 = vector.load %arg3[%c0_3, %c0_4] : memref<32x64xbf16, #tpu.memory_space<vmem>>, vector<32x64xbf16>
    %c0_5 = arith.constant 0 : index
    %c0_6 = arith.constant 0 : index
    %3 = vector.load %arg4[%c0_5, %c0_6] : memref<32x16xbf16, #tpu.memory_space<vmem>>, vector<32x16xbf16>
    %cst = arith.constant dense<0.000000e+00> : vector<32x16xf32>
    %4 = tpu.matmul %0, %3, %cst {dimension_numbers = #tpu.dot_dimension_numbers<[1], [0], [0], [1], [0, 0, 1, 1], [], []>} : vector<32x32xbf16>, vector<32x16xbf16>, vector<32x16xf32> -> vector<32x16xf32>
    %c0_7 = arith.constant 0 : index
    %c0_8 = arith.constant 0 : index
    %5 = vector.load %arg6[%c0_7, %c0_8] : memref<64x16xbf16, #tpu.memory_space<vmem>>, vector<64x16xbf16>
    %cst_9 = arith.constant dense<0.000000e+00> : vector<32x16xf32>
    %6 = tpu.matmul %2, %5, %cst_9 {dimension_numbers = #tpu.dot_dimension_numbers<[1], [0], [0], [1], [0, 0, 1, 1], [], []>} : vector<32x64xbf16>, vector<64x16xbf16>, vector<32x16xf32> -> vector<32x16xf32>
    %7 = arith.addf %4, %6 : vector<32x16xf32>
    %c0_10 = arith.constant 0 : index
    %c0_11 = arith.constant 0 : index
    %8 = vector.load %arg8[%c0_10, %c0_11] : memref<1x32xf32, #tpu.memory_space<vmem>>, vector<1x16xf32>
    %9 = vector.broadcast %8 : vector<1x16xf32> to vector<32x16xf32>
    %10 = arith.addf %7, %9 : vector<32x16xf32>
    %11 = arith.truncf %10 : vector<32x16xf32> to vector<32x16xbf16>
    %c0_12 = arith.constant 0 : index
    %c0_13 = arith.constant 0 : index
    %12 = vector.load %arg5[%c0_12, %c0_13] : memref<32x16xbf16, #tpu.memory_space<vmem>>, vector<32x16xbf16>
    %cst_14 = arith.constant dense<0.000000e+00> : vector<32x16xf32>
    %13 = tpu.matmul %1, %12, %cst_14 {dimension_numbers = #tpu.dot_dimension_numbers<[1], [0], [0], [1], [0, 0, 1, 1], [], []>} : vector<32x32xbf16>, vector<32x16xbf16>, vector<32x16xf32> -> vector<32x16xf32>
    %c0_15 = arith.constant 0 : index
    %c0_16 = arith.constant 0 : index
    %14 = vector.load %arg7[%c0_15, %c0_16] : memref<64x16xbf16, #tpu.memory_space<vmem>>, vector<64x16xbf16>
    %cst_17 = arith.constant dense<0.000000e+00> : vector<32x16xf32>
    %15 = tpu.matmul %2, %14, %cst_17 {dimension_numbers = #tpu.dot_dimension_numbers<[1], [0], [0], [1], [0, 0, 1, 1], [], []>} : vector<32x64xbf16>, vector<64x16xbf16>, vector<32x16xf32> -> vector<32x16xf32>
    %16 = arith.addf %13, %15 : vector<32x16xf32>
    %c0_18 = arith.constant 0 : index
    %c16 = arith.constant 16 : index
    %17 = vector.load %arg8[%c0_18, %c16] : memref<1x32xf32, #tpu.memory_space<vmem>>, vector<1x16xf32>
    %18 = vector.broadcast %17 : vector<1x16xf32> to vector<32x16xf32>
    %19 = arith.addf %16, %18 : vector<32x16xf32>
    %20 = arith.truncf %19 : vector<32x16xf32> to vector<32x16xbf16>
    %c0_19 = arith.constant 0 : index
    %c0_20 = arith.constant 0 : index
    %21 = vector.load %arg9[%c0_19, %c0_20] : memref<32x64xbf16, #tpu.memory_space<vmem>>, vector<32x16xbf16>
    tpu.vector_store %arg9[%c0_19, %c0_20], %11 {strides = array<i32>} : memref<32x64xbf16, #tpu.memory_space<vmem>>, vector<32x16xbf16>,
    %c0_21 = arith.constant 0 : index
    %c16_22 = arith.constant 16 : index
    %22 = vector.load %arg9[%c0_21, %c16_22] : memref<32x64xbf16, #tpu.memory_space<vmem>>, vector<32x16xbf16>
    tpu.vector_store %arg9[%c0_21, %c16_22], %20 {strides = array<i32>} : memref<32x64xbf16, #tpu.memory_space<vmem>>, vector<32x16xbf16>,
    %c0_23 = arith.constant 0 : index
    %c32 = arith.constant 32 : index
    %23 = vector.load %arg9[%c0_23, %c32] : memref<32x64xbf16, #tpu.memory_space<vmem>>, vector<32x16xbf16>
    tpu.vector_store %arg9[%c0_23, %c32], %11 {strides = array<i32>} : memref<32x64xbf16, #tpu.memory_space<vmem>>, vector<32x16xbf16>,
    %c0_24 = arith.constant 0 : index
    %c48 = arith.constant 48 : index
    %24 = vector.load %arg9[%c0_24, %c48] : memref<32x64xbf16, #tpu.memory_space<vmem>>, vector<32x16xbf16>
    tpu.vector_store %arg9[%c0_24, %c48], %20 {strides = array<i32>} : memref<32x64xbf16, #tpu.memory_space<vmem>>, vector<32x16xbf16>,
    return
  }
  func.func @transform_0(%arg0: i32) -> (i32, i32) {
    %c0_i32 = arith.constant 0 : i32
    %c0_i32_0 = arith.constant 0 : i32
    return %arg0, %c0_i32 : i32, i32
  }
  func.func @transform_1(%arg0: i32) -> (i32, i32) {
    %c0_i32 = arith.constant 0 : i32
    %c0_i32_0 = arith.constant 0 : i32
    return %arg0, %c0_i32 : i32, i32
  }
  func.func @transform_2(%arg0: i32) -> (i32, i32) {
    %c0_i32 = arith.constant 0 : i32
    %c0_i32_0 = arith.constant 0 : i32
    return %arg0, %c0_i32 : i32, i32
  }
  func.func @transform_3(%arg0: i32) -> (i32, i32) {
    %c0_i32 = arith.constant 0 : i32
    %c0_i32_0 = arith.constant 0 : i32
    %c0_i32_1 = arith.constant 0 : i32
    return %c0_i32, %c0_i32_0 : i32, i32
  }
  func.func @transform_4(%arg0: i32) -> (i32, i32) {
    %c0_i32 = arith.constant 0 : i32
    %c0_i32_0 = arith.constant 0 : i32
    %c0_i32_1 = arith.constant 0 : i32
    return %c0_i32, %c0_i32_0 : i32, i32
  }
  func.func @transform_5(%arg0: i32) -> (i32, i32) {
    %c0_i32 = arith.constant 0 : i32
    %c0_i32_0 = arith.constant 0 : i32
    %c0_i32_1 = arith.constant 0 : i32
    return %c0_i32, %c0_i32_0 : i32, i32
  }
  func.func @transform_6(%arg0: i32) -> (i32, i32) {
    %c0_i32 = arith.constant 0 : i32
    %c0_i32_0 = arith.constant 0 : i32
    %c0_i32_1 = arith.constant 0 : i32
    return %c0_i32, %c0_i32_0 : i32, i32
  }
  func.func @transform_7(%arg0: i32) -> (i32, i32) {
    %c0_i32 = arith.constant 0 : i32
    %c0_i32_0 = arith.constant 0 : i32
    %c0_i32_1 = arith.constant 0 : i32
    return %c0_i32, %c0_i32_0 : i32, i32
  }
  func.func @transform_8(%arg0: i32) -> (i32, i32) {
    %c0_i32 = arith.constant 0 : i32
    %c0_i32_0 = arith.constant 0 : i32
    return %arg0, %c0_i32 : i32, i32
  }
}

module attributes {stable_mosaic.version = 11 : i64} {
  func.func @_gap_linear_kernel(%arg0: i32, %arg1: memref<2x16x64xbf16, #tpu.memory_space<vmem>>, %arg2: memref<64x10xbf16, #tpu.memory_space<vmem>>, %arg3: memref<1x10xf32, #tpu.memory_space<vmem>>, %arg4: memref<2x10xf32, #tpu.memory_space<vmem>>) attributes {dimension_semantics = [#tpu.dimension_semantics<arbitrary>], iteration_bounds = array<i64: 1>, scalar_prefetch = 0 : i64, scratch_operands = 0 : i64, tpu.core_type = #tpu.core_type<tc>, window_params = [{pipeline_mode = #tpu.pipeline_mode<synchronous>, transform_indices = @transform_0, window_bounds = array<i64: 2, 16, 64>}, {pipeline_mode = #tpu.pipeline_mode<synchronous>, transform_indices = @transform_1, window_bounds = array<i64: 64, 10>}, {pipeline_mode = #tpu.pipeline_mode<synchronous>, transform_indices = @transform_2, window_bounds = array<i64: 1, 10>}, {pipeline_mode = #tpu.pipeline_mode<synchronous>, transform_indices = @transform_3, window_bounds = array<i64: 2, 10>}]} {
    %c0 = arith.constant 0 : index
    %c0_0 = arith.constant 0 : index
    %c0_1 = arith.constant 0 : index
    %0 = vector.load %arg1[%c0, %c0_0, %c0_1] : memref<2x16x64xbf16, #tpu.memory_space<vmem>>, vector<1x16x64xbf16>
    %1 = vector.shape_cast %0 : vector<1x16x64xbf16> to vector<16x64xbf16>
    %2 = arith.extf %1 : vector<16x64xbf16> to vector<16x64xf32>
    %cst = arith.constant dense<0.000000e+00> : vector<64xf32>
    %3 = vector.multi_reduction <add>, %2, %cst [0] : vector<16x64xf32> to vector<64xf32>
    %4 = vector.shape_cast %3 : vector<64xf32> to vector<1x64xf32>
    %cst_2 = arith.constant 6.250000e-02 : f32
    %5 = vector.broadcast %cst_2 : f32 to vector<1x64xf32>
    %6 = arith.mulf %4, %5 : vector<1x64xf32>
    %7 = arith.truncf %6 : vector<1x64xf32> to vector<1x64xbf16>
    %c0_3 = arith.constant 0 : index
    %c0_4 = arith.constant 0 : index
    %8 = vector.load %arg2[%c0_3, %c0_4] : memref<64x10xbf16, #tpu.memory_space<vmem>>, vector<64x10xbf16>
    %cst_5 = arith.constant dense<0.000000e+00> : vector<1x10xf32>
    %9 = tpu.matmul %7, %8, %cst_5 {dimension_numbers = #tpu.dot_dimension_numbers<[1], [0], [0], [1], [0, 0, 1, 1], [], []>} : vector<1x64xbf16>, vector<64x10xbf16>, vector<1x10xf32> -> vector<1x10xf32>
    %c0_6 = arith.constant 0 : index
    %c0_7 = arith.constant 0 : index
    %10 = vector.load %arg3[%c0_6, %c0_7] : memref<1x10xf32, #tpu.memory_space<vmem>>, vector<1x10xf32>
    %11 = arith.addf %9, %10 : vector<1x10xf32>
    %c0_8 = arith.constant 0 : index
    %c0_9 = arith.constant 0 : index
    %12 = vector.load %arg4[%c0_8, %c0_9] : memref<2x10xf32, #tpu.memory_space<vmem>>, vector<1x10xf32>
    tpu.vector_store %arg4[%c0_8, %c0_9], %11 {strides = array<i32>} : memref<2x10xf32, #tpu.memory_space<vmem>>, vector<1x10xf32>,
    %c1 = arith.constant 1 : index
    %c0_10 = arith.constant 0 : index
    %c0_11 = arith.constant 0 : index
    %13 = vector.load %arg1[%c1, %c0_10, %c0_11] : memref<2x16x64xbf16, #tpu.memory_space<vmem>>, vector<1x16x64xbf16>
    %14 = vector.shape_cast %13 : vector<1x16x64xbf16> to vector<16x64xbf16>
    %15 = arith.extf %14 : vector<16x64xbf16> to vector<16x64xf32>
    %cst_12 = arith.constant dense<0.000000e+00> : vector<64xf32>
    %16 = vector.multi_reduction <add>, %15, %cst_12 [0] : vector<16x64xf32> to vector<64xf32>
    %17 = vector.shape_cast %16 : vector<64xf32> to vector<1x64xf32>
    %cst_13 = arith.constant 6.250000e-02 : f32
    %18 = vector.broadcast %cst_13 : f32 to vector<1x64xf32>
    %19 = arith.mulf %17, %18 : vector<1x64xf32>
    %20 = arith.truncf %19 : vector<1x64xf32> to vector<1x64xbf16>
    %c0_14 = arith.constant 0 : index
    %c0_15 = arith.constant 0 : index
    %21 = vector.load %arg2[%c0_14, %c0_15] : memref<64x10xbf16, #tpu.memory_space<vmem>>, vector<64x10xbf16>
    %cst_16 = arith.constant dense<0.000000e+00> : vector<1x10xf32>
    %22 = tpu.matmul %20, %21, %cst_16 {dimension_numbers = #tpu.dot_dimension_numbers<[1], [0], [0], [1], [0, 0, 1, 1], [], []>} : vector<1x64xbf16>, vector<64x10xbf16>, vector<1x10xf32> -> vector<1x10xf32>
    %c0_17 = arith.constant 0 : index
    %c0_18 = arith.constant 0 : index
    %23 = vector.load %arg3[%c0_17, %c0_18] : memref<1x10xf32, #tpu.memory_space<vmem>>, vector<1x10xf32>
    %24 = arith.addf %22, %23 : vector<1x10xf32>
    %c1_19 = arith.constant 1 : index
    %c0_20 = arith.constant 0 : index
    %25 = vector.load %arg4[%c1_19, %c0_20] : memref<2x10xf32, #tpu.memory_space<vmem>>, vector<1x10xf32>
    tpu.vector_store %arg4[%c1_19, %c0_20], %24 {strides = array<i32>} : memref<2x10xf32, #tpu.memory_space<vmem>>, vector<1x10xf32>,
    return
  }
  func.func @transform_0(%arg0: i32) -> (i32, i32, i32) {
    %c0_i32 = arith.constant 0 : i32
    %c0_i32_0 = arith.constant 0 : i32
    %c0_i32_1 = arith.constant 0 : i32
    %c0_i32_2 = arith.constant 0 : i32
    return %c0_i32, %c0_i32_0, %c0_i32_1 : i32, i32, i32
  }
  func.func @transform_1(%arg0: i32) -> (i32, i32) {
    %c0_i32 = arith.constant 0 : i32
    %c0_i32_0 = arith.constant 0 : i32
    %c0_i32_1 = arith.constant 0 : i32
    return %c0_i32, %c0_i32_0 : i32, i32
  }
  func.func @transform_2(%arg0: i32) -> (i32, i32) {
    %c0_i32 = arith.constant 0 : i32
    %c0_i32_0 = arith.constant 0 : i32
    %c0_i32_1 = arith.constant 0 : i32
    return %c0_i32, %c0_i32_0 : i32, i32
  }
  func.func @transform_3(%arg0: i32) -> (i32, i32) {
    %c0_i32 = arith.constant 0 : i32
    %c0_i32_0 = arith.constant 0 : i32
    %c0_i32_1 = arith.constant 0 : i32
    return %c0_i32, %c0_i32_0 : i32, i32
  }
}

</mosaic_0001>

<bundles_post_ra>
// kernel: cnn_forward.10
= control target key start
LH: loop header
LB: loop body
LE: loop exit
PB: predicated region body
PF: predicated region fallthrough
CT: control target
= control target key end

     0   :  { %s1008_s12 = smov 0   ;;  %s1178_s0 = inlined_call_operand.vmem [shape: bf16[512,36], index: 0, kind: input, shape index: {}]   ;;  %s1179_s1 = inlined_call_operand.vmem [shape: bf16[36,24], index: 1, kind: input, shape index: {}]   ;;  %s1180_s2 = inlined_call_operand.vmem [shape: f32[1,24], index: 2, kind: input, shape index: {}]   ;;  %s1181_s3 = inlined_call_operand.vmem [shape: bf16[512,24], index: 3, kind: output, shape index: {}]  }
   0x1 LB: > { %s777_s13 = sadd.s32 4294967295, %s986_s12   ;;  %p781_p0 = scmp.ge.s32.totalorder %s986_s12, 1  ;;  %s986_s12 = sphi %s1008_s12, %s13_s12  }
   0x2   : > { %p138_p1 = scmp.lt.s32.totalorder %s986_s12, 3 }
   0x4   : > { %p139_p2 = pnand %p781_p0, %p138_p1 }
   0x5   : > { %v961_v0 = vld [vmem:[%s1179_s1] sm:$0xff] (!%p139_p2)   ;;  %v962_v1 = vld [vmem:[%s1179_s1 + $0x8] sm:$0xff] (!%p139_p2)   ;;  %s782_s18 = sshll.u32 (!%p139_p2), %s777_s13, 5  ;;  %v963_v2 = vld [vmem:[%s1179_s1 + $0x10] ss:$0 sps:$4 sm:$0x33] (!%p139_p2)  }
   0x6   : > { %142 = sbr.rel (%p139_p2) target bundleno = 265 (0x109), region = 32  ;;  %907 = vmatprep.subr.bf16.mxu0 (!%p139_p2), %v961_v0  ;;  %945 = vmatprep.subr.bf16.mxu1 (!%p139_p2), %v961_v0  ;;  %p163_p3 = scmp.lt.s32.totalorder (!%p139_p2), %s782_s18, 63  ;;  %vm363_vm0 = vcmask (!%p139_p2), 1041408   ;;  %vm314_vm1 = vcmask (!%p139_p2), 293888   ;;  %v1070_v20 = vld [vmem:[%s1180_s2] ss:$0 sm:$0xff] (!%p139_p2) }
   0x7   : > { %908 = vmatpush3.bf16.msra.mxu0 (!%p139_p2), %v961_v0  ;;  %948 = vmatpush3.bf16.msra.mxu1 (!%p139_p2), %v961_v0  ;;  %v365_v3 = vsel (!%p139_p2), %vm363_vm0, %v963_v2, 0  ;;  %vm688_vm2 = vcmask (!%p139_p2), 191488  }
   0x8   : > { %909 = vmatprep.subr.bf16.mxu0 (!%p139_p2), %v962_v1  ;;  %946 = vmatprep.subr.bf16.mxu1 (!%p139_p2), %v962_v1 }
   0xb   : > { %910 = vmatpush3.bf16.msra.mxu0 (!%p139_p2), %v962_v1  ;;  %949 = vmatpush3.bf16.msra.mxu1 (!%p139_p2), %v962_v1 }
   0xc   : > { %951 = vmatprep.subr.msk.bf16.mxu0 (!%p139_p2), %vm363_vm0, %v963_v2  ;;  %952 = vmatprep.subr.msk.bf16.mxu1 (!%p139_p2), %vm363_vm0, %v963_v2 }
   0xd   : > { %s1183_s18 = smov (!%p163_p3, %s782_s18), 63 }
   0xe   : > { %s783_s21 = sshll.u32 %s1183_s18, 2 }
   0xf   : > { %s1033_s24 = scalar_lea.vmem %s1178_s0, %s783_s21  ;;  %912 = vmatpush3.bf16.msra.mxu0 %v365_v3  ;;  %950 = vmatpush3.bf16.msra.mxu1 %v365_v3  ;;  %s1083_s29 = scalar_lea.vmem %s1181_s3, %s783_s21 }
  0x10   : > { %v964_v4 = vld [vmem:[%s1033_s24] sm:$0xff]   ;;  %v966_v6 = vld [vmem:[%s1033_s24 + $0x8] sm:$0xff]   ;;  %v968_v8 = vld [vmem:[%s1033_s24 + $0x10] sm:$0xff]  }
  0x11   : > { %v965_v5 = vld [vmem:[%s1033_s24 + $0x40] sm:$0xff]   ;;  %913 = vmatprep.mubr.msk.bf16.mxu0 %vm314_vm1, %v964_v4  ;;  %v967_v7 = vld [vmem:[%s1033_s24 + $0x48] sm:$0xff]   ;;  %v969_v9 = vld [vmem:[%s1033_s24 + $0x50] sm:$0xff]  }
  0x12   : > { %929 = vmatprep.mubr.msk.bf16.mxu1 %vm314_vm1, %v965_v5  ;;  %914 = vmatmul.mubr.msk.bf16.vlgmr.msra.gmra.mrb[0].mxu0 %vm314_vm1, %v966_v6  ;;  %v970_v10 = vld [vmem:[%s1033_s24 + $0x18] sm:$0xff]   ;;  %v972_v12 = vld [vmem:[%s1033_s24 + $0x20] sm:$0xff]   ;;  %v974_v14 = vld [vmem:[%s1033_s24 + $0x28] sm:$0xff]  }
  0x13   : > { %930 = vmatmul.mubr.msk.bf16.vlgmr.msra.gmra.mrb[0].mxu1 %vm314_vm1, %v967_v7  ;;  %917 = vmatprep.mubr.msk.bf16.mxu0 %vm314_vm1, %v968_v8  ;;  %v971_v11 = vld [vmem:[%s1033_s24 + $0x58] sm:$0xff]   ;;  %v973_v13 = vld [vmem:[%s1033_s24 + $0x60] sm:$0xff]   ;;  %v975_v15 = vld [vmem:[%s1033_s24 + $0x68] sm:$0xff]  }
  0x14   : > { %933 = vmatprep.mubr.msk.bf16.mxu1 %vm314_vm1, %v969_v9  ;;  %v976_v16 = vld [vmem:[%s1033_s24 + $0x30] sm:$0xff]   ;;  %v978_v18 = vld [vmem:[%s1033_s24 + $0x38] sm:$0xff]  }
  0x15   : > { %v977_v17 = vld [vmem:[%s1033_s24 + $0x70] sm:$0xff]   ;;  %v979_v19 = vld [vmem:[%s1033_s24 + $0x78] sm:$0xff]  }
  0x1a   : > { %918 = vmatmul.mubr.msk.bf16.gmra.mrb[4].mxu0 %vm314_vm1, %v970_v10 }
  0x1b   : > { %934 = vmatmul.mubr.msk.bf16.gmra.mrb[4].mxu1 %vm314_vm1, %v971_v11  ;;  %921 = vmatprep.mubr.msk.bf16.mxu0 %vm314_vm1, %v972_v12 }
  0x1c   : > { %937 = vmatprep.mubr.msk.bf16.mxu1 %vm314_vm1, %v973_v13 }
  0x22   : > { %922 = vmatmul.mubr.msk.bf16.gmra.mrb[8].mxu0 %vm314_vm1, %v974_v14 }
  0x23   : > { %938 = vmatmul.mubr.msk.bf16.gmra.mrb[8].mxu1 %vm314_vm1, %v975_v15  ;;  %925 = vmatprep.mubr.msk.bf16.mxu0 %vm314_vm1, %v976_v16 }
  0x24   : > { %941 = vmatprep.mubr.msk.bf16.mxu1 %vm314_vm1, %v977_v17 }
  0x2a   : > { %926 = vmatmul.mubr.msk.bf16.gmra.mrb[12].mxu0 %vm314_vm1, %v978_v18 }
  0x2b   : > { %942 = vmatmul.mubr.msk.bf16.gmra.mrb[12].mxu1 %vm314_vm1, %v979_v19 }
  0xe5   : > { %v915_v21 = vpop.f32.mrb[0].mxu0 }
  0xe6   : > { %v931_v22 = vpop.f32.mrb[0].mxu1  ;;  %v410_v23 = vadd.f32 %v915_v21, %v1070_v20  ;;  %v401_v25 = vpop.f32.mrb[1].mxu0 }
  0xe7   : > { %v474_v24 = vadd.f32 %v931_v22, %v1070_v20  ;;  %v465_v26 = vpop.f32.mrb[1].mxu1  ;;  %v402_v27 = vadd.f32 %v1070_v20, %v401_v25  ;;  %v916_v29 = vpop.f32.mrb[2].mxu0 }
  0xe8   : > { %v466_v28 = vadd.f32 %v1070_v20, %v465_v26  ;;  %v932_v30 = vpop.f32.mrb[2].mxu1  ;;  %v530_v31 = vmax.f32 %v410_v23, 0.0  ;;  %v413_v33 = vadd.f32 %v916_v29, %v1070_v20  ;;  %v404_v35 = vpop.f32.mrb[3].mxu0 }
  0xe9   : > { %v546_v32 = vmax.f32 %v474_v24, 0.0  ;;  %v477_v34 = vadd.f32 %v932_v30, %v1070_v20  ;;  %v468_v36 = vpop.f32.mrb[3].mxu1  ;;  %v528_v37 = vmax.f32 %v402_v27, 0.0  ;;  %v405_v39 = vadd.f32 %v1070_v20, %v404_v35 }
  0xea   : > { %v544_v38 = vmax.f32 %v466_v28, 0.0  ;;  %v469_v40 = vadd.f32 %v1070_v20, %v468_v36  ;;  %v858_v41 = vpack.c.bf16 %v530_v31, %v530_v31  ;;  %v531_v43 = vmax.f32 %v413_v33, 0.0 }
  0xeb   : > { %v874_v42 = vpack.c.bf16 %v546_v32, %v546_v32  ;;  %v547_v44 = vmax.f32 %v477_v34, 0.0  ;;  %v856_v45 = vpack.c.bf16 %v528_v37, %v528_v37  ;;  %v529_v47 = vmax.f32 %v405_v39, 0.0 }
  0xec   : > { %v872_v46 = vpack.c.bf16 %v544_v38, %v544_v38  ;;  %v545_v48 = vmax.f32 %v469_v40, 0.0  ;;  %691 = vst.msk [vmem:[%s1083_s29 + $0x8] sm:$0xf] %vm688_vm2, %v858_v41  ;;  %v859_v49 = vpack.c.bf16 %v531_v43, %v531_v43 }
  0xed   : > { %707 = vst.msk [vmem:[%s1083_s29 + $0x48] sm:$0xf] %vm688_vm2, %v874_v42  ;;  %v875_v50 = vpack.c.bf16 %v547_v44, %v547_v44  ;;  %689 = vst.msk [vmem:[%s1083_s29] sm:$0xf] %vm688_vm2, %v856_v45  ;;  %v857_v51 = vpack.c.bf16 %v529_v47, %v529_v47  ;;  %v919_v53 = vpop.f32.mrb[4].mxu0 }
  0xee   : > { %705 = vst.msk [vmem:[%s1083_s29 + $0x40] sm:$0xf] %vm688_vm2, %v872_v46  ;;  %v873_v52 = vpack.c.bf16 %v545_v48, %v545_v48  ;;  %v935_v54 = vpop.f32.mrb[4].mxu1  ;;  %692 = vst.msk [vmem:[%s1083_s29 + $0xc] sm:$0xf] %vm688_vm2, %v859_v49  ;;  %v426_v55 = vadd.f32 %v919_v53, %v1070_v20  ;;  %v417_v57 = vpop.f32.mrb[5].mxu0 }
  0xef   : > { %708 = vst.msk [vmem:[%s1083_s29 + $0x4c] sm:$0xf] %vm688_vm2, %v875_v50  ;;  %v490_v56 = vadd.f32 %v935_v54, %v1070_v20  ;;  %v481_v58 = vpop.f32.mrb[5].mxu1  ;;  %690 = vst.msk [vmem:[%s1083_s29 + $0x4] sm:$0xf] %vm688_vm2, %v857_v51  ;;  %v418_v59 = vadd.f32 %v1070_v20, %v417_v57  ;;  %v920_v61 = vpop.f32.mrb[6].mxu0 }
  0xf0   : > { %706 = vst.msk [vmem:[%s1083_s29 + $0x44] sm:$0xf] %vm688_vm2, %v873_v52  ;;  %v482_v60 = vadd.f32 %v1070_v20, %v481_v58  ;;  %v936_v62 = vpop.f32.mrb[6].mxu1  ;;  %v534_v63 = vmax.f32 %v426_v55, 0.0  ;;  %v429_v1 = vadd.f32 %v920_v61, %v1070_v20  ;;  %v420_v3 = vpop.f32.mrb[7].mxu0 }
  0xf1   : > { %v550_v0 = vmax.f32 %v490_v56, 0.0  ;;  %v493_v2 = vadd.f32 %v936_v62, %v1070_v20  ;;  %v484_v4 = vpop.f32.mrb[7].mxu1  ;;  %v532_v5 = vmax.f32 %v418_v59, 0.0  ;;  %v421_v7 = vadd.f32 %v1070_v20, %v420_v3 }
  0xf2   : > { %v548_v6 = vmax.f32 %v482_v60, 0.0  ;;  %v485_v8 = vadd.f32 %v1070_v20, %v484_v4  ;;  %v862_v9 = vpack.c.bf16 %v534_v63, %v534_v63  ;;  %v535_v11 = vmax.f32 %v429_v1, 0.0 }
  0xf3   : > { %v878_v10 = vpack.c.bf16 %v550_v0, %v550_v0  ;;  %v551_v12 = vmax.f32 %v493_v2, 0.0  ;;  %v860_v13 = vpack.c.bf16 %v532_v5, %v532_v5  ;;  %v533_v15 = vmax.f32 %v421_v7, 0.0 }
  0xf4   : > { %v876_v14 = vpack.c.bf16 %v548_v6, %v548_v6  ;;  %v549_v16 = vmax.f32 %v485_v8, 0.0  ;;  %695 = vst.msk [vmem:[%s1083_s29 + $0x18] sm:$0xf] %vm688_vm2, %v862_v9  ;;  %v863_v17 = vpack.c.bf16 %v535_v11, %v535_v11 }
  0xf5   : > { %711 = vst.msk [vmem:[%s1083_s29 + $0x58] sm:$0xf] %vm688_vm2, %v878_v10  ;;  %v879_v18 = vpack.c.bf16 %v551_v12, %v551_v12  ;;  %693 = vst.msk [vmem:[%s1083_s29 + $0x10] sm:$0xf] %vm688_vm2, %v860_v13  ;;  %v861_v19 = vpack.c.bf16 %v533_v15, %v533_v15  ;;  %v923_v22 = vpop.f32.mrb[8].mxu0 }
  0xf6   : > { %709 = vst.msk [vmem:[%s1083_s29 + $0x50] sm:$0xf] %vm688_vm2, %v876_v14  ;;  %v877_v21 = vpack.c.bf16 %v549_v16, %v549_v16  ;;  %v939_v23 = vpop.f32.mrb[8].mxu1  ;;  %696 = vst.msk [vmem:[%s1083_s29 + $0x1c] sm:$0xf] %vm688_vm2, %v863_v17  ;;  %v442_v24 = vadd.f32 %v923_v22, %v1070_v20  ;;  %v433_v26 = vpop.f32.mrb[9].mxu0 }
  0xf7   : > { %712 = vst.msk [vmem:[%s1083_s29 + $0x5c] sm:$0xf] %vm688_vm2, %v879_v18  ;;  %v506_v25 = vadd.f32 %v939_v23, %v1070_v20  ;;  %v497_v27 = vpop.f32.mrb[9].mxu1  ;;  %694 = vst.msk [vmem:[%s1083_s29 + $0x14] sm:$0xf] %vm688_vm2, %v861_v19  ;;  %v434_v28 = vadd.f32 %v1070_v20, %v433_v26  ;;  %v924_v30 = vpop.f32.mrb[10].mxu0 }
  0xf8   : > { %710 = vst.msk [vmem:[%s1083_s29 + $0x54] sm:$0xf] %vm688_vm2, %v877_v21  ;;  %v498_v29 = vadd.f32 %v1070_v20, %v497_v27  ;;  %v940_v31 = vpop.f32.mrb[10].mxu1  ;;  %v538_v32 = vmax.f32 %v442_v24, 0.0  ;;  %v445_v34 = vadd.f32 %v924_v30, %v1070_v20  ;;  %v436_v36 = vpop.f32.mrb[11].mxu0 }
  0xf9   : > { %v554_v33 = vmax.f32 %v506_v25, 0.0  ;;  %v509_v35 = vadd.f32 %v940_v31, %v1070_v20  ;;  %v500_v37 = vpop.f32.mrb[11].mxu1  ;;  %v536_v38 = vmax.f32 %v434_v28, 0.0  ;;  %v437_v40 = vadd.f32 %v1070_v20, %v436_v36 }
  0xfa   : > { %v552_v39 = vmax.f32 %v498_v29, 0.0  ;;  %v501_v41 = vadd.f32 %v1070_v20, %v500_v37  ;;  %v866_v42 = vpack.c.bf16 %v538_v32, %v538_v32  ;;  %v539_v44 = vmax.f32 %v445_v34, 0.0 }
  0xfb   : > { %v882_v43 = vpack.c.bf16 %v554_v33, %v554_v33  ;;  %v555_v45 = vmax.f32 %v509_v35, 0.0  ;;  %v864_v46 = vpack.c.bf16 %v536_v38, %v536_v38  ;;  %v537_v48 = vmax.f32 %v437_v40, 0.0 }
  0xfc   : > { %v880_v47 = vpack.c.bf16 %v552_v39, %v552_v39  ;;  %v553_v49 = vmax.f32 %v501_v41, 0.0  ;;  %699 = vst.msk [vmem:[%s1083_s29 + $0x28] sm:$0xf] %vm688_vm2, %v866_v42  ;;  %v867_v50 = vpack.c.bf16 %v539_v44, %v539_v44 }
  0xfd   : > { %715 = vst.msk [vmem:[%s1083_s29 + $0x68] sm:$0xf] %vm688_vm2, %v882_v43  ;;  %v883_v51 = vpack.c.bf16 %v555_v45, %v555_v45  ;;  %697 = vst.msk [vmem:[%s1083_s29 + $0x20] sm:$0xf] %vm688_vm2, %v864_v46  ;;  %v865_v52 = vpack.c.bf16 %v537_v48, %v537_v48  ;;  %v927_v54 = vpop.f32.mrb[12].mxu0 }
  0xfe   : > { %713 = vst.msk [vmem:[%s1083_s29 + $0x60] sm:$0xf] %vm688_vm2, %v880_v47  ;;  %v881_v53 = vpack.c.bf16 %v553_v49, %v553_v49  ;;  %v943_v55 = vpop.f32.mrb[12].mxu1  ;;  %700 = vst.msk [vmem:[%s1083_s29 + $0x2c] sm:$0xf] %vm688_vm2, %v867_v50  ;;  %v458_v56 = vadd.f32 %v927_v54, %v1070_v20  ;;  %v449_v58 = vpop.f32.mrb[13].mxu0 }
  0xff   : > { %716 = vst.msk [vmem:[%s1083_s29 + $0x6c] sm:$0xf] %vm688_vm2, %v883_v51  ;;  %v522_v57 = vadd.f32 %v943_v55, %v1070_v20  ;;  %v513_v59 = vpop.f32.mrb[13].mxu1  ;;  %698 = vst.msk [vmem:[%s1083_s29 + $0x24] sm:$0xf] %vm688_vm2, %v865_v52  ;;  %v450_v60 = vadd.f32 %v1070_v20, %v449_v58  ;;  %v928_v62 = vpop.f32.mrb[14].mxu0 }
 0x100   : > { %714 = vst.msk [vmem:[%s1083_s29 + $0x64] sm:$0xf] %vm688_vm2, %v881_v53  ;;  %v514_v61 = vadd.f32 %v1070_v20, %v513_v59  ;;  %v944_v63 = vpop.f32.mrb[14].mxu1  ;;  %v542_v0 = vmax.f32 %v458_v56, 0.0  ;;  %v461_v2 = vadd.f32 %v928_v62, %v1070_v20  ;;  %v452_v4 = vpop.f32.mrb[15].mxu0 }
 0x101   : > { %v558_v1 = vmax.f32 %v522_v57, 0.0  ;;  %v525_v3 = vadd.f32 %v944_v63, %v1070_v20  ;;  %v516_v5 = vpop.f32.mrb[15].mxu1  ;;  %v540_v6 = vmax.f32 %v450_v60, 0.0  ;;  %v453_v8 = vadd.f32 %v1070_v20, %v452_v4 }
 0x102   : > { %v556_v7 = vmax.f32 %v514_v61, 0.0  ;;  %v517_v9 = vadd.f32 %v1070_v20, %v516_v5  ;;  %v870_v10 = vpack.c.bf16 %v542_v0, %v542_v0  ;;  %v543_v12 = vmax.f32 %v461_v2, 0.0 }
 0x103   : > { %v886_v11 = vpack.c.bf16 %v558_v1, %v558_v1  ;;  %v559_v13 = vmax.f32 %v525_v3, 0.0  ;;  %v868_v14 = vpack.c.bf16 %v540_v6, %v540_v6  ;;  %v541_v16 = vmax.f32 %v453_v8, 0.0 }
 0x104   : > { %v884_v15 = vpack.c.bf16 %v556_v7, %v556_v7  ;;  %v557_v17 = vmax.f32 %v517_v9, 0.0  ;;  %703 = vst.msk [vmem:[%s1083_s29 + $0x38] sm:$0xf] %vm688_vm2, %v870_v10  ;;  %v871_v18 = vpack.c.bf16 %v543_v12, %v543_v12 }
 0x105   : > { %719 = vst.msk [vmem:[%s1083_s29 + $0x78] sm:$0xf] %vm688_vm2, %v886_v11  ;;  %v887_v19 = vpack.c.bf16 %v559_v13, %v559_v13  ;;  %701 = vst.msk [vmem:[%s1083_s29 + $0x30] sm:$0xf] %vm688_vm2, %v868_v14  ;;  %v869_v20 = vpack.c.bf16 %v541_v16, %v541_v16 }
 0x106   : > { %717 = vst.msk [vmem:[%s1083_s29 + $0x70] sm:$0xf] %vm688_vm2, %v884_v15  ;;  %v885_v21 = vpack.c.bf16 %v557_v17, %v557_v17  ;;  %704 = vst.msk [vmem:[%s1083_s29 + $0x3c] sm:$0xf] %vm688_vm2, %v871_v18 }
 0x107   : > { %720 = vst.msk [vmem:[%s1083_s29 + $0x7c] sm:$0xf] %vm688_vm2, %v887_v19  ;;  %702 = vst.msk [vmem:[%s1083_s29 + $0x34] sm:$0xf] %vm688_vm2, %v869_v20 }
 0x108   : > { %718 = vst.msk [vmem:[%s1083_s29 + $0x74] sm:$0xf] %vm688_vm2, %v885_v21 }
 0x109 PF: > { %s13_s12 = sadd.s32 1, %s986_s12  }
 0x10a   : > { %p10_p4 = scmp.ge.s32.totalorder %s13_s12, 4  }
 0x10c   :  { %12 = sbr.rel (!%p10_p4) target bundleno = 1 (0x1), region = 62 }

// kernel: cnn_forward.11
= control target key start
LH: loop header
LB: loop body
LE: loop exit
PB: predicated region body
PF: predicated region fallthrough
CT: control target
= control target key end

     0   :  { %s1726_s18 = smov 0   ;;  %s2030_s0 = inlined_call_operand.vmem [shape: bf16[512,24], index: 0, kind: input, shape index: {}, may-alias: {0,1}]   ;;  %s2031_s1 = inlined_call_operand.vmem [shape: bf16[512,24], index: 1, kind: input, shape index: {}, may-alias: {0,1}]   ;;  %s2032_s2 = inlined_call_operand.vmem [shape: bf16[24,8], index: 2, kind: input, shape index: {}]   ;;  %s2033_s3 = inlined_call_operand.vmem [shape: bf16[24,8], index: 3, kind: input, shape index: {}]   ;;  %s2034_s4 = inlined_call_operand.vmem [shape: f32[1,8], index: 4, kind: input, shape index: {}]   ;;  %s2035_s5 = inlined_call_operand.vmem [shape: bf16[512,16], index: 5, kind: output, shape index: {}]  }
   0x1 LB: > { %s1354_s19 = sadd.s32 4294967295, %s1693_s18   ;;  %p1358_p0 = scmp.ge.s32.totalorder %s1693_s18, 1  ;;  %s1693_s18 = sphi %s1726_s18, %s15_s18  }
   0x2   : > { %p199_p1 = scmp.lt.s32.totalorder %s1693_s18, 3 }
   0x4   : > { %p200_p2 = pnand %p1358_p0, %p199_p1 }
   0x5   : > { %v1651_v0 = vld [vmem:[%s2033_s3] sm:$0xff] (!%p200_p2)   ;;  %vm459_vm0 = vcmask (!%p200_p2), 1043456   ;;  %s1359_s24 = sshll.u32 (!%p200_p2), %s1354_s19, 5  ;;  %v1653_v2 = vld [vmem:[%s2033_s3 + $0x8] ss:$0 sps:$4 sm:$0xff] (!%p200_p2)   ;;  %vm410_vm1 = vcmask (!%p200_p2), 195584  }
   0x6   : > { %203 = sbr.rel (%p200_p2) target bundleno = 418 (0x1a2), region = 40  ;;  %v1652_v1 = vld [vmem:[%s2032_s2] sm:$0xff] (!%p200_p2)   ;;  %1536 = vmatprep.subr.bf16.mxu1 (!%p200_p2), %v1651_v0  ;;  %v1654_v3 = vld [vmem:[%s2032_s2 + $0x8] ss:$0 sps:$4 sm:$0xff] (!%p200_p2)   ;;  %p233_p3 = scmp.lt.s32.totalorder (!%p200_p2), %s1359_s24, 63  ;;  %v461_v4 = vsel (!%p200_p2), %vm459_vm0, %v1653_v2, 0 }
   0x7   : > { %1572 = vmatprep.subr.bf16.mxu0 (!%p200_p2), %v1652_v1  ;;  %1537 = vmatpush3.bf16.msra.mxu1 (!%p200_p2), %v1651_v0  ;;  %v762_v5 = vsel (!%p200_p2), %vm459_vm0, %v1654_v3, 0  ;;  %v1827_v41 = vld [vmem:[%s2034_s4] ss:$0 sm:$0xff] (!%p200_p2)  ;;  %vm1124_vm2 = vcmask (!%p200_p2), 60416   ;;  %s1695_s16 = smov (!%p200_p2), 8   ;;  %vm1253_vm3 = vcmask (!%p200_p2), 126016  }
   0x8   : > { %1573 = vmatpush3.bf16.msra.mxu0 (!%p200_p2), %v1652_v1  ;;  %1640 = vmatprep.subr.msk.bf16.mxu1 (!%p200_p2), %vm459_vm0, %v1653_v2 }
   0x9   : > { %1641 = vmatprep.subr.msk.bf16.mxu0 (!%p200_p2), %vm459_vm0, %v1654_v3 }
   0xb   : > { %1539 = vmatpush3.bf16.msra.mxu1 (!%p200_p2), %v461_v4 }
   0xc   : > { %1575 = vmatpush3.bf16.msra.mxu0 (!%p200_p2), %v762_v5 }
   0xd   : > { %s2037_s24 = smov (!%p233_p3, %s1359_s24), 63 }
   0xe   : > { %s1746_s29 = sshll.u32 %s2037_s24, 2 }
   0xf   : > { %s1752_s7 = scalar_lea.vmem %s2031_s1, %s1746_s29  ;;  %s1759_s10 = scalar_lea.vmem %s2030_s0, %s1746_s29 }
  0x10   : > { %v1655_v6 = vld [vmem:[%s1752_s7] sm:$0xff]   ;;  %v1657_v8 = vld [vmem:[%s1752_s7 + $0x8] sm:$0xff]   ;;  %v1659_v10 = vld [vmem:[%s1752_s7 + $0x10] sm:$0xff]   ;;  %s1836_s15 = scalar_lea.vmem %s2035_s5, %s1746_s29 }
  0x11   : > { %v1656_v7 = vld [vmem:[%s1759_s10] sm:$0xff]   ;;  %1540 = vmatprep.mubr.msk.bf16.mxu1 %vm410_vm1, %v1655_v6  ;;  %v1658_v9 = vld [vmem:[%s1759_s10 + $0x8] sm:$0xff]   ;;  %v1660_v11 = vld [vmem:[%s1759_s10 + $0x10] sm:$0xff]  }
  0x12   : > { %1576 = vmatprep.mubr.msk.bf16.mxu0 %vm410_vm1, %v1656_v7  ;;  %1541 = vmatmul.mubr.msk.bf16.vlgmr.msra.gmra.mrb[0].mxu1 %vm410_vm1, %v1657_v8  ;;  %v1661_v12 = vld [vmem:[%s1752_s7 + $0x18] sm:$0xff]   ;;  %v1663_v14 = vld [vmem:[%s1752_s7 + $0x20] sm:$0xff]   ;;  %v1665_v16 = vld [vmem:[%s1752_s7 + $0x28] sm:$0xff]  }
  0x13   : > { %1577 = vmatmul.mubr.msk.bf16.vlgmr.msra.gmra.mrb[0].mxu0 %vm410_vm1, %v1658_v9  ;;  %1544 = vmatprep.mubr.msk.bf16.mxu1 %vm410_vm1, %v1659_v10  ;;  %v1662_v13 = vld [vmem:[%s1759_s10 + $0x18] sm:$0xff]   ;;  %v1664_v15 = vld [vmem:[%s1759_s10 + $0x20] sm:$0xff]   ;;  %v1666_v17 = vld [vmem:[%s1759_s10 + $0x28] sm:$0xff]  }
  0x14   : > { %1580 = vmatprep.mubr.msk.bf16.mxu0 %vm410_vm1, %v1660_v11  ;;  %v1667_v18 = vld [vmem:[%s1752_s7 + $0x30] sm:$0xff]   ;;  %v1669_v20 = vld [vmem:[%s1752_s7 + $0x38] sm:$0xff]   ;;  %v1671_v22 = vld [vmem:[%s1752_s7 + $0x40] sm:$0xff]  }
  0x15   : > { %v1668_v19 = vld [vmem:[%s1759_s10 + $0x30] sm:$0xff]   ;;  %v1670_v21 = vld [vmem:[%s1759_s10 + $0x38] sm:$0xff]   ;;  %v1672_v23 = vld [vmem:[%s1759_s10 + $0x40] sm:$0xff]  }
  0x16   : > { %v1673_v24 = vld [vmem:[%s1752_s7 + $0x48] sm:$0xff]   ;;  %v1675_v26 = vld [vmem:[%s1752_s7 + $0x50] sm:$0xff]   ;;  %v1677_v28 = vld [vmem:[%s1752_s7 + $0x58] sm:$0xff]  }
  0x17   : > { %v1674_v25 = vld [vmem:[%s1759_s10 + $0x48] sm:$0xff]   ;;  %v1676_v27 = vld [vmem:[%s1759_s10 + $0x50] sm:$0xff]   ;;  %v1678_v29 = vld [vmem:[%s1759_s10 + $0x58] sm:$0xff]  }
  0x18   : > { %v1679_v30 = vld [vmem:[%s1752_s7 + $0x60] sm:$0xff]   ;;  %v1681_v32 = vld [vmem:[%s1752_s7 + $0x68] sm:$0xff]   ;;  %v1683_v34 = vld [vmem:[%s1752_s7 + $0x70] sm:$0xff]  }
  0x19   : > { %v1680_v31 = vld [vmem:[%s1759_s10 + $0x60] sm:$0xff]   ;;  %v1682_v33 = vld [vmem:[%s1759_s10 + $0x68] sm:$0xff]   ;;  %v1684_v35 = vld [vmem:[%s1759_s10 + $0x70] sm:$0xff]  }
  0x1a   : > { %1545 = vmatmul.mubr.msk.bf16.gmra.mrb[4].mxu1 %vm410_vm1, %v1661_v12  ;;  %v1685_v36 = vld [vmem:[%s1752_s7 + $0x78] sm:$0xff]  }
  0x1b   : > { %1581 = vmatmul.mubr.msk.bf16.gmra.mrb[4].mxu0 %vm410_vm1, %v1662_v13  ;;  %1548 = vmatprep.mubr.msk.bf16.mxu1 %vm410_vm1, %v1663_v14  ;;  %v1686_v37 = vld [vmem:[%s1759_s10 + $0x78] sm:$0xff]  }
  0x1c   : > { %1584 = vmatprep.mubr.msk.bf16.mxu0 %vm410_vm1, %v1664_v15 }
  0x22   : > { %1549 = vmatmul.mubr.msk.bf16.gmra.mrb[8].mxu1 %vm410_vm1, %v1665_v16 }
  0x23   : > { %1585 = vmatmul.mubr.msk.bf16.gmra.mrb[8].mxu0 %vm410_vm1, %v1666_v17  ;;  %1552 = vmatprep.mubr.msk.bf16.mxu1 %vm410_vm1, %v1667_v18 }
  0x24   : > { %1588 = vmatprep.mubr.msk.bf16.mxu0 %vm410_vm1, %v1668_v19 }
  0x2a   : > { %1553 = vmatmul.mubr.msk.bf16.gmra.mrb[12].mxu1 %vm410_vm1, %v1669_v20 }
  0x2b   : > { %1589 = vmatmul.mubr.msk.bf16.gmra.mrb[12].mxu0 %vm410_vm1, %v1670_v21  ;;  %1556 = vmatprep.mubr.msk.bf16.mxu1 %vm410_vm1, %v1671_v22 }
  0x2c   : > { %1592 = vmatprep.mubr.msk.bf16.mxu0 %vm410_vm1, %v1672_v23 }
  0x32   : > { %1557 = vmatmul.mubr.msk.bf16.gmra.mrb[16].mxu1 %vm410_vm1, %v1673_v24 }
  0x33   : > { %1593 = vmatmul.mubr.msk.bf16.gmra.mrb[16].mxu0 %vm410_vm1, %v1674_v25  ;;  %1560 = vmatprep.mubr.msk.bf16.mxu1 %vm410_vm1, %v1675_v26 }
  0x34   : > { %1596 = vmatprep.mubr.msk.bf16.mxu0 %vm410_vm1, %v1676_v27 }
  0x3a   : > { %1561 = vmatmul.mubr.msk.bf16.gmra.mrb[20].mxu1 %vm410_vm1, %v1677_v28 }
  0x3b   : > { %1597 = vmatmul.mubr.msk.bf16.gmra.mrb[20].mxu0 %vm410_vm1, %v1678_v29  ;;  %1564 = vmatprep.mubr.msk.bf16.mxu1 %vm410_vm1, %v1679_v30 }
  0x3c   : > { %1600 = vmatprep.mubr.msk.bf16.mxu0 %vm410_vm1, %v1680_v31 }
  0x42   : > { %1565 = vmatmul.mubr.msk.bf16.gmra.mrb[24].mxu1 %vm410_vm1, %v1681_v32 }
  0x43   : > { %1601 = vmatmul.mubr.msk.bf16.gmra.mrb[24].mxu0 %vm410_vm1, %v1682_v33  ;;  %1568 = vmatprep.mubr.msk.bf16.mxu1 %vm410_vm1, %v1683_v34 }
  0x44   : > { %1604 = vmatprep.mubr.msk.bf16.mxu0 %vm410_vm1, %v1684_v35 }
  0x4a   : > { %1569 = vmatmul.mubr.msk.bf16.gmra.mrb[28].mxu1 %vm410_vm1, %v1685_v36 }
  0x4b   : > { %1605 = vmatmul.mubr.msk.bf16.gmra.mrb[28].mxu0 %vm410_vm1, %v1686_v37 }
  0xe5   : > { %v1542_v38 = vpop.f32.mrb[0].mxu1 }
  0xe6   : > { %v1578_v39 = vpop.f32.mrb[0].mxu0  ;;  %v497_v40 = vpop.f32.mrb[1].mxu1 }
  0xe7   : > { %v807_v42 = vadd.f32 %v1578_v39, %v1542_v38  ;;  %v798_v43 = vpop.f32.mrb[1].mxu0  ;;  %v1543_v44 = vpop.f32.mrb[2].mxu1 }
  0xe8   : > { %v799_v45 = vadd.f32 %v798_v43, %v497_v40  ;;  %v1579_v46 = vpop.f32.mrb[2].mxu0  ;;  %v500_v47 = vpop.f32.mrb[3].mxu1 }
  0xe9   : > { %v810_v48 = vadd.f32 %v1579_v46, %v1543_v44  ;;  %v801_v49 = vpop.f32.mrb[3].mxu0  ;;  %v934_v50 = vadd.f32 %v1827_v41, %v807_v42 }
  0xea   : > { %v802_v51 = vadd.f32 %v801_v49, %v500_v47  ;;  %v932_v52 = vadd.f32 %v1827_v41, %v799_v45 }
  0xeb   : > { %v935_v53 = vadd.f32 %v1827_v41, %v810_v48  ;;  %v966_v54 = vmax.f32 %v934_v50, 0.0 }
  0xec   : > { %v933_v55 = vadd.f32 %v1827_v41, %v802_v51  ;;  %v964_v56 = vmax.f32 %v932_v52, 0.0 }
  0xed   : > { %v967_v57 = vmax.f32 %v935_v53, 0.0  ;;  %v1546_v58 = vpop.f32.mrb[4].mxu1  ;;  %v1470_v59 = vpack.c.bf16 %v966_v54, %v966_v54 }
  0xee   : > { %v965_v60 = vmax.f32 %v933_v55, 0.0  ;;  %v1582_v61 = vpop.f32.mrb[4].mxu0  ;;  %v513_v62 = vpop.f32.mrb[5].mxu1  ;;  %v1468_v63 = vpack.c.bf16 %v964_v56, %v964_v56 }
  0xef   : > { %v1471_v0 = vpack.c.bf16 %v967_v57, %v967_v57  ;;  %v823_v1 = vadd.f32 %v1582_v61, %v1546_v58  ;;  %1161 = vrot.lane.b32.xlu1 %v1470_v59, %s1695_s16  ;;  %1127 = vst.msk [vmem:[%s1836_s15 + $0x8] sm:$0xf] %vm1124_vm2, %v1470_v59  ;;  %v814_v2 = vpop.f32.mrb[5].mxu0  ;;  %v1547_v3 = vpop.f32.mrb[6].mxu1 }
  0xf0   : > { %v1469_v4 = vpack.c.bf16 %v965_v60, %v965_v60  ;;  %v815_v5 = vadd.f32 %v814_v2, %v513_v62  ;;  %v1583_v6 = vpop.f32.mrb[6].mxu0  ;;  %1157 = vrot.lane.b32.xlu0 %v1468_v63, %s1695_s16  ;;  %1125 = vst.msk [vmem:[%s1836_s15] sm:$0xf] %vm1124_vm2, %v1468_v63  ;;  %v516_v7 = vpop.f32.mrb[7].mxu1 }
  0xf1   : > { %v938_v8 = vadd.f32 %v1827_v41, %v823_v1  ;;  %1128 = vst.msk [vmem:[%s1836_s15 + $0xc] sm:$0xf] %vm1124_vm2, %v1471_v0  ;;  %v826_v9 = vadd.f32 %v1583_v6, %v1547_v3  ;;  %v817_v10 = vpop.f32.mrb[7].mxu0 }
  0xf2   : > { %1126 = vst.msk [vmem:[%s1836_s15 + $0x4] sm:$0xf] %vm1124_vm2, %v1469_v4  ;;  %v936_v11 = vadd.f32 %v1827_v41, %v815_v5  ;;  %v818_v12 = vadd.f32 %v817_v10, %v516_v7 }
  0xf3   : > { %v970_v13 = vmax.f32 %v938_v8, 0.0  ;;  %v939_v14 = vadd.f32 %v1827_v41, %v826_v9  ;;  %1163 = vrot.lane.b32.xlu1 %v1471_v0, %s1695_s16 }
  0xf4   : > { %v968_v15 = vmax.f32 %v936_v11, 0.0  ;;  %v937_v16 = vadd.f32 %v1827_v41, %v818_v12  ;;  %1159 = vrot.lane.b32.xlu0 %v1469_v4, %s1695_s16 }
  0xf5   : > { %v1474_v17 = vpack.c.bf16 %v970_v13, %v970_v13  ;;  %v971_v18 = vmax.f32 %v939_v14, 0.0  ;;  %v1550_v19 = vpop.f32.mrb[8].mxu1 }
  0xf6   : > { %v1472_v20 = vpack.c.bf16 %v968_v15, %v968_v15  ;;  %v969_v21 = vmax.f32 %v937_v16, 0.0  ;;  %v1586_v22 = vpop.f32.mrb[8].mxu0  ;;  %v529_v23 = vpop.f32.mrb[9].mxu1 }
  0xf7   : > { %1131 = vst.msk [vmem:[%s1836_s15 + $0x18] sm:$0xf] %vm1124_vm2, %v1474_v17  ;;  %v1475_v24 = vpack.c.bf16 %v971_v18, %v971_v18  ;;  %v839_v25 = vadd.f32 %v1586_v22, %v1550_v19  ;;  %v830_v26 = vpop.f32.mrb[9].mxu0  ;;  %v1551_v27 = vpop.f32.mrb[10].mxu1 }
  0xf8   : > { %1129 = vst.msk [vmem:[%s1836_s15 + $0x10] sm:$0xf] %vm1124_vm2, %v1472_v20  ;;  %v1473_v28 = vpack.c.bf16 %v969_v21, %v969_v21  ;;  %v831_v29 = vadd.f32 %v830_v26, %v529_v23  ;;  %v1587_v30 = vpop.f32.mrb[10].mxu0  ;;  %1169 = vrot.lane.b32.xlu0 %v1474_v17, %s1695_s16  ;;  %v532_v31 = vpop.f32.mrb[11].mxu1 }
  0xf9   : > { %1132 = vst.msk [vmem:[%s1836_s15 + $0x1c] sm:$0xf] %vm1124_vm2, %v1475_v24  ;;  %v942_v32 = vadd.f32 %v1827_v41, %v839_v25  ;;  %v842_v33 = vadd.f32 %v1587_v30, %v1551_v27  ;;  %1171 = vrot.lane.b32.xlu1 %v1475_v24, %s1695_s16  ;;  %v833_v34 = vpop.f32.mrb[11].mxu0 }
  0xfa   : > { %1130 = vst.msk [vmem:[%s1836_s15 + $0x14] sm:$0xf] %vm1124_vm2, %v1473_v28  ;;  %v940_v35 = vadd.f32 %v1827_v41, %v831_v29  ;;  %v834_v36 = vadd.f32 %v833_v34, %v532_v31 }
  0xfb   : > { %v974_v37 = vmax.f32 %v942_v32, 0.0  ;;  %v943_v38 = vadd.f32 %v1827_v41, %v842_v33 }
  0xfc   : > { %v972_v39 = vmax.f32 %v940_v35, 0.0  ;;  %v941_v40 = vadd.f32 %v1827_v41, %v834_v36  ;;  %1165 = vrot.lane.b32.xlu0 %v1472_v20, %s1695_s16 }
  0xfd   : > { %v1478_v42 = vpack.c.bf16 %v974_v37, %v974_v37  ;;  %v975_v43 = vmax.f32 %v943_v38, 0.0  ;;  %1167 = vrot.lane.b32.xlu1 %v1473_v28, %s1695_s16  ;;  %v1554_v44 = vpop.f32.mrb[12].mxu1 }
  0xfe   : > { %v1476_v45 = vpack.c.bf16 %v972_v39, %v972_v39  ;;  %v973_v46 = vmax.f32 %v941_v40, 0.0  ;;  %v1590_v47 = vpop.f32.mrb[12].mxu0  ;;  %v545_v48 = vpop.f32.mrb[13].mxu1 }
  0xff   : > { %1135 = vst.msk [vmem:[%s1836_s15 + $0x28] sm:$0xf] %vm1124_vm2, %v1478_v42  ;;  %v1479_v49 = vpack.c.bf16 %v975_v43, %v975_v43  ;;  %v855_v50 = vadd.f32 %v1590_v47, %v1554_v44  ;;  %v846_v51 = vpop.f32.mrb[13].mxu0  ;;  %v1555_v52 = vpop.f32.mrb[14].mxu1 }
 0x100   : > { %1133 = vst.msk [vmem:[%s1836_s15 + $0x20] sm:$0xf] %vm1124_vm2, %v1476_v45  ;;  %v1477_v53 = vpack.c.bf16 %v973_v46, %v973_v46  ;;  %v847_v54 = vadd.f32 %v846_v51, %v545_v48  ;;  %v1591_v55 = vpop.f32.mrb[14].mxu0  ;;  %1177 = vrot.lane.b32.xlu0 %v1478_v42, %s1695_s16  ;;  %v548_v56 = vpop.f32.mrb[15].mxu1 }
 0x101   : > { %1136 = vst.msk [vmem:[%s1836_s15 + $0x2c] sm:$0xf] %vm1124_vm2, %v1479_v49  ;;  %v946_v57 = vadd.f32 %v1827_v41, %v855_v50  ;;  %v858_v58 = vadd.f32 %v1591_v55, %v1555_v52  ;;  %v849_v59 = vpop.f32.mrb[15].mxu0  ;;  %1179 = vrot.lane.b32.xlu1 %v1479_v49, %s1695_s16 }
 0x102   : > { %1134 = vst.msk [vmem:[%s1836_s15 + $0x24] sm:$0xf] %vm1124_vm2, %v1477_v53  ;;  %v944_v60 = vadd.f32 %v1827_v41, %v847_v54  ;;  %v850_v61 = vadd.f32 %v849_v59, %v548_v56 }
 0x103   : > { %v978_v62 = vmax.f32 %v946_v57, 0.0  ;;  %v947_v63 = vadd.f32 %v1827_v41, %v858_v58 }
 0x104   : > { %v976_v0 = vmax.f32 %v944_v60, 0.0  ;;  %v945_v1 = vadd.f32 %v1827_v41, %v850_v61  ;;  %1173 = vrot.lane.b32.xlu0 %v1476_v45, %s1695_s16 }
 0x105   : > { %v1482_v2 = vpack.c.bf16 %v978_v62, %v978_v62  ;;  %v979_v3 = vmax.f32 %v947_v63, 0.0  ;;  %1175 = vrot.lane.b32.xlu1 %v1477_v53, %s1695_s16  ;;  %v1558_v4 = vpop.f32.mrb[16].mxu1 }
 0x106   : > { %v1480_v5 = vpack.c.bf16 %v976_v0, %v976_v0  ;;  %v977_v6 = vmax.f32 %v945_v1, 0.0  ;;  %v1594_v7 = vpop.f32.mrb[16].mxu0  ;;  %v561_v8 = vpop.f32.mrb[17].mxu1 }
 0x107   : > { %1139 = vst.msk [vmem:[%s1836_s15 + $0x38] sm:$0xf] %vm1124_vm2, %v1482_v2  ;;  %v1483_v9 = vpack.c.bf16 %v979_v3, %v979_v3  ;;  %v871_v10 = vadd.f32 %v1594_v7, %v1558_v4  ;;  %v862_v11 = vpop.f32.mrb[17].mxu0  ;;  %v1559_v12 = vpop.f32.mrb[18].mxu1 }
 0x108   : > { %1137 = vst.msk [vmem:[%s1836_s15 + $0x30] sm:$0xf] %vm1124_vm2, %v1480_v5  ;;  %v1481_v13 = vpack.c.bf16 %v977_v6, %v977_v6  ;;  %v863_v14 = vadd.f32 %v862_v11, %v561_v8  ;;  %v1595_v15 = vpop.f32.mrb[18].mxu0  ;;  %1185 = vrot.lane.b32.xlu0 %v1482_v2, %s1695_s16  ;;  %v564_v16 = vpop.f32.mrb[19].mxu1 }
 0x109   : > { %1140 = vst.msk [vmem:[%s1836_s15 + $0x3c] sm:$0xf] %vm1124_vm2, %v1483_v9  ;;  %v950_v17 = vadd.f32 %v1827_v41, %v871_v10  ;;  %v874_v18 = vadd.f32 %v1595_v15, %v1559_v12  ;;  %v865_v19 = vpop.f32.mrb[19].mxu0  ;;  %1187 = vrot.lane.b32.xlu1 %v1483_v9, %s1695_s16 }
 0x10a   : > { %1138 = vst.msk [vmem:[%s1836_s15 + $0x34] sm:$0xf] %vm1124_vm2, %v1481_v13  ;;  %v948_v20 = vadd.f32 %v1827_v41, %v863_v14  ;;  %v866_v21 = vadd.f32 %v865_v19, %v564_v16 }
 0x10b   : > { %v982_v22 = vmax.f32 %v950_v17, 0.0  ;;  %v951_v23 = vadd.f32 %v1827_v41, %v874_v18 }
 0x10c   : > { %v980_v24 = vmax.f32 %v948_v20, 0.0  ;;  %v949_v25 = vadd.f32 %v1827_v41, %v866_v21  ;;  %1181 = vrot.lane.b32.xlu0 %v1480_v5, %s1695_s16 }
 0x10d   : > { %v1486_v26 = vpack.c.bf16 %v982_v22, %v982_v22  ;;  %v983_v27 = vmax.f32 %v951_v23, 0.0  ;;  %1183 = vrot.lane.b32.xlu1 %v1481_v13, %s1695_s16  ;;  %v1562_v28 = vpop.f32.mrb[20].mxu1 }
 0x10e   : > { %v1484_v29 = vpack.c.bf16 %v980_v24, %v980_v24  ;;  %v981_v30 = vmax.f32 %v949_v25, 0.0  ;;  %v1598_v31 = vpop.f32.mrb[20].mxu0  ;;  %v577_v32 = vpop.f32.mrb[21].mxu1 }
 0x10f   : > { %1143 = vst.msk [vmem:[%s1836_s15 + $0x48] sm:$0xf] %vm1124_vm2, %v1486_v26  ;;  %v1487_v33 = vpack.c.bf16 %v983_v27, %v983_v27  ;;  %v887_v34 = vadd.f32 %v1598_v31, %v1562_v28  ;;  %v878_v35 = vpop.f32.mrb[21].mxu0  ;;  %v1563_v36 = vpop.f32.mrb[22].mxu1 }
 0x110   : > { %1141 = vst.msk [vmem:[%s1836_s15 + $0x40] sm:$0xf] %vm1124_vm2, %v1484_v29  ;;  %v1485_v37 = vpack.c.bf16 %v981_v30, %v981_v30  ;;  %v879_v38 = vadd.f32 %v878_v35, %v577_v32  ;;  %v1599_v39 = vpop.f32.mrb[22].mxu0  ;;  %1193 = vrot.lane.b32.xlu0 %v1486_v26, %s1695_s16  ;;  %v580_v40 = vpop.f32.mrb[23].mxu1 }
 0x111   : > { %1144 = vst.msk [vmem:[%s1836_s15 + $0x4c] sm:$0xf] %vm1124_vm2, %v1487_v33  ;;  %v954_v42 = vadd.f32 %v1827_v41, %v887_v34  ;;  %v890_v43 = vadd.f32 %v1599_v39, %v1563_v36  ;;  %v881_v44 = vpop.f32.mrb[23].mxu0  ;;  %1195 = vrot.lane.b32.xlu1 %v1487_v33, %s1695_s16 }
 0x112   : > { %1142 = vst.msk [vmem:[%s1836_s15 + $0x44] sm:$0xf] %vm1124_vm2, %v1485_v37  ;;  %v952_v45 = vadd.f32 %v1827_v41, %v879_v38  ;;  %v882_v46 = vadd.f32 %v881_v44, %v580_v40 }
 0x113   : > { %v986_v47 = vmax.f32 %v954_v42, 0.0  ;;  %v955_v48 = vadd.f32 %v1827_v41, %v890_v43 }
 0x114   : > { %v984_v49 = vmax.f32 %v952_v45, 0.0  ;;  %v953_v50 = vadd.f32 %v1827_v41, %v882_v46  ;;  %1189 = vrot.lane.b32.xlu0 %v1484_v29, %s1695_s16 }
 0x115   : > { %v1490_v51 = vpack.c.bf16 %v986_v47, %v986_v47  ;;  %v987_v52 = vmax.f32 %v955_v48, 0.0  ;;  %1191 = vrot.lane.b32.xlu1 %v1485_v37, %s1695_s16  ;;  %v1566_v53 = vpop.f32.mrb[24].mxu1 }
 0x116   : > { %v1488_v54 = vpack.c.bf16 %v984_v49, %v984_v49  ;;  %v985_v55 = vmax.f32 %v953_v50, 0.0  ;;  %v1602_v56 = vpop.f32.mrb[24].mxu0  ;;  %v593_v57 = vpop.f32.mrb[25].mxu1 }
 0x117   : > { %1147 = vst.msk [vmem:[%s1836_s15 + $0x58] sm:$0xf] %vm1124_vm2, %v1490_v51  ;;  %v1491_v58 = vpack.c.bf16 %v987_v52, %v987_v52  ;;  %v903_v59 = vadd.f32 %v1602_v56, %v1566_v53  ;;  %v894_v60 = vpop.f32.mrb[25].mxu0  ;;  %v1567_v61 = vpop.f32.mrb[26].mxu1 }
 0x118   : > { %1145 = vst.msk [vmem:[%s1836_s15 + $0x50] sm:$0xf] %vm1124_vm2, %v1488_v54  ;;  %v1489_v62 = vpack.c.bf16 %v985_v55, %v985_v55  ;;  %v895_v63 = vadd.f32 %v894_v60, %v593_v57  ;;  %v1603_v0 = vpop.f32.mrb[26].mxu0  ;;  %1201 = vrot.lane.b32.xlu0 %v1490_v51, %s1695_s16  ;;  %v596_v1 = vpop.f32.mrb[27].mxu1 }
 0x119   : > { %1148 = vst.msk [vmem:[%s1836_s15 + $0x5c] sm:$0xf] %vm1124_vm2, %v1491_v58  ;;  %v958_v2 = vadd.f32 %v1827_v41, %v903_v59  ;;  %v906_v3 = vadd.f32 %v1603_v0, %v1567_v61  ;;  %v897_v4 = vpop.f32.mrb[27].mxu0  ;;  %1203 = vrot.lane.b32.xlu1 %v1491_v58, %s1695_s16 }
 0x11a   : > { %1146 = vst.msk [vmem:[%s1836_s15 + $0x54] sm:$0xf] %vm1124_vm2, %v1489_v62  ;;  %v956_v5 = vadd.f32 %v1827_v41, %v895_v63  ;;  %v898_v6 = vadd.f32 %v897_v4, %v596_v1 }
 0x11b   : > { %v990_v7 = vmax.f32 %v958_v2, 0.0  ;;  %v959_v8 = vadd.f32 %v1827_v41, %v906_v3 }
 0x11c   : > { %v988_v9 = vmax.f32 %v956_v5, 0.0  ;;  %v957_v10 = vadd.f32 %v1827_v41, %v898_v6  ;;  %1197 = vrot.lane.b32.xlu0 %v1488_v54, %s1695_s16 }
 0x11d   : > { %v1494_v11 = vpack.c.bf16 %v990_v7, %v990_v7  ;;  %v991_v12 = vmax.f32 %v959_v8, 0.0  ;;  %1199 = vrot.lane.b32.xlu1 %v1489_v62, %s1695_s16  ;;  %v1570_v13 = vpop.f32.mrb[28].mxu1 }
 0x11e   : > { %v1492_v14 = vpack.c.bf16 %v988_v9, %v988_v9  ;;  %v989_v15 = vmax.f32 %v957_v10, 0.0  ;;  %v1606_v16 = vpop.f32.mrb[28].mxu0  ;;  %v609_v17 = vpop.f32.mrb[29].mxu1 }
 0x11f   : > { %1151 = vst.msk [vmem:[%s1836_s15 + $0x68] sm:$0xf] %vm1124_vm2, %v1494_v11  ;;  %v1495_v18 = vpack.c.bf16 %v991_v12, %v991_v12  ;;  %v919_v19 = vadd.f32 %v1606_v16, %v1570_v13  ;;  %v910_v20 = vpop.f32.mrb[29].mxu0  ;;  %v1571_v21 = vpop.f32.mrb[30].mxu1 }
 0x120   : > { %1149 = vst.msk [vmem:[%s1836_s15 + $0x60] sm:$0xf] %vm1124_vm2, %v1492_v14  ;;  %v1493_v22 = vpack.c.bf16 %v989_v15, %v989_v15  ;;  %v911_v23 = vadd.f32 %v910_v20, %v609_v17  ;;  %v1607_v24 = vpop.f32.mrb[30].mxu0  ;;  %1209 = vrot.lane.b32.xlu0 %v1494_v11, %s1695_s16  ;;  %v612_v25 = vpop.f32.mrb[31].mxu1 }
 0x121   : > { %1152 = vst.msk [vmem:[%s1836_s15 + $0x6c] sm:$0xf] %vm1124_vm2, %v1495_v18  ;;  %v962_v26 = vadd.f32 %v1827_v41, %v919_v19  ;;  %v922_v27 = vadd.f32 %v1607_v24, %v1571_v21  ;;  %v913_v28 = vpop.f32.mrb[31].mxu0  ;;  %1211 = vrot.lane.b32.xlu1 %v1495_v18, %s1695_s16 }
 0x122   : > { %1150 = vst.msk [vmem:[%s1836_s15 + $0x64] sm:$0xf] %vm1124_vm2, %v1493_v22  ;;  %v960_v29 = vadd.f32 %v1827_v41, %v911_v23  ;;  %v914_v30 = vadd.f32 %v913_v28, %v612_v25 }
 0x123   : > { %v994_v31 = vmax.f32 %v962_v26, 0.0  ;;  %v963_v32 = vadd.f32 %v1827_v41, %v922_v27 }
 0x124   : > { %v992_v33 = vmax.f32 %v960_v29, 0.0  ;;  %v961_v34 = vadd.f32 %v1827_v41, %v914_v30  ;;  %1205 = vrot.lane.b32.xlu0 %v1492_v14, %s1695_s16 }
 0x125   : > { %v1498_v35 = vpack.c.bf16 %v994_v31, %v994_v31  ;;  %v995_v36 = vmax.f32 %v963_v32, 0.0  ;;  %1207 = vrot.lane.b32.xlu1 %v1493_v22, %s1695_s16 }
 0x126   : > { %v1496_v37 = vpack.c.bf16 %v992_v33, %v992_v33  ;;  %v993_v38 = vmax.f32 %v961_v34, 0.0 }
 0x127   : > { %1155 = vst.msk [vmem:[%s1836_s15 + $0x78] sm:$0xf] %vm1124_vm2, %v1498_v35  ;;  %v1499_v39 = vpack.c.bf16 %v995_v36, %v995_v36 }
 0x128   : > { %1153 = vst.msk [vmem:[%s1836_s15 + $0x70] sm:$0xf] %vm1124_vm2, %v1496_v37  ;;  %v1497_v40 = vpack.c.bf16 %v993_v38, %v993_v38  ;;  %1213 = vrot.lane.b32.xlu0 %v1496_v37, %s1695_s16 }
 0x129   : > { %1156 = vst.msk [vmem:[%s1836_s15 + $0x7c] sm:$0xf] %vm1124_vm2, %v1499_v39 }
 0x12a   : > { %1154 = vst.msk [vmem:[%s1836_s15 + $0x74] sm:$0xf] %vm1124_vm2, %v1497_v40  ;;  %1215 = vrot.lane.b32.xlu1 %v1497_v40, %s1695_s16 }
 0x12c   : > { %1217 = vrot.lane.b32.xlu0 %v1498_v35, %s1695_s16 }
 0x12e   : > { %1219 = vrot.lane.b32.xlu1 %v1499_v39, %s1695_s16 }
 0x161   : > { %v1162_v41 = vpop.permute.xlu1 %1161 }
 0x162   : > { %1256 = vst.msk [vmem:[%s1836_s15 + $0x8] sm:$0xf] %vm1253_vm3, %v1162_v41  ;;  %v1158_v42 = vpop.permute.xlu0 %1157 }
 0x163   : > { %1254 = vst.msk [vmem:[%s1836_s15] sm:$0xf] %vm1253_vm3, %v1158_v42 }
 0x165   : > { %v1164_v43 = vpop.permute.xlu1 %1163 }
 0x166   : > { %1257 = vst.msk [vmem:[%s1836_s15 + $0xc] sm:$0xf] %vm1253_vm3, %v1164_v43  ;;  %v1160_v44 = vpop.permute.xlu0 %1159 }
 0x167   : > { %1255 = vst.msk [vmem:[%s1836_s15 + $0x4] sm:$0xf] %vm1253_vm3, %v1160_v44 }
 0x16a   : > { %v1170_v45 = vpop.permute.xlu0 %1169 }
 0x16b   : > { %1260 = vst.msk [vmem:[%s1836_s15 + $0x18] sm:$0xf] %vm1253_vm3, %v1170_v45  ;;  %v1172_v46 = vpop.permute.xlu1 %1171 }
 0x16c   : > { %1261 = vst.msk [vmem:[%s1836_s15 + $0x1c] sm:$0xf] %vm1253_vm3, %v1172_v46 }
 0x16e   : > { %v1166_v47 = vpop.permute.xlu0 %1165 }
 0x16f   : > { %1258 = vst.msk [vmem:[%s1836_s15 + $0x10] sm:$0xf] %vm1253_vm3, %v1166_v47  ;;  %v1168_v48 = vpop.permute.xlu1 %1167 }
 0x170   : > { %1259 = vst.msk [vmem:[%s1836_s15 + $0x14] sm:$0xf] %vm1253_vm3, %v1168_v48 }
 0x172   : > { %v1178_v49 = vpop.permute.xlu0 %1177 }
 0x173   : > { %1264 = vst.msk [vmem:[%s1836_s15 + $0x28] sm:$0xf] %vm1253_vm3, %v1178_v49  ;;  %v1180_v50 = vpop.permute.xlu1 %1179 }
 0x174   : > { %1265 = vst.msk [vmem:[%s1836_s15 + $0x2c] sm:$0xf] %vm1253_vm3, %v1180_v50 }
 0x176   : > { %v1174_v51 = vpop.permute.xlu0 %1173 }
 0x177   : > { %1262 = vst.msk [vmem:[%s1836_s15 + $0x20] sm:$0xf] %vm1253_vm3, %v1174_v51  ;;  %v1176_v52 = vpop.permute.xlu1 %1175 }
 0x178   : > { %1263 = vst.msk [vmem:[%s1836_s15 + $0x24] sm:$0xf] %vm1253_vm3, %v1176_v52 }
 0x17a   : > { %v1186_v53 = vpop.permute.xlu0 %1185 }
 0x17b   : > { %1268 = vst.msk [vmem:[%s1836_s15 + $0x38] sm:$0xf] %vm1253_vm3, %v1186_v53  ;;  %v1188_v54 = vpop.permute.xlu1 %1187 }
 0x17c   : > { %1269 = vst.msk [vmem:[%s1836_s15 + $0x3c] sm:$0xf] %vm1253_vm3, %v1188_v54 }
 0x17e   : > { %v1182_v55 = vpop.permute.xlu0 %1181 }
 0x17f   : > { %1266 = vst.msk [vmem:[%s1836_s15 + $0x30] sm:$0xf] %vm1253_vm3, %v1182_v55  ;;  %v1184_v56 = vpop.permute.xlu1 %1183 }
 0x180   : > { %1267 = vst.msk [vmem:[%s1836_s15 + $0x34] sm:$0xf] %vm1253_vm3, %v1184_v56 }
 0x182   : > { %v1194_v57 = vpop.permute.xlu0 %1193 }
 0x183   : > { %1272 = vst.msk [vmem:[%s1836_s15 + $0x48] sm:$0xf] %vm1253_vm3, %v1194_v57  ;;  %v1196_v58 = vpop.permute.xlu1 %1195 }
 0x184   : > { %1273 = vst.msk [vmem:[%s1836_s15 + $0x4c] sm:$0xf] %vm1253_vm3, %v1196_v58 }
 0x186   : > { %v1190_v59 = vpop.permute.xlu0 %1189 }
 0x187   : > { %1270 = vst.msk [vmem:[%s1836_s15 + $0x40] sm:$0xf] %vm1253_vm3, %v1190_v59  ;;  %v1192_v60 = vpop.permute.xlu1 %1191 }
 0x188   : > { %1271 = vst.msk [vmem:[%s1836_s15 + $0x44] sm:$0xf] %vm1253_vm3, %v1192_v60 }
 0x18a   : > { %v1202_v61 = vpop.permute.xlu0 %1201 }
 0x18b   : > { %1276 = vst.msk [vmem:[%s1836_s15 + $0x58] sm:$0xf] %vm1253_vm3, %v1202_v61  ;;  %v1204_v62 = vpop.permute.xlu1 %1203 }
 0x18c   : > { %1277 = vst.msk [vmem:[%s1836_s15 + $0x5c] sm:$0xf] %vm1253_vm3, %v1204_v62 }
 0x18e   : > { %v1198_v63 = vpop.permute.xlu0 %1197 }
 0x18f   : > { %1274 = vst.msk [vmem:[%s1836_s15 + $0x50] sm:$0xf] %vm1253_vm3, %v1198_v63  ;;  %v1200_v0 = vpop.permute.xlu1 %1199 }
 0x190   : > { %1275 = vst.msk [vmem:[%s1836_s15 + $0x54] sm:$0xf] %vm1253_vm3, %v1200_v0 }
 0x192   : > { %v1210_v1 = vpop.permute.xlu0 %1209 }
 0x193   : > { %1280 = vst.msk [vmem:[%s1836_s15 + $0x68] sm:$0xf] %vm1253_vm3, %v1210_v1  ;;  %v1212_v2 = vpop.permute.xlu1 %1211 }
 0x194   : > { %1281 = vst.msk [vmem:[%s1836_s15 + $0x6c] sm:$0xf] %vm1253_vm3, %v1212_v2 }
 0x196   : > { %v1206_v3 = vpop.permute.xlu0 %1205 }
 0x197   : > { %1278 = vst.msk [vmem:[%s1836_s15 + $0x60] sm:$0xf] %vm1253_vm3, %v1206_v3  ;;  %v1208_v4 = vpop.permute.xlu1 %1207 }
 0x198   : > { %1279 = vst.msk [vmem:[%s1836_s15 + $0x64] sm:$0xf] %vm1253_vm3, %v1208_v4 }
 0x19a   : > { %v1214_v5 = vpop.permute.xlu0 %1213 }
 0x19b   : > { %1282 = vst.msk [vmem:[%s1836_s15 + $0x70] sm:$0xf] %vm1253_vm3, %v1214_v5 }
 0x19c   : > { %v1216_v6 = vpop.permute.xlu1 %1215 }
 0x19d   : > { %1283 = vst.msk [vmem:[%s1836_s15 + $0x74] sm:$0xf] %vm1253_vm3, %v1216_v6 }
 0x19e   : > { %v1218_v7 = vpop.permute.xlu0 %1217 }
 0x19f   : > { %1284 = vst.msk [vmem:[%s1836_s15 + $0x78] sm:$0xf] %vm1253_vm3, %v1218_v7 }
 0x1a0   : > { %v1220_v8 = vpop.permute.xlu1 %1219 }
 0x1a1   : > { %1285 = vst.msk [vmem:[%s1836_s15 + $0x7c] sm:$0xf] %vm1253_vm3, %v1220_v8 }
 0x1a2 PF: > { %s15_s18 = sadd.s32 1, %s1693_s18  }
 0x1a3   : > { %p12_p4 = scmp.ge.s32.totalorder %s15_s18, 4  }
 0x1a5   :  { %14 = sbr.rel (!%p12_p4) target bundleno = 1 (0x1), region = 73 }

// kernel: cnn_forward.15
= control target key start
LH: loop header
LB: loop body
LE: loop exit
PB: predicated region body
PF: predicated region fallthrough
CT: control target
= control target key end

     0   :  { %vm108_vm0 = vcmask 130048   ;;  %s805_s6 = smov 112   ;;  %vm506_vm1 = vcmask 125952   ;;  %vm611_vm2 = vcmask 257152   ;;  %s1091_s3 = inlined_call_operand.vmem [shape: bf16[16,16], index: 3, kind: input, shape index: {}]   ;;  %s1092_s1 = inlined_call_operand.vmem [shape: bf16[128,16], index: 1, kind: input, shape index: {}]   ;;  %s1093_s4 = inlined_call_operand.vmem [shape: f32[1,32], index: 4, kind: input, shape index: {}]   ;;  %s1094_s2 = inlined_call_operand.vmem [shape: bf16[16,16], index: 2, kind: input, shape index: {}]   ;;  %s1095_s0 = inlined_call_operand.vmem [shape: bf16[128,16], index: 0, kind: input, shape index: {}]   ;;  %s1096_s5 = inlined_call_operand.vmem [shape: bf16[128,32], index: 5, kind: output, shape index: {}]  }
   0x1   :  { %v787_v0 = vld [vmem:[%s1091_s3] sm:$0xff]   ;;  %v789_v2 = vld [vmem:[%s1092_s1 + $0x8] sm:$0xff]   ;;  %v790_v3 = vld [vmem:[%s1092_s1 + $0x10] sm:$0xff]  }
   0x2   :  { %v788_v1 = vld [vmem:[%s1092_s1] sm:$0xff]   ;;  %767 = vmatprep.subr.bf16.mxu1 %v787_v0  ;;  %v791_v4 = vld [vmem:[%s1092_s1 + $0x18] sm:$0xff]   ;;  %v798_v9 = vld [vmem:[%s1095_s0 + $0x8] sm:$0xff]  }
   0x3   :  { %768 = vmatpush3.bf16.msra.mxu1 %v787_v0  ;;  %769 = vmatprep.mubr.msk.bf16.mxu1 %vm108_vm0, %v788_v1  ;;  %v792_v5 = vld [vmem:[%s1092_s1 + $0x20] sm:$0xff]   ;;  %v799_v10 = vld [vmem:[%s1095_s0 + $0x10] sm:$0xff]   ;;  %v793_v11 = vld [vmem:[%s1092_s1 + $0x28] sm:$0xff]  }
   0x4   :  { %v861_v6 = vld [vmem:[%s1093_s4] ss:$0 sm:$0xff]  ;;  %v794_v12 = vld [vmem:[%s1092_s1 + $0x30] sm:$0xff]   ;;  %v800_v13 = vld [vmem:[%s1095_s0 + $0x18] sm:$0xff]  }
   0x5   :  { %302 = vrot.lane.b32.xlu0 %v861_v6, %s805_s6  ;;  %v796_v7 = vld [vmem:[%s1094_s2] sm:$0xff]   ;;  %v795_v15 = vld [vmem:[%s1092_s1 + $0x38] sm:$0xff]   ;;  %v802_v16 = vld [vmem:[%s1095_s0 + $0x28] sm:$0xff]  }
   0x6   :  { %770 = vmatmul.mubr.msk.bf16.vlgmr.msra.gmra.mrb[0].mxu1 %vm108_vm0, %v789_v2  ;;  %v797_v8 = vld [vmem:[%s1095_s0] sm:$0xff]   ;;  %749 = vmatprep.subr.bf16.mxu0 %v796_v7  ;;  %v803_v17 = vld [vmem:[%s1095_s0 + $0x30] sm:$0xff]   ;;  %v804_v18 = vld [vmem:[%s1095_s0 + $0x38] sm:$0xff]  }
   0x7   :  { %773 = vmatprep.mubr.msk.bf16.mxu1 %vm108_vm0, %v790_v3  ;;  %750 = vmatpush3.bf16.msra.mxu0 %v796_v7  ;;  %v801_v14 = vld [vmem:[%s1095_s0 + $0x20] sm:$0xff]   ;;  %s806_s0 = smov 16  }
   0x8   :  { %751 = vmatprep.mubr.msk.bf16.mxu0 %vm108_vm0, %v797_v8 }
   0xa   :  { %752 = vmatmul.mubr.msk.bf16.vlgmr.msra.gmra.mrb[0].mxu0 %vm108_vm0, %v798_v9 }
   0xb   :  { %755 = vmatprep.mubr.msk.bf16.mxu0 %vm108_vm0, %v799_v10 }
   0xe   :  { %774 = vmatmul.mubr.msk.bf16.gmra.mrb[4].mxu1 %vm108_vm0, %v791_v4 }
   0xf   :  { %777 = vmatprep.mubr.msk.bf16.mxu1 %vm108_vm0, %v792_v5 }
  0x12   :  { %756 = vmatmul.mubr.msk.bf16.gmra.mrb[4].mxu0 %vm108_vm0, %v800_v13 }
  0x13   :  { %759 = vmatprep.mubr.msk.bf16.mxu0 %vm108_vm0, %v801_v14 }
  0x16   :  { %778 = vmatmul.mubr.msk.bf16.gmra.mrb[8].mxu1 %vm108_vm0, %v793_v11 }
  0x17   :  { %781 = vmatprep.mubr.msk.bf16.mxu1 %vm108_vm0, %v794_v12 }
  0x1a   :  { %760 = vmatmul.mubr.msk.bf16.gmra.mrb[8].mxu0 %vm108_vm0, %v802_v16 }
  0x1b   :  { %763 = vmatprep.mubr.msk.bf16.mxu0 %vm108_vm0, %v803_v17 }
  0x1e   :  { %782 = vmatmul.mubr.msk.bf16.gmra.mrb[12].mxu1 %vm108_vm0, %v795_v15 }
  0x22   :  { %764 = vmatmul.mubr.msk.bf16.gmra.mrb[12].mxu0 %vm108_vm0, %v804_v18 }
  0x77   :  { %v913_v19 = vpop.permute.xlu0 %302 }
  0xd9   :  { %v771_v20 = vpop.f32.mrb[0].mxu1 }
  0xda   :  { %v372_v21 = vadd.f32 %v771_v20, %v913_v19  ;;  %v363_v22 = vpop.f32.mrb[1].mxu1 }
  0xdb   :  { %v364_v23 = vadd.f32 %v363_v22, %v913_v19  ;;  %v772_v24 = vpop.f32.mrb[2].mxu1 }
  0xdc   :  { %v428_v25 = vmax.f32 %v372_v21, 0.0  ;;  %v375_v26 = vadd.f32 %v772_v24, %v913_v19  ;;  %v366_v27 = vpop.f32.mrb[3].mxu1 }
  0xdd   :  { %v426_v28 = vmax.f32 %v364_v23, 0.0  ;;  %v367_v29 = vadd.f32 %v366_v27, %v913_v19  ;;  %v753_v41 = vpop.f32.mrb[0].mxu0 }
  0xde   :  { %v717_v30 = vpack.c.bf16 %v428_v25, %v428_v25  ;;  %v429_v32 = vmax.f32 %v375_v26, 0.0  ;;  %v176_v45 = vadd.f32 %v753_v41, %v861_v6  ;;  %v167_v46 = vpop.f32.mrb[1].mxu0 }
  0xdf   :  { %v715_v31 = vpack.c.bf16 %v426_v28, %v426_v28  ;;  %v427_v33 = vmax.f32 %v367_v29, 0.0  ;;  %v168_v49 = vadd.f32 %v861_v6, %v167_v46  ;;  %v754_v50 = vpop.f32.mrb[2].mxu0 }
  0xe0   :  { %567 = vrot.lane.b32.xlu1 %v717_v30, %s806_s0  ;;  %v718_v38 = vpack.c.bf16 %v429_v32, %v429_v32  ;;  %v232_v53 = vmax.f32 %v176_v45, 0.0  ;;  %v179_v54 = vadd.f32 %v754_v50, %v861_v6  ;;  %v170_v55 = vpop.f32.mrb[3].mxu0 }
  0xe1   :  { %v716_v34 = vpack.c.bf16 %v427_v33, %v427_v33  ;;  %v775_v35 = vpop.f32.mrb[4].mxu1  ;;  %563 = vrot.lane.b32.xlu0 %v715_v31, %s806_s0  ;;  %v230_v56 = vmax.f32 %v168_v49, 0.0  ;;  %v171_v57 = vadd.f32 %v861_v6, %v170_v55 }
  0xe2   :  { %v388_v36 = vadd.f32 %v775_v35, %v913_v19  ;;  %v379_v37 = vpop.f32.mrb[5].mxu1  ;;  %v701_v60 = vpack.c.bf16 %v232_v53, %v232_v53  ;;  %v233_v61 = vmax.f32 %v179_v54, 0.0 }
  0xe3   :  { %v380_v39 = vadd.f32 %v379_v37, %v913_v19  ;;  %v776_v40 = vpop.f32.mrb[6].mxu1  ;;  %v699_v63 = vpack.c.bf16 %v230_v56, %v230_v56  ;;  %v231_v0 = vmax.f32 %v171_v57, 0.0 }
  0xe4   :  { %v432_v42 = vmax.f32 %v388_v36, 0.0  ;;  %v391_v43 = vadd.f32 %v776_v40, %v913_v19  ;;  %v382_v44 = vpop.f32.mrb[7].mxu1  ;;  %565 = vrot.lane.b32.xlu1 %v716_v34, %s806_s0  ;;  %509 = vst.msk [vmem:[%s1096_s5 + $0x8] sm:$0xf] %vm506_vm1, %v701_v60  ;;  %v702_v4 = vpack.c.bf16 %v233_v61, %v233_v61 }
  0xe5   :  { %v430_v47 = vmax.f32 %v380_v39, 0.0  ;;  %v383_v48 = vadd.f32 %v382_v44, %v913_v19  ;;  %569 = vrot.lane.b32.xlu0 %v718_v38, %s806_s0  ;;  %507 = vst.msk [vmem:[%s1096_s5] sm:$0xf] %vm506_vm1, %v699_v63  ;;  %v700_v8 = vpack.c.bf16 %v231_v0, %v231_v0  ;;  %v757_v9 = vpop.f32.mrb[4].mxu0 }
  0xe6   :  { %v721_v51 = vpack.c.bf16 %v432_v42, %v432_v42  ;;  %v433_v52 = vmax.f32 %v391_v43, 0.0  ;;  %510 = vst.msk [vmem:[%s1096_s5 + $0xc] sm:$0xf] %vm506_vm1, %v702_v4  ;;  %v192_v14 = vadd.f32 %v757_v9, %v861_v6  ;;  %v183_v15 = vpop.f32.mrb[5].mxu0 }
  0xe7   :  { %v431_v59 = vmax.f32 %v383_v48, 0.0  ;;  %v719_v1 = vpack.c.bf16 %v430_v47, %v430_v47  ;;  %508 = vst.msk [vmem:[%s1096_s5 + $0x4] sm:$0xf] %vm506_vm1, %v700_v8  ;;  %v184_v18 = vadd.f32 %v861_v6, %v183_v15  ;;  %v758_v20 = vpop.f32.mrb[6].mxu0 }
  0xe8   :  { %v722_v58 = vpack.c.bf16 %v433_v52, %v433_v52  ;;  %575 = vrot.lane.b32.xlu1 %v721_v51, %s806_s0  ;;  %v236_v23 = vmax.f32 %v192_v14, 0.0  ;;  %v195_v24 = vadd.f32 %v758_v20, %v861_v6  ;;  %v186_v25 = vpop.f32.mrb[7].mxu0 }
  0xe9   :  { %v779_v62 = vpop.f32.mrb[8].mxu1  ;;  %v720_v10 = vpack.c.bf16 %v431_v59, %v431_v59  ;;  %v234_v26 = vmax.f32 %v184_v18, 0.0  ;;  %v187_v27 = vadd.f32 %v861_v6, %v186_v25 }
  0xea   :  { %v404_v2 = vadd.f32 %v779_v62, %v913_v19  ;;  %v395_v3 = vpop.f32.mrb[9].mxu1  ;;  %577 = vrot.lane.b32.xlu0 %v722_v58, %s806_s0  ;;  %v705_v30 = vpack.c.bf16 %v236_v23, %v236_v23  ;;  %v237_v31 = vmax.f32 %v195_v24, 0.0 }
  0xeb   :  { %v396_v5 = vadd.f32 %v395_v3, %v913_v19  ;;  %v780_v7 = vpop.f32.mrb[10].mxu1  ;;  %v703_v33 = vpack.c.bf16 %v234_v26, %v234_v26  ;;  %v235_v34 = vmax.f32 %v187_v27, 0.0 }
  0xec   :  { %v436_v11 = vmax.f32 %v404_v2, 0.0  ;;  %v407_v12 = vadd.f32 %v780_v7, %v913_v19  ;;  %v398_v13 = vpop.f32.mrb[11].mxu1  ;;  %571 = vrot.lane.b32.xlu1 %v719_v1, %s806_s0  ;;  %513 = vst.msk [vmem:[%s1096_s5 + $0x18] sm:$0xf] %vm506_vm1, %v705_v30  ;;  %v706_v38 = vpack.c.bf16 %v237_v31, %v237_v31 }
  0xed   :  { %v434_v16 = vmax.f32 %v396_v5, 0.0  ;;  %v399_v17 = vadd.f32 %v398_v13, %v913_v19  ;;  %511 = vst.msk [vmem:[%s1096_s5 + $0x10] sm:$0xf] %vm506_vm1, %v703_v33  ;;  %v704_v41 = vpack.c.bf16 %v235_v34, %v235_v34  ;;  %v761_v42 = vpop.f32.mrb[8].mxu0 }
  0xee   :  { %v725_v21 = vpack.c.bf16 %v436_v11, %v436_v11  ;;  %v437_v22 = vmax.f32 %v407_v12, 0.0  ;;  %573 = vrot.lane.b32.xlu0 %v720_v10, %s806_s0  ;;  %514 = vst.msk [vmem:[%s1096_s5 + $0x1c] sm:$0xf] %vm506_vm1, %v706_v38  ;;  %v208_v45 = vadd.f32 %v761_v42, %v861_v6  ;;  %v199_v46 = vpop.f32.mrb[9].mxu0 }
  0xef   :  { %v435_v29 = vmax.f32 %v399_v17, 0.0  ;;  %v723_v35 = vpack.c.bf16 %v434_v16, %v434_v16  ;;  %512 = vst.msk [vmem:[%s1096_s5 + $0x14] sm:$0xf] %vm506_vm1, %v704_v41  ;;  %v200_v50 = vadd.f32 %v861_v6, %v199_v46  ;;  %v762_v51 = vpop.f32.mrb[10].mxu0 }
  0xf0   :  { %v726_v28 = vpack.c.bf16 %v437_v22, %v437_v22  ;;  %583 = vrot.lane.b32.xlu1 %v725_v21, %s806_s0  ;;  %v240_v53 = vmax.f32 %v208_v45, 0.0  ;;  %v211_v54 = vadd.f32 %v762_v51, %v861_v6  ;;  %v202_v55 = vpop.f32.mrb[11].mxu0 }
  0xf1   :  { %v783_v32 = vpop.f32.mrb[12].mxu1  ;;  %v724_v43 = vpack.c.bf16 %v435_v29, %v435_v29  ;;  %v238_v58 = vmax.f32 %v200_v50, 0.0 }
  0xf2   :  { %v420_v36 = vadd.f32 %v783_v32, %v913_v19  ;;  %v411_v37 = vpop.f32.mrb[13].mxu1  ;;  %585 = vrot.lane.b32.xlu0 %v726_v28, %s806_s0  ;;  %v709_v59 = vpack.c.bf16 %v240_v53, %v240_v53  ;;  %v241_v60 = vmax.f32 %v211_v54, 0.0 }
  0xf3   :  { %v412_v39 = vadd.f32 %v411_v37, %v913_v19  ;;  %v784_v40 = vpop.f32.mrb[14].mxu1  ;;  %v707_v63 = vpack.c.bf16 %v238_v58, %v238_v58 }
  0xf4   :  { %v414_v44 = vpop.f32.mrb[15].mxu1  ;;  %579 = vrot.lane.b32.xlu1 %v723_v35, %s806_s0  ;;  %v423_v48 = vadd.f32 %v784_v40, %v913_v19  ;;  %v440_v52 = vmax.f32 %v420_v36, 0.0  ;;  %517 = vst.msk [vmem:[%s1096_s5 + $0x28] sm:$0xf] %vm506_vm1, %v709_v59  ;;  %v710_v1 = vpack.c.bf16 %v241_v60, %v241_v60 }
  0xf5   :  { %v438_v47 = vmax.f32 %v412_v39, 0.0  ;;  %v415_v49 = vadd.f32 %v414_v44, %v913_v19  ;;  %v203_v19 = vadd.f32 %v861_v6, %v202_v55  ;;  %515 = vst.msk [vmem:[%s1096_s5 + $0x20] sm:$0xf] %vm506_vm1, %v707_v63  ;;  %v765_v4 = vpop.f32.mrb[12].mxu0 }
  0xf6   :  { %581 = vrot.lane.b32.xlu0 %v724_v43, %s806_s0  ;;  %v441_v61 = vmax.f32 %v423_v48, 0.0  ;;  %v729_v2 = vpack.c.bf16 %v440_v52, %v440_v52  ;;  %518 = vst.msk [vmem:[%s1096_s5 + $0x2c] sm:$0xf] %vm506_vm1, %v710_v1  ;;  %v224_v5 = vadd.f32 %v765_v4, %v861_v6  ;;  %v215_v7 = vpop.f32.mrb[13].mxu0 }
  0xf7   :  { %v727_v56 = vpack.c.bf16 %v438_v47, %v438_v47  ;;  %v439_v57 = vmax.f32 %v415_v49, 0.0  ;;  %v239_v0 = vmax.f32 %v203_v19, 0.0  ;;  %v216_v9 = vadd.f32 %v861_v6, %v215_v7  ;;  %v766_v10 = vpop.f32.mrb[14].mxu0 }
  0xf8   :  { %v730_v8 = vpack.c.bf16 %v441_v61, %v441_v61  ;;  %v244_v11 = vmax.f32 %v224_v5, 0.0  ;;  %v227_v12 = vadd.f32 %v766_v10, %v861_v6  ;;  %v218_v13 = vpop.f32.mrb[15].mxu0 }
  0xf9   :  { %v728_v62 = vpack.c.bf16 %v439_v57, %v439_v57  ;;  %587 = vrot.lane.b32.xlu1 %v727_v56, %s806_s0  ;;  %v708_v3 = vpack.c.bf16 %v239_v0, %v239_v0  ;;  %v242_v14 = vmax.f32 %v216_v9, 0.0  ;;  %v219_v15 = vadd.f32 %v861_v6, %v218_v13 }
  0xfa   :  { %v713_v16 = vpack.c.bf16 %v244_v11, %v244_v11  ;;  %v245_v17 = vmax.f32 %v227_v12, 0.0 }
  0xfb   :  { %589 = vrot.lane.b32.xlu0 %v728_v62, %s806_s0  ;;  %516 = vst.msk [vmem:[%s1096_s5 + $0x24] sm:$0xf] %vm506_vm1, %v708_v3  ;;  %v711_v18 = vpack.c.bf16 %v242_v14, %v242_v14  ;;  %v243_v20 = vmax.f32 %v219_v15, 0.0 }
  0xfc   :  { %521 = vst.msk [vmem:[%s1096_s5 + $0x38] sm:$0xf] %vm506_vm1, %v713_v16  ;;  %v714_v21 = vpack.c.bf16 %v245_v17, %v245_v17 }
  0xfd   :  { %591 = vrot.lane.b32.xlu1 %v729_v2, %s806_s0  ;;  %519 = vst.msk [vmem:[%s1096_s5 + $0x30] sm:$0xf] %vm506_vm1, %v711_v18  ;;  %v712_v22 = vpack.c.bf16 %v243_v20, %v243_v20 }
  0xfe   :  { %522 = vst.msk [vmem:[%s1096_s5 + $0x3c] sm:$0xf] %vm506_vm1, %v714_v21 }
  0xff   :  { %593 = vrot.lane.b32.xlu0 %v730_v8, %s806_s0  ;;  %520 = vst.msk [vmem:[%s1096_s5 + $0x34] sm:$0xf] %vm506_vm1, %v712_v22 }
 0x152   :  { %v568_v6 = vpop.permute.xlu1 %567 }
 0x153   :  { %614 = vst.msk [vmem:[%s1096_s5 + $0x8] sm:$0xf] %vm611_vm2, %v568_v6  ;;  %v564_v23 = vpop.permute.xlu0 %563 }
 0x154   :  { %612 = vst.msk [vmem:[%s1096_s5] sm:$0xf] %vm611_vm2, %v564_v23 }
 0x156   :  { %v566_v24 = vpop.permute.xlu1 %565 }
 0x157   :  { %613 = vst.msk [vmem:[%s1096_s5 + $0x4] sm:$0xf] %vm611_vm2, %v566_v24  ;;  %v570_v25 = vpop.permute.xlu0 %569 }
 0x158   :  { %615 = vst.msk [vmem:[%s1096_s5 + $0xc] sm:$0xf] %vm611_vm2, %v570_v25 }
 0x15a   :  { %v576_v26 = vpop.permute.xlu1 %575 }
 0x15b   :  { %618 = vst.msk [vmem:[%s1096_s5 + $0x18] sm:$0xf] %vm611_vm2, %v576_v26 }
 0x15c   :  { %v578_v27 = vpop.permute.xlu0 %577 }
 0x15d   :  { %619 = vst.msk [vmem:[%s1096_s5 + $0x1c] sm:$0xf] %vm611_vm2, %v578_v27 }
 0x15e   :  { %v572_v28 = vpop.permute.xlu1 %571 }
 0x15f   :  { %616 = vst.msk [vmem:[%s1096_s5 + $0x10] sm:$0xf] %vm611_vm2, %v572_v28 }
 0x160   :  { %v574_v29 = vpop.permute.xlu0 %573 }
 0x161   :  { %617 = vst.msk [vmem:[%s1096_s5 + $0x14] sm:$0xf] %vm611_vm2, %v574_v29 }
 0x162   :  { %v584_v30 = vpop.permute.xlu1 %583 }
 0x163   :  { %622 = vst.msk [vmem:[%s1096_s5 + $0x28] sm:$0xf] %vm611_vm2, %v584_v30 }
 0x164   :  { %v586_v31 = vpop.permute.xlu0 %585 }
 0x165   :  { %623 = vst.msk [vmem:[%s1096_s5 + $0x2c] sm:$0xf] %vm611_vm2, %v586_v31 }
 0x166   :  { %v580_v32 = vpop.permute.xlu1 %579 }
 0x167   :  { %620 = vst.msk [vmem:[%s1096_s5 + $0x20] sm:$0xf] %vm611_vm2, %v580_v32 }
 0x168   :  { %v582_v33 = vpop.permute.xlu0 %581 }
 0x169   :  { %621 = vst.msk [vmem:[%s1096_s5 + $0x24] sm:$0xf] %vm611_vm2, %v582_v33 }
 0x16b   :  { %v588_v34 = vpop.permute.xlu1 %587 }
 0x16c   :  { %624 = vst.msk [vmem:[%s1096_s5 + $0x30] sm:$0xf] %vm611_vm2, %v588_v34 }
 0x16d   :  { %v590_v35 = vpop.permute.xlu0 %589 }
 0x16e   :  { %625 = vst.msk [vmem:[%s1096_s5 + $0x34] sm:$0xf] %vm611_vm2, %v590_v35 }
 0x16f   :  { %v592_v36 = vpop.permute.xlu1 %591 }
 0x170   :  { %626 = vst.msk [vmem:[%s1096_s5 + $0x38] sm:$0xf] %vm611_vm2, %v592_v36 }
 0x171   :  { %v594_v37 = vpop.permute.xlu0 %593 }
 0x172   :  { %627 = vst.msk [vmem:[%s1096_s5 + $0x3c] sm:$0xf] %vm611_vm2, %v594_v37 }

// kernel: cnn_forward.13
= control target key start
LH: loop header
LB: loop body
LE: loop exit
PB: predicated region body
PF: predicated region fallthrough
CT: control target
= control target key end

     0   :  { %s976_s12 = smov 0   ;;  %s1140_s0 = inlined_call_operand.vmem [shape: bf16[512,16], index: 0, kind: input, shape index: {}]   ;;  %s1141_s1 = inlined_call_operand.vmem [shape: bf16[16,16], index: 1, kind: input, shape index: {}]   ;;  %s1142_s2 = inlined_call_operand.vmem [shape: f32[1,16], index: 2, kind: input, shape index: {}]   ;;  %s1143_s3 = inlined_call_operand.vmem [shape: bf16[512,16], index: 3, kind: output, shape index: {}]  }
   0x1 LB: > { %s761_s13 = sadd.s32 4294967295, %s954_s12   ;;  %p765_p0 = scmp.ge.s32.totalorder %s954_s12, 1  ;;  %s954_s12 = sphi %s976_s12, %s13_s12  }
   0x2   : > { %p138_p1 = scmp.lt.s32.totalorder %s954_s12, 3 }
   0x4   : > { %p139_p2 = pnand %p765_p0, %p138_p1 }
   0x5   : > { %v931_v0 = vld [vmem:[%s1141_s1] sm:$0xff] (!%p139_p2)   ;;  %s766_s16 = sshll.u32 (!%p139_p2), %s761_s13, 5  ;;  %vm302_vm0 = vcmask (!%p139_p2), 130048   ;;  %vm672_vm1 = vcmask (!%p139_p2), 125952  }
   0x6   : > { %142 = sbr.rel (%p139_p2) target bundleno = 265 (0x109), region = 32  ;;  %p163_p3 = scmp.lt.s32.totalorder (!%p139_p2), %s766_s16, 63  ;;  %887 = vmatprep.subr.bf16.mxu0 (!%p139_p2), %v931_v0  ;;  %921 = vmatprep.subr.bf16.mxu1 (!%p139_p2), %v931_v0  ;;  %v1032_v17 = vld [vmem:[%s1142_s2] ss:$0 sm:$0xff] (!%p139_p2) }
   0x7   : > { %888 = vmatpush3.bf16.msra.mxu0 (!%p139_p2), %v931_v0  ;;  %922 = vmatpush3.bf16.msra.mxu1 (!%p139_p2), %v931_v0 }
   0xd   : > { %s1145_s16 = smov (!%p163_p3, %s766_s16), 63 }
   0xe   : > { %s767_s17 = sshll.u32 %s1145_s16, 2 }
   0xf   : > { %s995_s20 = scalar_lea.vmem %s1140_s0, %s767_s17  ;;  %s1044_s25 = scalar_lea.vmem %s1143_s3, %s767_s17 }
  0x10   : > { %v932_v1 = vld [vmem:[%s995_s20] sm:$0xff]   ;;  %v934_v3 = vld [vmem:[%s995_s20 + $0x8] sm:$0xff]   ;;  %v936_v5 = vld [vmem:[%s995_s20 + $0x10] sm:$0xff]  }
  0x11   : > { %v933_v2 = vld [vmem:[%s995_s20 + $0x40] sm:$0xff]   ;;  %889 = vmatprep.mubr.msk.bf16.mxu0 %vm302_vm0, %v932_v1  ;;  %v935_v4 = vld [vmem:[%s995_s20 + $0x48] sm:$0xff]   ;;  %v937_v6 = vld [vmem:[%s995_s20 + $0x50] sm:$0xff]  }
  0x12   : > { %905 = vmatprep.mubr.msk.bf16.mxu1 %vm302_vm0, %v933_v2  ;;  %890 = vmatmul.mubr.msk.bf16.vlgmr.msra.gmra.mrb[0].mxu0 %vm302_vm0, %v934_v3  ;;  %v938_v7 = vld [vmem:[%s995_s20 + $0x18] sm:$0xff]   ;;  %v940_v9 = vld [vmem:[%s995_s20 + $0x20] sm:$0xff]   ;;  %v942_v11 = vld [vmem:[%s995_s20 + $0x28] sm:$0xff]  }
  0x13   : > { %906 = vmatmul.mubr.msk.bf16.vlgmr.msra.gmra.mrb[0].mxu1 %vm302_vm0, %v935_v4  ;;  %893 = vmatprep.mubr.msk.bf16.mxu0 %vm302_vm0, %v936_v5  ;;  %v939_v8 = vld [vmem:[%s995_s20 + $0x58] sm:$0xff]   ;;  %v941_v10 = vld [vmem:[%s995_s20 + $0x60] sm:$0xff]   ;;  %v943_v12 = vld [vmem:[%s995_s20 + $0x68] sm:$0xff]  }
  0x14   : > { %909 = vmatprep.mubr.msk.bf16.mxu1 %vm302_vm0, %v937_v6  ;;  %v944_v13 = vld [vmem:[%s995_s20 + $0x30] sm:$0xff]   ;;  %v946_v15 = vld [vmem:[%s995_s20 + $0x38] sm:$0xff]  }
  0x15   : > { %v945_v14 = vld [vmem:[%s995_s20 + $0x70] sm:$0xff]   ;;  %v947_v16 = vld [vmem:[%s995_s20 + $0x78] sm:$0xff]  }
  0x1a   : > { %894 = vmatmul.mubr.msk.bf16.gmra.mrb[4].mxu0 %vm302_vm0, %v938_v7 }
  0x1b   : > { %910 = vmatmul.mubr.msk.bf16.gmra.mrb[4].mxu1 %vm302_vm0, %v939_v8  ;;  %897 = vmatprep.mubr.msk.bf16.mxu0 %vm302_vm0, %v940_v9 }
  0x1c   : > { %913 = vmatprep.mubr.msk.bf16.mxu1 %vm302_vm0, %v941_v10 }
  0x22   : > { %898 = vmatmul.mubr.msk.bf16.gmra.mrb[8].mxu0 %vm302_vm0, %v942_v11 }
  0x23   : > { %914 = vmatmul.mubr.msk.bf16.gmra.mrb[8].mxu1 %vm302_vm0, %v943_v12  ;;  %901 = vmatprep.mubr.msk.bf16.mxu0 %vm302_vm0, %v944_v13 }
  0x24   : > { %917 = vmatprep.mubr.msk.bf16.mxu1 %vm302_vm0, %v945_v14 }
  0x2a   : > { %902 = vmatmul.mubr.msk.bf16.gmra.mrb[12].mxu0 %vm302_vm0, %v946_v15 }
  0x2b   : > { %918 = vmatmul.mubr.msk.bf16.gmra.mrb[12].mxu1 %vm302_vm0, %v947_v16 }
  0xe5   : > { %v891_v18 = vpop.f32.mrb[0].mxu0 }
  0xe6   : > { %v394_v19 = vadd.f32 %v891_v18, %v1032_v17  ;;  %v907_v20 = vpop.f32.mrb[0].mxu1  ;;  %v385_v21 = vpop.f32.mrb[1].mxu0 }
  0xe7   : > { %v458_v22 = vadd.f32 %v907_v20, %v1032_v17  ;;  %v386_v23 = vadd.f32 %v1032_v17, %v385_v21  ;;  %v449_v24 = vpop.f32.mrb[1].mxu1  ;;  %v892_v25 = vpop.f32.mrb[2].mxu0 }
  0xe8   : > { %v514_v26 = vmax.f32 %v394_v19, 0.0  ;;  %v450_v27 = vadd.f32 %v1032_v17, %v449_v24  ;;  %v397_v28 = vadd.f32 %v892_v25, %v1032_v17  ;;  %v908_v29 = vpop.f32.mrb[2].mxu1  ;;  %v388_v30 = vpop.f32.mrb[3].mxu0 }
  0xe9   : > { %v530_v31 = vmax.f32 %v458_v22, 0.0  ;;  %v512_v32 = vmax.f32 %v386_v23, 0.0  ;;  %v461_v33 = vadd.f32 %v908_v29, %v1032_v17  ;;  %v389_v34 = vadd.f32 %v1032_v17, %v388_v30  ;;  %v452_v35 = vpop.f32.mrb[3].mxu1 }
  0xea   : > { %v840_v36 = vpack.c.bf16 %v514_v26, %v514_v26  ;;  %v528_v37 = vmax.f32 %v450_v27, 0.0  ;;  %v515_v38 = vmax.f32 %v397_v28, 0.0  ;;  %v453_v39 = vadd.f32 %v1032_v17, %v452_v35 }
  0xeb   : > { %v856_v40 = vpack.c.bf16 %v530_v31, %v530_v31  ;;  %v838_v41 = vpack.c.bf16 %v512_v32, %v512_v32  ;;  %v531_v42 = vmax.f32 %v461_v33, 0.0  ;;  %v513_v43 = vmax.f32 %v389_v34, 0.0 }
  0xec   : > { %675 = vst.msk [vmem:[%s1044_s25 + $0x8] sm:$0xf] %vm672_vm1, %v840_v36  ;;  %v854_v44 = vpack.c.bf16 %v528_v37, %v528_v37  ;;  %v841_v45 = vpack.c.bf16 %v515_v38, %v515_v38  ;;  %v529_v46 = vmax.f32 %v453_v39, 0.0 }
  0xed   : > { %691 = vst.msk [vmem:[%s1044_s25 + $0x48] sm:$0xf] %vm672_vm1, %v856_v40  ;;  %673 = vst.msk [vmem:[%s1044_s25] sm:$0xf] %vm672_vm1, %v838_v41  ;;  %v857_v47 = vpack.c.bf16 %v531_v42, %v531_v42  ;;  %v839_v48 = vpack.c.bf16 %v513_v43, %v513_v43  ;;  %v895_v49 = vpop.f32.mrb[4].mxu0 }
  0xee   : > { %689 = vst.msk [vmem:[%s1044_s25 + $0x40] sm:$0xf] %vm672_vm1, %v854_v44  ;;  %676 = vst.msk [vmem:[%s1044_s25 + $0xc] sm:$0xf] %vm672_vm1, %v841_v45  ;;  %v855_v50 = vpack.c.bf16 %v529_v46, %v529_v46  ;;  %v410_v51 = vadd.f32 %v895_v49, %v1032_v17  ;;  %v911_v52 = vpop.f32.mrb[4].mxu1  ;;  %v401_v53 = vpop.f32.mrb[5].mxu0 }
  0xef   : > { %692 = vst.msk [vmem:[%s1044_s25 + $0x4c] sm:$0xf] %vm672_vm1, %v857_v47  ;;  %674 = vst.msk [vmem:[%s1044_s25 + $0x4] sm:$0xf] %vm672_vm1, %v839_v48  ;;  %v474_v54 = vadd.f32 %v911_v52, %v1032_v17  ;;  %v402_v55 = vadd.f32 %v1032_v17, %v401_v53  ;;  %v465_v56 = vpop.f32.mrb[5].mxu1  ;;  %v896_v57 = vpop.f32.mrb[6].mxu0 }
  0xf0   : > { %690 = vst.msk [vmem:[%s1044_s25 + $0x44] sm:$0xf] %vm672_vm1, %v855_v50  ;;  %v518_v58 = vmax.f32 %v410_v51, 0.0  ;;  %v466_v59 = vadd.f32 %v1032_v17, %v465_v56  ;;  %v413_v60 = vadd.f32 %v896_v57, %v1032_v17  ;;  %v912_v61 = vpop.f32.mrb[6].mxu1  ;;  %v404_v62 = vpop.f32.mrb[7].mxu0 }
  0xf1   : > { %v534_v63 = vmax.f32 %v474_v54, 0.0  ;;  %v516_v0 = vmax.f32 %v402_v55, 0.0  ;;  %v477_v1 = vadd.f32 %v912_v61, %v1032_v17  ;;  %v405_v2 = vadd.f32 %v1032_v17, %v404_v62  ;;  %v468_v3 = vpop.f32.mrb[7].mxu1 }
  0xf2   : > { %v844_v4 = vpack.c.bf16 %v518_v58, %v518_v58  ;;  %v532_v5 = vmax.f32 %v466_v59, 0.0  ;;  %v519_v6 = vmax.f32 %v413_v60, 0.0  ;;  %v469_v7 = vadd.f32 %v1032_v17, %v468_v3 }
  0xf3   : > { %v860_v8 = vpack.c.bf16 %v534_v63, %v534_v63  ;;  %v842_v9 = vpack.c.bf16 %v516_v0, %v516_v0  ;;  %v535_v10 = vmax.f32 %v477_v1, 0.0  ;;  %v517_v11 = vmax.f32 %v405_v2, 0.0 }
  0xf4   : > { %679 = vst.msk [vmem:[%s1044_s25 + $0x18] sm:$0xf] %vm672_vm1, %v844_v4  ;;  %v858_v12 = vpack.c.bf16 %v532_v5, %v532_v5  ;;  %v845_v13 = vpack.c.bf16 %v519_v6, %v519_v6  ;;  %v533_v14 = vmax.f32 %v469_v7, 0.0 }
  0xf5   : > { %695 = vst.msk [vmem:[%s1044_s25 + $0x58] sm:$0xf] %vm672_vm1, %v860_v8  ;;  %677 = vst.msk [vmem:[%s1044_s25 + $0x10] sm:$0xf] %vm672_vm1, %v842_v9  ;;  %v861_v15 = vpack.c.bf16 %v535_v10, %v535_v10  ;;  %v843_v16 = vpack.c.bf16 %v517_v11, %v517_v11  ;;  %v899_v18 = vpop.f32.mrb[8].mxu0 }
  0xf6   : > { %693 = vst.msk [vmem:[%s1044_s25 + $0x50] sm:$0xf] %vm672_vm1, %v858_v12  ;;  %680 = vst.msk [vmem:[%s1044_s25 + $0x1c] sm:$0xf] %vm672_vm1, %v845_v13  ;;  %v859_v19 = vpack.c.bf16 %v533_v14, %v533_v14  ;;  %v426_v20 = vadd.f32 %v899_v18, %v1032_v17  ;;  %v915_v21 = vpop.f32.mrb[8].mxu1  ;;  %v417_v22 = vpop.f32.mrb[9].mxu0 }
  0xf7   : > { %696 = vst.msk [vmem:[%s1044_s25 + $0x5c] sm:$0xf] %vm672_vm1, %v861_v15  ;;  %678 = vst.msk [vmem:[%s1044_s25 + $0x14] sm:$0xf] %vm672_vm1, %v843_v16  ;;  %v490_v23 = vadd.f32 %v915_v21, %v1032_v17  ;;  %v418_v24 = vadd.f32 %v1032_v17, %v417_v22  ;;  %v481_v25 = vpop.f32.mrb[9].mxu1  ;;  %v900_v26 = vpop.f32.mrb[10].mxu0 }
  0xf8   : > { %694 = vst.msk [vmem:[%s1044_s25 + $0x54] sm:$0xf] %vm672_vm1, %v859_v19  ;;  %v522_v27 = vmax.f32 %v426_v20, 0.0  ;;  %v482_v28 = vadd.f32 %v1032_v17, %v481_v25  ;;  %v429_v29 = vadd.f32 %v900_v26, %v1032_v17  ;;  %v916_v30 = vpop.f32.mrb[10].mxu1  ;;  %v420_v31 = vpop.f32.mrb[11].mxu0 }
  0xf9   : > { %v538_v32 = vmax.f32 %v490_v23, 0.0  ;;  %v520_v33 = vmax.f32 %v418_v24, 0.0  ;;  %v493_v34 = vadd.f32 %v916_v30, %v1032_v17  ;;  %v421_v35 = vadd.f32 %v1032_v17, %v420_v31  ;;  %v484_v36 = vpop.f32.mrb[11].mxu1 }
  0xfa   : > { %v848_v37 = vpack.c.bf16 %v522_v27, %v522_v27  ;;  %v536_v38 = vmax.f32 %v482_v28, 0.0  ;;  %v523_v39 = vmax.f32 %v429_v29, 0.0  ;;  %v485_v40 = vadd.f32 %v1032_v17, %v484_v36 }
  0xfb   : > { %v864_v41 = vpack.c.bf16 %v538_v32, %v538_v32  ;;  %v846_v42 = vpack.c.bf16 %v520_v33, %v520_v33  ;;  %v539_v43 = vmax.f32 %v493_v34, 0.0  ;;  %v521_v44 = vmax.f32 %v421_v35, 0.0 }
  0xfc   : > { %683 = vst.msk [vmem:[%s1044_s25 + $0x28] sm:$0xf] %vm672_vm1, %v848_v37  ;;  %v862_v45 = vpack.c.bf16 %v536_v38, %v536_v38  ;;  %v849_v46 = vpack.c.bf16 %v523_v39, %v523_v39  ;;  %v537_v47 = vmax.f32 %v485_v40, 0.0 }
  0xfd   : > { %699 = vst.msk [vmem:[%s1044_s25 + $0x68] sm:$0xf] %vm672_vm1, %v864_v41  ;;  %681 = vst.msk [vmem:[%s1044_s25 + $0x20] sm:$0xf] %vm672_vm1, %v846_v42  ;;  %v865_v48 = vpack.c.bf16 %v539_v43, %v539_v43  ;;  %v847_v49 = vpack.c.bf16 %v521_v44, %v521_v44  ;;  %v903_v50 = vpop.f32.mrb[12].mxu0 }
  0xfe   : > { %697 = vst.msk [vmem:[%s1044_s25 + $0x60] sm:$0xf] %vm672_vm1, %v862_v45  ;;  %684 = vst.msk [vmem:[%s1044_s25 + $0x2c] sm:$0xf] %vm672_vm1, %v849_v46  ;;  %v863_v51 = vpack.c.bf16 %v537_v47, %v537_v47  ;;  %v442_v52 = vadd.f32 %v903_v50, %v1032_v17  ;;  %v919_v53 = vpop.f32.mrb[12].mxu1  ;;  %v433_v54 = vpop.f32.mrb[13].mxu0 }
  0xff   : > { %700 = vst.msk [vmem:[%s1044_s25 + $0x6c] sm:$0xf] %vm672_vm1, %v865_v48  ;;  %682 = vst.msk [vmem:[%s1044_s25 + $0x24] sm:$0xf] %vm672_vm1, %v847_v49  ;;  %v506_v55 = vadd.f32 %v919_v53, %v1032_v17  ;;  %v434_v56 = vadd.f32 %v1032_v17, %v433_v54  ;;  %v497_v57 = vpop.f32.mrb[13].mxu1  ;;  %v904_v58 = vpop.f32.mrb[14].mxu0 }
 0x100   : > { %698 = vst.msk [vmem:[%s1044_s25 + $0x64] sm:$0xf] %vm672_vm1, %v863_v51  ;;  %v526_v59 = vmax.f32 %v442_v52, 0.0  ;;  %v498_v60 = vadd.f32 %v1032_v17, %v497_v57  ;;  %v445_v61 = vadd.f32 %v904_v58, %v1032_v17  ;;  %v920_v62 = vpop.f32.mrb[14].mxu1  ;;  %v436_v63 = vpop.f32.mrb[15].mxu0 }
 0x101   : > { %v542_v0 = vmax.f32 %v506_v55, 0.0  ;;  %v524_v1 = vmax.f32 %v434_v56, 0.0  ;;  %v509_v2 = vadd.f32 %v920_v62, %v1032_v17  ;;  %v437_v3 = vadd.f32 %v1032_v17, %v436_v63  ;;  %v500_v4 = vpop.f32.mrb[15].mxu1 }
 0x102   : > { %v852_v5 = vpack.c.bf16 %v526_v59, %v526_v59  ;;  %v540_v6 = vmax.f32 %v498_v60, 0.0  ;;  %v527_v7 = vmax.f32 %v445_v61, 0.0  ;;  %v501_v8 = vadd.f32 %v1032_v17, %v500_v4 }
 0x103   : > { %v868_v9 = vpack.c.bf16 %v542_v0, %v542_v0  ;;  %v850_v10 = vpack.c.bf16 %v524_v1, %v524_v1  ;;  %v543_v11 = vmax.f32 %v509_v2, 0.0  ;;  %v525_v12 = vmax.f32 %v437_v3, 0.0 }
 0x104   : > { %687 = vst.msk [vmem:[%s1044_s25 + $0x38] sm:$0xf] %vm672_vm1, %v852_v5  ;;  %v866_v13 = vpack.c.bf16 %v540_v6, %v540_v6  ;;  %v853_v14 = vpack.c.bf16 %v527_v7, %v527_v7  ;;  %v541_v15 = vmax.f32 %v501_v8, 0.0 }
 0x105   : > { %703 = vst.msk [vmem:[%s1044_s25 + $0x78] sm:$0xf] %vm672_vm1, %v868_v9  ;;  %685 = vst.msk [vmem:[%s1044_s25 + $0x30] sm:$0xf] %vm672_vm1, %v850_v10  ;;  %v869_v16 = vpack.c.bf16 %v543_v11, %v543_v11  ;;  %v851_v18 = vpack.c.bf16 %v525_v12, %v525_v12 }
 0x106   : > { %701 = vst.msk [vmem:[%s1044_s25 + $0x70] sm:$0xf] %vm672_vm1, %v866_v13  ;;  %688 = vst.msk [vmem:[%s1044_s25 + $0x3c] sm:$0xf] %vm672_vm1, %v853_v14  ;;  %v867_v17 = vpack.c.bf16 %v541_v15, %v541_v15 }
 0x107   : > { %704 = vst.msk [vmem:[%s1044_s25 + $0x7c] sm:$0xf] %vm672_vm1, %v869_v16  ;;  %686 = vst.msk [vmem:[%s1044_s25 + $0x34] sm:$0xf] %vm672_vm1, %v851_v18 }
 0x108   : > { %702 = vst.msk [vmem:[%s1044_s25 + $0x74] sm:$0xf] %vm672_vm1, %v867_v17 }
 0x109 PF: > { %s13_s12 = sadd.s32 1, %s954_s12  }
 0x10a   : > { %p10_p4 = scmp.ge.s32.totalorder %s13_s12, 4  }
 0x10c   :  { %12 = sbr.rel (!%p10_p4) target bundleno = 1 (0x1), region = 62 }

// kernel: cnn_forward.12
= control target key start
LH: loop header
LB: loop body
LE: loop exit
PB: predicated region body
PF: predicated region fallthrough
CT: control target
= control target key end

     0   :  { %s993_s12 = smov 0   ;;  %s1160_s0 = inlined_call_operand.vmem [shape: bf16[512,24], index: 0, kind: input, shape index: {}]   ;;  %s1161_s1 = inlined_call_operand.vmem [shape: bf16[24,16], index: 1, kind: input, shape index: {}]   ;;  %s1162_s2 = inlined_call_operand.vmem [shape: f32[1,16], index: 2, kind: input, shape index: {}]   ;;  %s1163_s3 = inlined_call_operand.vmem [shape: bf16[512,16], index: 3, kind: output, shape index: {}]  }
   0x1 LB: > { %s769_s13 = sadd.s32 4294967295, %s971_s12   ;;  %p773_p0 = scmp.ge.s32.totalorder %s971_s12, 1  ;;  %s971_s12 = sphi %s993_s12, %s13_s12  }
   0x2   : > { %p138_p1 = scmp.lt.s32.totalorder %s971_s12, 3 }
   0x4   : > { %p139_p2 = pnand %p773_p0, %p138_p1 }
   0x5   : > { %v947_v0 = vld [vmem:[%s1161_s1] sm:$0xff] (!%p139_p2)   ;;  %v948_v1 = vld [vmem:[%s1161_s1 + $0x8] ss:$0 sps:$4 sm:$0xff] (!%p139_p2)   ;;  %vm355_vm0 = vcmask (!%p139_p2), 1043456   ;;  %s774_s18 = sshll.u32 (!%p139_p2), %s769_s13, 5  ;;  %vm306_vm1 = vcmask (!%p139_p2), 195584  }
   0x6   : > { %142 = sbr.rel (%p139_p2) target bundleno = 265 (0x109), region = 32  ;;  %897 = vmatprep.subr.bf16.mxu0 (!%p139_p2), %v947_v0  ;;  %933 = vmatprep.subr.bf16.mxu1 (!%p139_p2), %v947_v0  ;;  %p163_p3 = scmp.lt.s32.totalorder (!%p139_p2), %s774_s18, 63  ;;  %v357_v2 = vsel (!%p139_p2), %vm355_vm0, %v948_v1, 0  ;;  %v1052_v19 = vld [vmem:[%s1162_s2] ss:$0 sm:$0xff] (!%p139_p2)  ;;  %vm680_vm2 = vcmask (!%p139_p2), 125952  }
   0x7   : > { %898 = vmatpush3.bf16.msra.mxu0 (!%p139_p2), %v947_v0  ;;  %935 = vmatpush3.bf16.msra.mxu1 (!%p139_p2), %v947_v0 }
   0x8   : > { %937 = vmatprep.subr.msk.bf16.mxu0 (!%p139_p2), %vm355_vm0, %v948_v1  ;;  %938 = vmatprep.subr.msk.bf16.mxu1 (!%p139_p2), %vm355_vm0, %v948_v1 }
   0xb   : > { %900 = vmatpush3.bf16.msra.mxu0 (!%p139_p2), %v357_v2  ;;  %936 = vmatpush3.bf16.msra.mxu1 (!%p139_p2), %v357_v2 }
   0xd   : > { %s1165_s18 = smov (!%p163_p3, %s774_s18), 63 }
   0xe   : > { %s775_s19 = sshll.u32 %s1165_s18, 2 }
   0xf   : > { %s1015_s22 = scalar_lea.vmem %s1160_s0, %s775_s19  ;;  %s1064_s27 = scalar_lea.vmem %s1163_s3, %s775_s19 }
  0x10   : > { %v949_v3 = vld [vmem:[%s1015_s22] sm:$0xff]   ;;  %v951_v5 = vld [vmem:[%s1015_s22 + $0x8] sm:$0xff]   ;;  %v953_v7 = vld [vmem:[%s1015_s22 + $0x10] sm:$0xff]  }
  0x11   : > { %v950_v4 = vld [vmem:[%s1015_s22 + $0x40] sm:$0xff]   ;;  %901 = vmatprep.mubr.msk.bf16.mxu0 %vm306_vm1, %v949_v3  ;;  %v952_v6 = vld [vmem:[%s1015_s22 + $0x48] sm:$0xff]   ;;  %v954_v8 = vld [vmem:[%s1015_s22 + $0x50] sm:$0xff]  }
  0x12   : > { %917 = vmatprep.mubr.msk.bf16.mxu1 %vm306_vm1, %v950_v4  ;;  %902 = vmatmul.mubr.msk.bf16.vlgmr.msra.gmra.mrb[0].mxu0 %vm306_vm1, %v951_v5  ;;  %v955_v9 = vld [vmem:[%s1015_s22 + $0x18] sm:$0xff]   ;;  %v957_v11 = vld [vmem:[%s1015_s22 + $0x20] sm:$0xff]   ;;  %v959_v13 = vld [vmem:[%s1015_s22 + $0x28] sm:$0xff]  }
  0x13   : > { %918 = vmatmul.mubr.msk.bf16.vlgmr.msra.gmra.mrb[0].mxu1 %vm306_vm1, %v952_v6  ;;  %905 = vmatprep.mubr.msk.bf16.mxu0 %vm306_vm1, %v953_v7  ;;  %v956_v10 = vld [vmem:[%s1015_s22 + $0x58] sm:$0xff]   ;;  %v958_v12 = vld [vmem:[%s1015_s22 + $0x60] sm:$0xff]   ;;  %v960_v14 = vld [vmem:[%s1015_s22 + $0x68] sm:$0xff]  }
  0x14   : > { %921 = vmatprep.mubr.msk.bf16.mxu1 %vm306_vm1, %v954_v8  ;;  %v961_v15 = vld [vmem:[%s1015_s22 + $0x30] sm:$0xff]   ;;  %v963_v17 = vld [vmem:[%s1015_s22 + $0x38] sm:$0xff]  }
  0x15   : > { %v962_v16 = vld [vmem:[%s1015_s22 + $0x70] sm:$0xff]   ;;  %v964_v18 = vld [vmem:[%s1015_s22 + $0x78] sm:$0xff]  }
  0x1a   : > { %906 = vmatmul.mubr.msk.bf16.gmra.mrb[4].mxu0 %vm306_vm1, %v955_v9 }
  0x1b   : > { %922 = vmatmul.mubr.msk.bf16.gmra.mrb[4].mxu1 %vm306_vm1, %v956_v10  ;;  %909 = vmatprep.mubr.msk.bf16.mxu0 %vm306_vm1, %v957_v11 }
  0x1c   : > { %925 = vmatprep.mubr.msk.bf16.mxu1 %vm306_vm1, %v958_v12 }
  0x22   : > { %910 = vmatmul.mubr.msk.bf16.gmra.mrb[8].mxu0 %vm306_vm1, %v959_v13 }
  0x23   : > { %926 = vmatmul.mubr.msk.bf16.gmra.mrb[8].mxu1 %vm306_vm1, %v960_v14  ;;  %913 = vmatprep.mubr.msk.bf16.mxu0 %vm306_vm1, %v961_v15 }
  0x24   : > { %929 = vmatprep.mubr.msk.bf16.mxu1 %vm306_vm1, %v962_v16 }
  0x2a   : > { %914 = vmatmul.mubr.msk.bf16.gmra.mrb[12].mxu0 %vm306_vm1, %v963_v17 }
  0x2b   : > { %930 = vmatmul.mubr.msk.bf16.gmra.mrb[12].mxu1 %vm306_vm1, %v964_v18 }
  0xe5   : > { %v903_v20 = vpop.f32.mrb[0].mxu0 }
  0xe6   : > { %v402_v21 = vadd.f32 %v903_v20, %v1052_v19  ;;  %v919_v22 = vpop.f32.mrb[0].mxu1  ;;  %v393_v23 = vpop.f32.mrb[1].mxu0 }
  0xe7   : > { %v466_v24 = vadd.f32 %v919_v22, %v1052_v19  ;;  %v394_v25 = vadd.f32 %v1052_v19, %v393_v23  ;;  %v457_v26 = vpop.f32.mrb[1].mxu1  ;;  %v904_v27 = vpop.f32.mrb[2].mxu0 }
  0xe8   : > { %v522_v28 = vmax.f32 %v402_v21, 0.0  ;;  %v458_v29 = vadd.f32 %v1052_v19, %v457_v26  ;;  %v405_v30 = vadd.f32 %v904_v27, %v1052_v19  ;;  %v920_v31 = vpop.f32.mrb[2].mxu1  ;;  %v396_v32 = vpop.f32.mrb[3].mxu0 }
  0xe9   : > { %v538_v33 = vmax.f32 %v466_v24, 0.0  ;;  %v520_v34 = vmax.f32 %v394_v25, 0.0  ;;  %v469_v35 = vadd.f32 %v920_v31, %v1052_v19  ;;  %v397_v36 = vadd.f32 %v1052_v19, %v396_v32  ;;  %v460_v37 = vpop.f32.mrb[3].mxu1 }
  0xea   : > { %v849_v38 = vpack.c.bf16 %v522_v28, %v522_v28  ;;  %v536_v39 = vmax.f32 %v458_v29, 0.0  ;;  %v523_v40 = vmax.f32 %v405_v30, 0.0  ;;  %v461_v41 = vadd.f32 %v1052_v19, %v460_v37 }
  0xeb   : > { %v865_v42 = vpack.c.bf16 %v538_v33, %v538_v33  ;;  %v847_v43 = vpack.c.bf16 %v520_v34, %v520_v34  ;;  %v539_v44 = vmax.f32 %v469_v35, 0.0  ;;  %v521_v45 = vmax.f32 %v397_v36, 0.0 }
  0xec   : > { %683 = vst.msk [vmem:[%s1064_s27 + $0x8] sm:$0xf] %vm680_vm2, %v849_v38  ;;  %v863_v46 = vpack.c.bf16 %v536_v39, %v536_v39  ;;  %v850_v47 = vpack.c.bf16 %v523_v40, %v523_v40  ;;  %v537_v48 = vmax.f32 %v461_v41, 0.0 }
  0xed   : > { %699 = vst.msk [vmem:[%s1064_s27 + $0x48] sm:$0xf] %vm680_vm2, %v865_v42  ;;  %681 = vst.msk [vmem:[%s1064_s27] sm:$0xf] %vm680_vm2, %v847_v43  ;;  %v866_v49 = vpack.c.bf16 %v539_v44, %v539_v44  ;;  %v848_v50 = vpack.c.bf16 %v521_v45, %v521_v45  ;;  %v907_v51 = vpop.f32.mrb[4].mxu0 }
  0xee   : > { %697 = vst.msk [vmem:[%s1064_s27 + $0x40] sm:$0xf] %vm680_vm2, %v863_v46  ;;  %684 = vst.msk [vmem:[%s1064_s27 + $0xc] sm:$0xf] %vm680_vm2, %v850_v47  ;;  %v864_v52 = vpack.c.bf16 %v537_v48, %v537_v48  ;;  %v418_v53 = vadd.f32 %v907_v51, %v1052_v19  ;;  %v923_v54 = vpop.f32.mrb[4].mxu1  ;;  %v409_v55 = vpop.f32.mrb[5].mxu0 }
  0xef   : > { %700 = vst.msk [vmem:[%s1064_s27 + $0x4c] sm:$0xf] %vm680_vm2, %v866_v49  ;;  %682 = vst.msk [vmem:[%s1064_s27 + $0x4] sm:$0xf] %vm680_vm2, %v848_v50  ;;  %v482_v56 = vadd.f32 %v923_v54, %v1052_v19  ;;  %v410_v57 = vadd.f32 %v1052_v19, %v409_v55  ;;  %v473_v58 = vpop.f32.mrb[5].mxu1  ;;  %v908_v59 = vpop.f32.mrb[6].mxu0 }
  0xf0   : > { %698 = vst.msk [vmem:[%s1064_s27 + $0x44] sm:$0xf] %vm680_vm2, %v864_v52  ;;  %v526_v60 = vmax.f32 %v418_v53, 0.0  ;;  %v474_v61 = vadd.f32 %v1052_v19, %v473_v58  ;;  %v421_v62 = vadd.f32 %v908_v59, %v1052_v19  ;;  %v924_v63 = vpop.f32.mrb[6].mxu1  ;;  %v412_v0 = vpop.f32.mrb[7].mxu0 }
  0xf1   : > { %v542_v1 = vmax.f32 %v482_v56, 0.0  ;;  %v524_v2 = vmax.f32 %v410_v57, 0.0  ;;  %v485_v3 = vadd.f32 %v924_v63, %v1052_v19  ;;  %v413_v4 = vadd.f32 %v1052_v19, %v412_v0  ;;  %v476_v5 = vpop.f32.mrb[7].mxu1 }
  0xf2   : > { %v853_v6 = vpack.c.bf16 %v526_v60, %v526_v60  ;;  %v540_v7 = vmax.f32 %v474_v61, 0.0  ;;  %v527_v8 = vmax.f32 %v421_v62, 0.0  ;;  %v477_v9 = vadd.f32 %v1052_v19, %v476_v5 }
  0xf3   : > { %v869_v10 = vpack.c.bf16 %v542_v1, %v542_v1  ;;  %v851_v11 = vpack.c.bf16 %v524_v2, %v524_v2  ;;  %v543_v12 = vmax.f32 %v485_v3, 0.0  ;;  %v525_v13 = vmax.f32 %v413_v4, 0.0 }
  0xf4   : > { %687 = vst.msk [vmem:[%s1064_s27 + $0x18] sm:$0xf] %vm680_vm2, %v853_v6  ;;  %v867_v14 = vpack.c.bf16 %v540_v7, %v540_v7  ;;  %v854_v15 = vpack.c.bf16 %v527_v8, %v527_v8  ;;  %v541_v16 = vmax.f32 %v477_v9, 0.0 }
  0xf5   : > { %703 = vst.msk [vmem:[%s1064_s27 + $0x58] sm:$0xf] %vm680_vm2, %v869_v10  ;;  %685 = vst.msk [vmem:[%s1064_s27 + $0x10] sm:$0xf] %vm680_vm2, %v851_v11  ;;  %v870_v17 = vpack.c.bf16 %v543_v12, %v543_v12  ;;  %v852_v18 = vpack.c.bf16 %v525_v13, %v525_v13  ;;  %v911_v20 = vpop.f32.mrb[8].mxu0 }
  0xf6   : > { %701 = vst.msk [vmem:[%s1064_s27 + $0x50] sm:$0xf] %vm680_vm2, %v867_v14  ;;  %688 = vst.msk [vmem:[%s1064_s27 + $0x1c] sm:$0xf] %vm680_vm2, %v854_v15  ;;  %v868_v21 = vpack.c.bf16 %v541_v16, %v541_v16  ;;  %v434_v22 = vadd.f32 %v911_v20, %v1052_v19  ;;  %v927_v23 = vpop.f32.mrb[8].mxu1  ;;  %v425_v24 = vpop.f32.mrb[9].mxu0 }
  0xf7   : > { %704 = vst.msk [vmem:[%s1064_s27 + $0x5c] sm:$0xf] %vm680_vm2, %v870_v17  ;;  %686 = vst.msk [vmem:[%s1064_s27 + $0x14] sm:$0xf] %vm680_vm2, %v852_v18  ;;  %v498_v25 = vadd.f32 %v927_v23, %v1052_v19  ;;  %v426_v26 = vadd.f32 %v1052_v19, %v425_v24  ;;  %v489_v27 = vpop.f32.mrb[9].mxu1  ;;  %v912_v28 = vpop.f32.mrb[10].mxu0 }
  0xf8   : > { %702 = vst.msk [vmem:[%s1064_s27 + $0x54] sm:$0xf] %vm680_vm2, %v868_v21  ;;  %v530_v29 = vmax.f32 %v434_v22, 0.0  ;;  %v490_v30 = vadd.f32 %v1052_v19, %v489_v27  ;;  %v437_v31 = vadd.f32 %v912_v28, %v1052_v19  ;;  %v928_v32 = vpop.f32.mrb[10].mxu1  ;;  %v428_v33 = vpop.f32.mrb[11].mxu0 }
  0xf9   : > { %v546_v34 = vmax.f32 %v498_v25, 0.0  ;;  %v528_v35 = vmax.f32 %v426_v26, 0.0  ;;  %v501_v36 = vadd.f32 %v928_v32, %v1052_v19  ;;  %v429_v37 = vadd.f32 %v1052_v19, %v428_v33  ;;  %v492_v38 = vpop.f32.mrb[11].mxu1 }
  0xfa   : > { %v857_v39 = vpack.c.bf16 %v530_v29, %v530_v29  ;;  %v544_v40 = vmax.f32 %v490_v30, 0.0  ;;  %v531_v41 = vmax.f32 %v437_v31, 0.0  ;;  %v493_v42 = vadd.f32 %v1052_v19, %v492_v38 }
  0xfb   : > { %v873_v43 = vpack.c.bf16 %v546_v34, %v546_v34  ;;  %v855_v44 = vpack.c.bf16 %v528_v35, %v528_v35  ;;  %v547_v45 = vmax.f32 %v501_v36, 0.0  ;;  %v529_v46 = vmax.f32 %v429_v37, 0.0 }
  0xfc   : > { %691 = vst.msk [vmem:[%s1064_s27 + $0x28] sm:$0xf] %vm680_vm2, %v857_v39  ;;  %v871_v47 = vpack.c.bf16 %v544_v40, %v544_v40  ;;  %v858_v48 = vpack.c.bf16 %v531_v41, %v531_v41  ;;  %v545_v49 = vmax.f32 %v493_v42, 0.0 }
  0xfd   : > { %707 = vst.msk [vmem:[%s1064_s27 + $0x68] sm:$0xf] %vm680_vm2, %v873_v43  ;;  %689 = vst.msk [vmem:[%s1064_s27 + $0x20] sm:$0xf] %vm680_vm2, %v855_v44  ;;  %v874_v50 = vpack.c.bf16 %v547_v45, %v547_v45  ;;  %v856_v51 = vpack.c.bf16 %v529_v46, %v529_v46  ;;  %v915_v52 = vpop.f32.mrb[12].mxu0 }
  0xfe   : > { %705 = vst.msk [vmem:[%s1064_s27 + $0x60] sm:$0xf] %vm680_vm2, %v871_v47  ;;  %692 = vst.msk [vmem:[%s1064_s27 + $0x2c] sm:$0xf] %vm680_vm2, %v858_v48  ;;  %v872_v53 = vpack.c.bf16 %v545_v49, %v545_v49  ;;  %v450_v54 = vadd.f32 %v915_v52, %v1052_v19  ;;  %v931_v55 = vpop.f32.mrb[12].mxu1  ;;  %v441_v56 = vpop.f32.mrb[13].mxu0 }
  0xff   : > { %708 = vst.msk [vmem:[%s1064_s27 + $0x6c] sm:$0xf] %vm680_vm2, %v874_v50  ;;  %690 = vst.msk [vmem:[%s1064_s27 + $0x24] sm:$0xf] %vm680_vm2, %v856_v51  ;;  %v514_v57 = vadd.f32 %v931_v55, %v1052_v19  ;;  %v442_v58 = vadd.f32 %v1052_v19, %v441_v56  ;;  %v505_v59 = vpop.f32.mrb[13].mxu1  ;;  %v916_v60 = vpop.f32.mrb[14].mxu0 }
 0x100   : > { %706 = vst.msk [vmem:[%s1064_s27 + $0x64] sm:$0xf] %vm680_vm2, %v872_v53  ;;  %v534_v61 = vmax.f32 %v450_v54, 0.0  ;;  %v506_v62 = vadd.f32 %v1052_v19, %v505_v59  ;;  %v453_v63 = vadd.f32 %v916_v60, %v1052_v19  ;;  %v932_v0 = vpop.f32.mrb[14].mxu1  ;;  %v444_v1 = vpop.f32.mrb[15].mxu0 }
 0x101   : > { %v550_v2 = vmax.f32 %v514_v57, 0.0  ;;  %v532_v3 = vmax.f32 %v442_v58, 0.0  ;;  %v517_v4 = vadd.f32 %v932_v0, %v1052_v19  ;;  %v445_v5 = vadd.f32 %v1052_v19, %v444_v1  ;;  %v508_v6 = vpop.f32.mrb[15].mxu1 }
 0x102   : > { %v861_v7 = vpack.c.bf16 %v534_v61, %v534_v61  ;;  %v548_v8 = vmax.f32 %v506_v62, 0.0  ;;  %v535_v9 = vmax.f32 %v453_v63, 0.0  ;;  %v509_v10 = vadd.f32 %v1052_v19, %v508_v6 }
 0x103   : > { %v877_v11 = vpack.c.bf16 %v550_v2, %v550_v2  ;;  %v859_v12 = vpack.c.bf16 %v532_v3, %v532_v3  ;;  %v551_v13 = vmax.f32 %v517_v4, 0.0  ;;  %v533_v14 = vmax.f32 %v445_v5, 0.0 }
 0x104   : > { %695 = vst.msk [vmem:[%s1064_s27 + $0x38] sm:$0xf] %vm680_vm2, %v861_v7  ;;  %v875_v15 = vpack.c.bf16 %v548_v8, %v548_v8  ;;  %v862_v16 = vpack.c.bf16 %v535_v9, %v535_v9  ;;  %v549_v17 = vmax.f32 %v509_v10, 0.0 }
 0x105   : > { %711 = vst.msk [vmem:[%s1064_s27 + $0x78] sm:$0xf] %vm680_vm2, %v877_v11  ;;  %693 = vst.msk [vmem:[%s1064_s27 + $0x30] sm:$0xf] %vm680_vm2, %v859_v12  ;;  %v878_v18 = vpack.c.bf16 %v551_v13, %v551_v13  ;;  %v860_v20 = vpack.c.bf16 %v533_v14, %v533_v14 }
 0x106   : > { %709 = vst.msk [vmem:[%s1064_s27 + $0x70] sm:$0xf] %vm680_vm2, %v875_v15  ;;  %696 = vst.msk [vmem:[%s1064_s27 + $0x3c] sm:$0xf] %vm680_vm2, %v862_v16  ;;  %v876_v19 = vpack.c.bf16 %v549_v17, %v549_v17 }
 0x107   : > { %712 = vst.msk [vmem:[%s1064_s27 + $0x7c] sm:$0xf] %vm680_vm2, %v878_v18  ;;  %694 = vst.msk [vmem:[%s1064_s27 + $0x34] sm:$0xf] %vm680_vm2, %v860_v20 }
 0x108   : > { %710 = vst.msk [vmem:[%s1064_s27 + $0x74] sm:$0xf] %vm680_vm2, %v876_v19 }
 0x109 PF: > { %s13_s12 = sadd.s32 1, %s971_s12  }
 0x10a   : > { %p10_p4 = scmp.ge.s32.totalorder %s13_s12, 4  }
 0x10c   :  { %12 = sbr.rel (!%p10_p4) target bundleno = 1 (0x1), region = 62 }

// kernel: cnn_forward.16
= control target key start
LH: loop header
LB: loop body
LE: loop exit
PB: predicated region body
PF: predicated region fallthrough
CT: control target
= control target key end

     0   :  { %vm94_vm0 = vcmask 261120   ;;  %vm296_vm1 = vcmask 257024   ;;  %s537_s1 = inlined_call_operand.vmem [shape: bf16[32,32], index: 1, kind: input, shape index: {}]   ;;  %s538_s0 = inlined_call_operand.vmem [shape: bf16[128,32], index: 0, kind: input, shape index: {}]   ;;  %s539_s2 = inlined_call_operand.vmem [shape: f32[1,32], index: 2, kind: input, shape index: {}]   ;;  %s540_s3 = inlined_call_operand.vmem [shape: bf16[128,32], index: 3, kind: output, shape index: {}]  }
   0x1   :  { %v402_v0 = vld [vmem:[%s537_s1] sm:$0xff]   ;;  %v403_v1 = vld [vmem:[%s537_s1 + $0x8] sm:$0xff]   ;;  %v408_v6 = vld [vmem:[%s538_s0 + $0x10] sm:$0xff]  }
   0x2   :  { %378 = vmatprep.subr.bf16.mxu0 %v402_v0  ;;  %398 = vmatprep.subr.bf16.mxu1 %v402_v0  ;;  %v404_v2 = vld [vmem:[%s538_s0] sm:$0xff]   ;;  %v406_v4 = vld [vmem:[%s538_s0 + $0x8] sm:$0xff]   ;;  %v409_v7 = vld [vmem:[%s538_s0 + $0x30] sm:$0xff]  }
   0x3   :  { %379 = vmatpush3.bf16.msra.mxu0 %v402_v0  ;;  %400 = vmatpush3.bf16.msra.mxu1 %v402_v0  ;;  %v405_v3 = vld [vmem:[%s538_s0 + $0x20] sm:$0xff]   ;;  %v407_v5 = vld [vmem:[%s538_s0 + $0x28] sm:$0xff]   ;;  %v410_v8 = vld [vmem:[%s538_s0 + $0x18] sm:$0xff]  }
   0x4   :  { %380 = vmatprep.subr.bf16.mxu0 %v403_v1  ;;  %399 = vmatprep.subr.bf16.mxu1 %v403_v1  ;;  %v411_v9 = vld [vmem:[%s538_s0 + $0x38] sm:$0xff]   ;;  %v317_v10 = vld [vmem:[%s539_s2] ss:$0 sm:$0xff] }
   0x5   :  { %382 = vmatprep.mubr.msk.bf16.mxu0 %vm94_vm0, %v404_v2  ;;  %390 = vmatprep.mubr.msk.bf16.mxu1 %vm94_vm0, %v405_v3 }
   0x7   :  { %381 = vmatpush3.bf16.msra.mxu0 %v403_v1  ;;  %401 = vmatpush3.bf16.msra.mxu1 %v403_v1 }
   0xa   :  { %383 = vmatmul.mubr.msk.bf16.vlgmr.msra.gmra.mrb[0].mxu0 %vm94_vm0, %v406_v4  ;;  %391 = vmatmul.mubr.msk.bf16.vlgmr.msra.gmra.mrb[0].mxu1 %vm94_vm0, %v407_v5 }
   0xb   :  { %386 = vmatprep.mubr.msk.bf16.mxu0 %vm94_vm0, %v408_v6  ;;  %394 = vmatprep.mubr.msk.bf16.mxu1 %vm94_vm0, %v409_v7 }
  0x12   :  { %387 = vmatmul.mubr.msk.bf16.gmra.mrb[4].mxu0 %vm94_vm0, %v410_v8  ;;  %395 = vmatmul.mubr.msk.bf16.gmra.mrb[4].mxu1 %vm94_vm0, %v411_v9 }
  0xdd   :  { %v384_v11 = vpop.f32.mrb[0].mxu0  ;;  %v392_v12 = vpop.f32.mrb[0].mxu1 }
  0xde   :  { %v162_v13 = vadd.f32 %v384_v11, %v317_v10  ;;  %v194_v14 = vadd.f32 %v392_v12, %v317_v10  ;;  %v153_v15 = vpop.f32.mrb[1].mxu0  ;;  %v185_v16 = vpop.f32.mrb[1].mxu1 }
  0xdf   :  { %v154_v17 = vadd.f32 %v317_v10, %v153_v15  ;;  %v186_v18 = vadd.f32 %v317_v10, %v185_v16  ;;  %v385_v19 = vpop.f32.mrb[2].mxu0  ;;  %v393_v20 = vpop.f32.mrb[2].mxu1 }
  0xe0   :  { %v218_v21 = vmax.f32 %v162_v13, 0.0  ;;  %v226_v22 = vmax.f32 %v194_v14, 0.0  ;;  %v165_v23 = vadd.f32 %v385_v19, %v317_v10  ;;  %v197_v24 = vadd.f32 %v393_v20, %v317_v10  ;;  %v156_v25 = vpop.f32.mrb[3].mxu0  ;;  %v188_v26 = vpop.f32.mrb[3].mxu1 }
  0xe1   :  { %v216_v27 = vmax.f32 %v154_v17, 0.0  ;;  %v224_v28 = vmax.f32 %v186_v18, 0.0  ;;  %v157_v29 = vadd.f32 %v317_v10, %v156_v25  ;;  %v189_v30 = vadd.f32 %v317_v10, %v188_v26 }
  0xe2   :  { %v354_v31 = vpack.c.bf16 %v218_v21, %v218_v21  ;;  %v362_v32 = vpack.c.bf16 %v226_v22, %v226_v22  ;;  %v219_v33 = vmax.f32 %v165_v23, 0.0  ;;  %v227_v34 = vmax.f32 %v197_v24, 0.0 }
  0xe3   :  { %v352_v35 = vpack.c.bf16 %v216_v27, %v216_v27  ;;  %v360_v36 = vpack.c.bf16 %v224_v28, %v224_v28  ;;  %v217_v37 = vmax.f32 %v157_v29, 0.0  ;;  %v225_v38 = vmax.f32 %v189_v30, 0.0 }
  0xe4   :  { %299 = vst.msk [vmem:[%s540_s3 + $0x8] sm:$0xf] %vm296_vm1, %v354_v31  ;;  %307 = vst.msk [vmem:[%s540_s3 + $0x28] sm:$0xf] %vm296_vm1, %v362_v32  ;;  %v355_v39 = vpack.c.bf16 %v219_v33, %v219_v33  ;;  %v363_v40 = vpack.c.bf16 %v227_v34, %v227_v34 }
  0xe5   :  { %297 = vst.msk [vmem:[%s540_s3] sm:$0xf] %vm296_vm1, %v352_v35  ;;  %305 = vst.msk [vmem:[%s540_s3 + $0x20] sm:$0xf] %vm296_vm1, %v360_v36  ;;  %v353_v41 = vpack.c.bf16 %v217_v37, %v217_v37  ;;  %v361_v42 = vpack.c.bf16 %v225_v38, %v225_v38  ;;  %v388_v43 = vpop.f32.mrb[4].mxu0  ;;  %v396_v44 = vpop.f32.mrb[4].mxu1 }
  0xe6   :  { %300 = vst.msk [vmem:[%s540_s3 + $0xc] sm:$0xf] %vm296_vm1, %v355_v39  ;;  %308 = vst.msk [vmem:[%s540_s3 + $0x2c] sm:$0xf] %vm296_vm1, %v363_v40  ;;  %v178_v45 = vadd.f32 %v388_v43, %v317_v10  ;;  %v210_v46 = vadd.f32 %v396_v44, %v317_v10  ;;  %v169_v47 = vpop.f32.mrb[5].mxu0  ;;  %v201_v48 = vpop.f32.mrb[5].mxu1 }
  0xe7   :  { %298 = vst.msk [vmem:[%s540_s3 + $0x4] sm:$0xf] %vm296_vm1, %v353_v41  ;;  %306 = vst.msk [vmem:[%s540_s3 + $0x24] sm:$0xf] %vm296_vm1, %v361_v42  ;;  %v170_v49 = vadd.f32 %v317_v10, %v169_v47  ;;  %v202_v50 = vadd.f32 %v317_v10, %v201_v48  ;;  %v389_v51 = vpop.f32.mrb[6].mxu0  ;;  %v397_v52 = vpop.f32.mrb[6].mxu1 }
  0xe8   :  { %v222_v53 = vmax.f32 %v178_v45, 0.0  ;;  %v230_v54 = vmax.f32 %v210_v46, 0.0  ;;  %v181_v55 = vadd.f32 %v389_v51, %v317_v10  ;;  %v213_v56 = vadd.f32 %v397_v52, %v317_v10  ;;  %v172_v57 = vpop.f32.mrb[7].mxu0  ;;  %v204_v58 = vpop.f32.mrb[7].mxu1 }
  0xe9   :  { %v220_v59 = vmax.f32 %v170_v49, 0.0  ;;  %v228_v60 = vmax.f32 %v202_v50, 0.0  ;;  %v173_v61 = vadd.f32 %v317_v10, %v172_v57  ;;  %v205_v62 = vadd.f32 %v317_v10, %v204_v58 }
  0xea   :  { %v358_v63 = vpack.c.bf16 %v222_v53, %v222_v53  ;;  %v366_v0 = vpack.c.bf16 %v230_v54, %v230_v54  ;;  %v223_v1 = vmax.f32 %v181_v55, 0.0  ;;  %v231_v2 = vmax.f32 %v213_v56, 0.0 }
  0xeb   :  { %v356_v3 = vpack.c.bf16 %v220_v59, %v220_v59  ;;  %v364_v4 = vpack.c.bf16 %v228_v60, %v228_v60  ;;  %v221_v5 = vmax.f32 %v173_v61, 0.0  ;;  %v229_v6 = vmax.f32 %v205_v62, 0.0 }
  0xec   :  { %303 = vst.msk [vmem:[%s540_s3 + $0x18] sm:$0xf] %vm296_vm1, %v358_v63  ;;  %311 = vst.msk [vmem:[%s540_s3 + $0x38] sm:$0xf] %vm296_vm1, %v366_v0  ;;  %v359_v7 = vpack.c.bf16 %v223_v1, %v223_v1  ;;  %v367_v8 = vpack.c.bf16 %v231_v2, %v231_v2 }
  0xed   :  { %301 = vst.msk [vmem:[%s540_s3 + $0x10] sm:$0xf] %vm296_vm1, %v356_v3  ;;  %309 = vst.msk [vmem:[%s540_s3 + $0x30] sm:$0xf] %vm296_vm1, %v364_v4  ;;  %v357_v9 = vpack.c.bf16 %v221_v5, %v221_v5  ;;  %v365_v10 = vpack.c.bf16 %v229_v6, %v229_v6 }
  0xee   :  { %304 = vst.msk [vmem:[%s540_s3 + $0x1c] sm:$0xf] %vm296_vm1, %v359_v7  ;;  %312 = vst.msk [vmem:[%s540_s3 + $0x3c] sm:$0xf] %vm296_vm1, %v367_v8 }
  0xef   :  { %302 = vst.msk [vmem:[%s540_s3 + $0x14] sm:$0xf] %vm296_vm1, %v357_v9  ;;  %310 = vst.msk [vmem:[%s540_s3 + $0x34] sm:$0xf] %vm296_vm1, %v365_v10 }

// kernel: cnn_forward.14
= control target key start
LH: loop header
LB: loop body
LE: loop exit
PB: predicated region body
PF: predicated region fallthrough
CT: control target
= control target key end

     0   :  { %vm159_vm0 = vcmask 130048   ;;  %s2333_s23 = smov 120   ;;  %s2334_s24 = smov 104   ;;  %vm1438_vm1 = vcmask 60416   ;;  %vm1543_vm2 = vcmask 126016   ;;  %vm1648_vm3 = vcmask 191616   ;;  %s3065_s5 = inlined_call_operand.vmem [shape: bf16[16,8], index: 5, kind: input, shape index: {}]   ;;  %s3066_s7 = inlined_call_operand.vmem [shape: bf16[16,8], index: 7, kind: input, shape index: {}]   ;;  %s3067_s2 = inlined_call_operand.vmem [shape: bf16[128,16], index: 2, kind: input, shape index: {}]   ;;  %s3068_s3 = inlined_call_operand.vmem [shape: bf16[128,16], index: 3, kind: input, shape index: {}]   ;;  %s3069_s4 = inlined_call_operand.vmem [shape: bf16[16,8], index: 4, kind: input, shape index: {}]   ;;  %s3070_s6 = inlined_call_operand.vmem [shape: bf16[16,8], index: 6, kind: input, shape index: {}]   ;;  %s3071_s0 = inlined_call_operand.vmem [shape: bf16[128,16], index: 0, kind: input, shape index: {}]   ;;  %s3072_s1 = inlined_call_operand.vmem [shape: bf16[128,16], index: 1, kind: input, shape index: {}]   ;;  %s3073_s9 = inlined_call_operand.vmem [shape: bf16[16,8], index: 9, kind: input, shape index: {}]   ;;  %s3074_s11 = inlined_call_operand.vmem [shape: bf16[16,8], index: 11, kind: input, shape index: {}]   ;;  %s3075_s8 = inlined_call_operand.vmem [shape: bf16[16,8], index: 8, kind: input, shape index: {}]   ;;  %s3076_s10 = inlined_call_operand.vmem [shape: bf16[16,8], index: 10, kind: input, shape index: {}]   ;;  %s3077_s12 = inlined_call_operand.vmem [shape: f32[1,32], index: 12, kind: input, shape index: {}]   ;;  %s3078_s13 = inlined_call_operand.vmem [shape: bf16[128,32], index: 13, kind: output, shape index: {}]  }
   0x1   :  { %v2293_v0 = vld [vmem:[%s3065_s5] sm:$0xff]   ;;  %v2430_v4 = vld [vmem:[%s3067_s2 + $0x8] sm:$0xff]   ;;  %v2452_v8 = vld [vmem:[%s3067_s2 + $0x10] sm:$0xff]   ;;  %s2336_s21 = smov 8   ;;  %s2337_s18 = smov 16   ;;  %vm1753_vm4 = vcmask 257216  }
   0x2   :  { %v2294_v1 = vld [vmem:[%s3066_s7] sm:$0xff]   ;;  %2079 = vmatprep.subr.bf16.mxu0 %v2293_v0  ;;  %v2442_v6 = vld [vmem:[%s3068_s3 + $0x8] sm:$0xff]   ;;  %v2457_v9 = vld [vmem:[%s3068_s3 + $0x10] sm:$0xff]   ;;  %s2338_s19 = smov 24  }
   0x3   :  { %v2418_v2 = vld [vmem:[%s3067_s2] sm:$0xff]   ;;  %2115 = vmatprep.subr.bf16.mxu1 %v2294_v1  ;;  %2080 = vmatpush3.bf16.msra.mxu0 %v2293_v0  ;;  %v2464_v10 = vld [vmem:[%s3067_s2 + $0x18] sm:$0xff]   ;;  %v2494_v14 = vld [vmem:[%s3067_s2 + $0x28] sm:$0xff]  }
   0x4   :  { %v2423_v3 = vld [vmem:[%s3068_s3] sm:$0xff]   ;;  %2116 = vmatpush3.bf16.msra.mxu1 %v2294_v1  ;;  %2081 = vmatprep.mubr.msk.bf16.mxu0 %vm159_vm0, %v2418_v2  ;;  %v2471_v11 = vld [vmem:[%s3068_s3 + $0x18] sm:$0xff]   ;;  %v2499_v15 = vld [vmem:[%s3067_s2 + $0x30] sm:$0xff]  }
   0x5   :  { %2117 = vmatprep.mubr.msk.bf16.mxu1 %vm159_vm0, %v2423_v3  ;;  %v2298_v5 = vld [vmem:[%s3069_s4] sm:$0xff]   ;;  %v2504_v16 = vld [vmem:[%s3068_s3 + $0x28] sm:$0xff]   ;;  %v2509_v17 = vld [vmem:[%s3068_s3 + $0x30] sm:$0xff]  }
   0x6   :  { %2082 = vmatmul.mubr.msk.bf16.vlgmr.msra.gmra.mrb[0].mxu0 %vm159_vm0, %v2430_v4  ;;  %2097 = vmatprep.subr.bf16.mxu0 %v2298_v5  ;;  %v2300_v7 = vld [vmem:[%s3070_s6] sm:$0xff]   ;;  %v2528_v20 = vld [vmem:[%s3067_s2 + $0x38] sm:$0xff]   ;;  %v2556_v24 = vld [vmem:[%s3071_s0 + $0x8] sm:$0xff]  }
   0x7   :  { %2118 = vmatmul.mubr.msk.bf16.vlgmr.msra.gmra.mrb[0].mxu1 %vm159_vm0, %v2442_v6  ;;  %2098 = vmatpush3.bf16.msra.mxu0 %v2298_v5  ;;  %v2476_v12 = vld [vmem:[%s3067_s2 + $0x20] sm:$0xff]   ;;  %v2538_v22 = vld [vmem:[%s3068_s3 + $0x38] sm:$0xff]   ;;  %v2561_v25 = vld [vmem:[%s3071_s0 + $0x10] sm:$0xff]  }
   0x8   :  { %2133 = vmatprep.subr.bf16.mxu1 %v2300_v7  ;;  %2085 = vmatprep.mubr.msk.bf16.mxu0 %vm159_vm0, %v2452_v8  ;;  %v2481_v13 = vld [vmem:[%s3068_s3 + $0x20] sm:$0xff]   ;;  %v2566_v26 = vld [vmem:[%s3072_s1 + $0x8] sm:$0xff]   ;;  %v2320_v27 = vld [vmem:[%s3072_s1 + $0x10] sm:$0xff]  }
   0x9   :  { %2134 = vmatpush3.bf16.msra.mxu1 %v2300_v7  ;;  %2121 = vmatprep.mubr.msk.bf16.mxu1 %vm159_vm0, %v2457_v9  ;;  %v2317_v18 = vld [vmem:[%s3073_s9] sm:$0xff]   ;;  %v2321_v31 = vld [vmem:[%s3071_s0 + $0x18] sm:$0xff]   ;;  %s2335_s9 = smov 112   ;;  %v2325_v35 = vld [vmem:[%s3071_s0 + $0x28] sm:$0xff]  }
   0xa   :  { %v2318_v19 = vld [vmem:[%s3074_s11] sm:$0xff]   ;;  %2151 = vmatprep.subr.bf16.mxu0 %v2317_v18  ;;  %v2322_v33 = vld [vmem:[%s3072_s1 + $0x18] sm:$0xff]   ;;  %v2327_v36 = vld [vmem:[%s3071_s0 + $0x30] sm:$0xff]  }
   0xb   :  { %v2533_v21 = vld [vmem:[%s3071_s0] sm:$0xff]   ;;  %2187 = vmatprep.subr.bf16.mxu1 %v2318_v19  ;;  %v2326_v37 = vld [vmem:[%s3072_s1 + $0x28] sm:$0xff]   ;;  %v2328_v38 = vld [vmem:[%s3072_s1 + $0x30] sm:$0xff]  }
   0xc   :  { %v2543_v23 = vld [vmem:[%s3072_s1] sm:$0xff]   ;;  %v2329_v39 = vld [vmem:[%s3071_s0 + $0x38] sm:$0xff]  }
   0xd   :  { %v2331_v28 = vld [vmem:[%s3075_s8] sm:$0xff]   ;;  %v2330_v40 = vld [vmem:[%s3072_s1 + $0x38] sm:$0xff]  }
   0xe   :  { %2086 = vmatmul.mubr.msk.bf16.gmra.mrb[4].mxu0 %vm159_vm0, %v2464_v10  ;;  %v2332_v29 = vld [vmem:[%s3076_s10] sm:$0xff]  }
   0xf   :  { %2089 = vmatprep.mubr.msk.bf16.mxu0 %vm159_vm0, %v2476_v12  ;;  %2122 = vmatmul.mubr.msk.bf16.gmra.mrb[4].mxu1 %vm159_vm0, %v2471_v11  ;;  %v2586_v30 = vld [vmem:[%s3077_s12] ss:$0 sm:$0xff] }
  0x10   :  { %2125 = vmatprep.mubr.msk.bf16.mxu1 %vm159_vm0, %v2481_v13  ;;  %833 = vrot.lane.b32.xlu0 %v2586_v30, %s2333_s23  ;;  %v2323_v32 = vld [vmem:[%s3071_s0 + $0x20] sm:$0xff]  }
  0x11   :  { %1339 = vrot.lane.b32.xlu1 %v2586_v30, %s2334_s24  ;;  %v2324_v34 = vld [vmem:[%s3072_s1 + $0x20] sm:$0xff]  }
  0x14   :  { %1086 = vrot.lane.b32.xlu0 %v2586_v30, %s2335_s9 }
  0x16   :  { %2090 = vmatmul.mubr.msk.bf16.gmra.mrb[8].mxu0 %vm159_vm0, %v2494_v14 }
  0x17   :  { %2093 = vmatprep.mubr.msk.bf16.mxu0 %vm159_vm0, %v2499_v15  ;;  %2126 = vmatmul.mubr.msk.bf16.gmra.mrb[8].mxu1 %vm159_vm0, %v2504_v16 }
  0x18   :  { %2129 = vmatprep.mubr.msk.bf16.mxu1 %vm159_vm0, %v2509_v17 }
  0x1e   :  { %2094 = vmatmul.mubr.msk.bf16.gmra.mrb[12].mxu0 %vm159_vm0, %v2528_v20 }
  0x1f   :  { %2099 = vmatprep.mubr.msk.bf16.mxu0 %vm159_vm0, %v2533_v21  ;;  %2130 = vmatmul.mubr.msk.bf16.gmra.mrb[12].mxu1 %vm159_vm0, %v2538_v22 }
  0x20   :  { %2135 = vmatprep.mubr.msk.bf16.mxu1 %vm159_vm0, %v2543_v23 }
  0x26   :  { %2100 = vmatmul.mubr.msk.bf16.vlgmr.msra.gmra.mrb[0].mxu0 %vm159_vm0, %v2556_v24 }
  0x27   :  { %2152 = vmatpush3.bf16.msra.mxu0 %v2317_v18  ;;  %2103 = vmatprep.mubr.msk.bf16.mxu0 %vm159_vm0, %v2561_v25 }
  0x28   :  { %2136 = vmatmul.mubr.msk.bf16.vlgmr.msra.gmra.mrb[0].mxu1 %vm159_vm0, %v2566_v26  ;;  %2169 = vmatprep.subr.bf16.mxu0 %v2331_v28 }
  0x29   :  { %2188 = vmatpush3.bf16.msra.mxu1 %v2318_v19  ;;  %2139 = vmatprep.mubr.msk.bf16.mxu1 %vm159_vm0, %v2320_v27 }
  0x2a   :  { %2205 = vmatprep.subr.bf16.mxu1 %v2332_v29 }
  0x2e   :  { %2104 = vmatmul.mubr.msk.bf16.gmra.mrb[4].mxu0 %vm159_vm0, %v2321_v31 }
  0x2f   :  { %2107 = vmatprep.mubr.msk.bf16.mxu0 %vm159_vm0, %v2323_v32 }
  0x30   :  { %2140 = vmatmul.mubr.msk.bf16.gmra.mrb[4].mxu1 %vm159_vm0, %v2322_v33 }
  0x31   :  { %2143 = vmatprep.mubr.msk.bf16.mxu1 %vm159_vm0, %v2324_v34 }
  0x36   :  { %2108 = vmatmul.mubr.msk.bf16.gmra.mrb[8].mxu0 %vm159_vm0, %v2325_v35 }
  0x37   :  { %2111 = vmatprep.mubr.msk.bf16.mxu0 %vm159_vm0, %v2327_v36 }
  0x38   :  { %2144 = vmatmul.mubr.msk.bf16.gmra.mrb[8].mxu1 %vm159_vm0, %v2326_v37 }
  0x39   :  { %2147 = vmatprep.mubr.msk.bf16.mxu1 %vm159_vm0, %v2328_v38 }
  0x3e   :  { %2112 = vmatmul.mubr.msk.bf16.gmra.mrb[12].mxu0 %vm159_vm0, %v2329_v39 }
  0x3f   :  { %2153 = vmatprep.mubr.msk.bf16.mxu0 %vm159_vm0, %v2418_v2 }
  0x40   :  { %2148 = vmatmul.mubr.msk.bf16.gmra.mrb[12].mxu1 %vm159_vm0, %v2330_v40 }
  0x41   :  { %2189 = vmatprep.mubr.msk.bf16.mxu1 %vm159_vm0, %v2423_v3 }
  0x46   :  { %2154 = vmatmul.mubr.msk.bf16.vlgmr.msra.gmra.mrb[16].mxu0 %vm159_vm0, %v2430_v4 }
  0x47   :  { %2170 = vmatpush3.bf16.msra.mxu0 %v2331_v28  ;;  %2157 = vmatprep.mubr.msk.bf16.mxu0 %vm159_vm0, %v2452_v8 }
  0x48   :  { %2190 = vmatmul.mubr.msk.bf16.vlgmr.msra.gmra.mrb[16].mxu1 %vm159_vm0, %v2442_v6 }
  0x49   :  { %2206 = vmatpush3.bf16.msra.mxu1 %v2332_v29  ;;  %2193 = vmatprep.mubr.msk.bf16.mxu1 %vm159_vm0, %v2457_v9 }
  0x4e   :  { %2158 = vmatmul.mubr.msk.bf16.gmra.mrb[20].mxu0 %vm159_vm0, %v2464_v10 }
  0x4f   :  { %2161 = vmatprep.mubr.msk.bf16.mxu0 %vm159_vm0, %v2476_v12 }
  0x50   :  { %2194 = vmatmul.mubr.msk.bf16.gmra.mrb[20].mxu1 %vm159_vm0, %v2471_v11 }
  0x51   :  { %2197 = vmatprep.mubr.msk.bf16.mxu1 %vm159_vm0, %v2481_v13 }
  0x56   :  { %2162 = vmatmul.mubr.msk.bf16.gmra.mrb[24].mxu0 %vm159_vm0, %v2494_v14 }
  0x57   :  { %2165 = vmatprep.mubr.msk.bf16.mxu0 %vm159_vm0, %v2499_v15 }
  0x58   :  { %2198 = vmatmul.mubr.msk.bf16.gmra.mrb[24].mxu1 %vm159_vm0, %v2504_v16 }
  0x59   :  { %2201 = vmatprep.mubr.msk.bf16.mxu1 %vm159_vm0, %v2509_v17 }
  0x5e   :  { %2166 = vmatmul.mubr.msk.bf16.gmra.mrb[28].mxu0 %vm159_vm0, %v2528_v20 }
  0x5f   :  { %2171 = vmatprep.mubr.msk.bf16.mxu0 %vm159_vm0, %v2533_v21 }
  0x60   :  { %2202 = vmatmul.mubr.msk.bf16.gmra.mrb[28].mxu1 %vm159_vm0, %v2538_v22 }
  0x61   :  { %2207 = vmatprep.mubr.msk.bf16.mxu1 %vm159_vm0, %v2543_v23 }
  0x66   :  { %2172 = vmatmul.mubr.msk.bf16.vlgmr.msra.gmra.mrb[16].mxu0 %vm159_vm0, %v2556_v24 }
  0x67   :  { %2175 = vmatprep.mubr.msk.bf16.mxu0 %vm159_vm0, %v2561_v25 }
  0x68   :  { %2208 = vmatmul.mubr.msk.bf16.vlgmr.msra.gmra.mrb[16].mxu1 %vm159_vm0, %v2566_v26 }
  0x69   :  { %2211 = vmatprep.mubr.msk.bf16.mxu1 %vm159_vm0, %v2320_v27 }
  0x6e   :  { %2176 = vmatmul.mubr.msk.bf16.gmra.mrb[20].mxu0 %vm159_vm0, %v2321_v31 }
  0x6f   :  { %2179 = vmatprep.mubr.msk.bf16.mxu0 %vm159_vm0, %v2323_v32 }
  0x70   :  { %2212 = vmatmul.mubr.msk.bf16.gmra.mrb[20].mxu1 %vm159_vm0, %v2322_v33 }
  0x71   :  { %2215 = vmatprep.mubr.msk.bf16.mxu1 %vm159_vm0, %v2324_v34 }
  0x76   :  { %2180 = vmatmul.mubr.msk.bf16.gmra.mrb[24].mxu0 %vm159_vm0, %v2325_v35 }
  0x77   :  { %2183 = vmatprep.mubr.msk.bf16.mxu0 %vm159_vm0, %v2327_v36 }
  0x78   :  { %2216 = vmatmul.mubr.msk.bf16.gmra.mrb[24].mxu1 %vm159_vm0, %v2326_v37 }
  0x79   :  { %2219 = vmatprep.mubr.msk.bf16.mxu1 %vm159_vm0, %v2328_v38 }
  0x7e   :  { %2184 = vmatmul.mubr.msk.bf16.gmra.mrb[28].mxu0 %vm159_vm0, %v2329_v39 }
  0x80   :  { %2220 = vmatmul.mubr.msk.bf16.gmra.mrb[28].mxu1 %vm159_vm0, %v2330_v40 }
  0x82   :  { %v2685_v41 = vpop.permute.xlu0 %833 }
  0xf9   :  { %v2101_v42 = vpop.f32.mrb[0].mxu0 }
  0xfa   :  { %v457_v43 = vadd.f32 %v2101_v42, %v2586_v30  ;;  %v385_v44 = vpop.f32.mrb[1].mxu0 }
  0xfb   :  { %v2137_v45 = vpop.f32.mrb[0].mxu1  ;;  %v455_v46 = vadd.f32 %v2586_v30, %v385_v44  ;;  %v2102_v47 = vpop.f32.mrb[2].mxu0 }
  0xfc   :  { %v473_v48 = vmax.f32 %v457_v43, 0.0  ;;  %v838_v49 = vadd.f32 %v2137_v45, %v2685_v41  ;;  %v770_v50 = vpop.f32.mrb[1].mxu1  ;;  %v458_v51 = vadd.f32 %v2102_v47, %v2586_v30  ;;  %v388_v52 = vpop.f32.mrb[3].mxu0 }
  0xfd   :  { %v471_v53 = vmax.f32 %v455_v46, 0.0  ;;  %v836_v54 = vadd.f32 %v2685_v41, %v770_v50  ;;  %v2138_v55 = vpop.f32.mrb[2].mxu1  ;;  %v456_v56 = vadd.f32 %v2586_v30, %v388_v52 }
  0xfe   :  { %v1945_v57 = vpack.c.bf16 %v473_v48, %v473_v48  ;;  %v854_v58 = vmax.f32 %v838_v49, 0.0  ;;  %v474_v59 = vmax.f32 %v458_v51, 0.0  ;;  %v839_v60 = vadd.f32 %v2138_v55, %v2685_v41  ;;  %v773_v61 = vpop.f32.mrb[3].mxu1 }
  0xff   :  { %v1943_v62 = vpack.c.bf16 %v471_v53, %v471_v53  ;;  %v472_v63 = vmax.f32 %v456_v56, 0.0  ;;  %v837_v0 = vadd.f32 %v2685_v41, %v773_v61  ;;  %v852_v2 = vmax.f32 %v836_v54, 0.0 }
 0x100   :  { %1441 = vst.msk [vmem:[%s3078_s13 + $0x8] sm:$0xf] %vm1438_vm1, %v1945_v57  ;;  %v1961_v1 = vpack.c.bf16 %v854_v58, %v854_v58  ;;  %v1946_v3 = vpack.c.bf16 %v474_v59, %v474_v59  ;;  %v855_v4 = vmax.f32 %v839_v60, 0.0 }
 0x101   :  { %1439 = vst.msk [vmem:[%s3078_s13] sm:$0xf] %vm1438_vm1, %v1943_v62  ;;  %v1944_v5 = vpack.c.bf16 %v472_v63, %v472_v63  ;;  %v853_v6 = vmax.f32 %v837_v0, 0.0  ;;  %v2105_v7 = vpop.f32.mrb[4].mxu0  ;;  %v1959_v14 = vpack.c.bf16 %v852_v2, %v852_v2 }
 0x102   :  { %1442 = vst.msk [vmem:[%s3078_s13 + $0xc] sm:$0xf] %vm1438_vm1, %v1946_v3  ;;  %v1962_v8 = vpack.c.bf16 %v855_v4, %v855_v4  ;;  %1499 = vrot.lane.b32.xlu1 %v1961_v1, %s2336_s21  ;;  %v461_v9 = vadd.f32 %v2105_v7, %v2586_v30  ;;  %v401_v10 = vpop.f32.mrb[5].mxu0 }
 0x103   :  { %1440 = vst.msk [vmem:[%s3078_s13 + $0x4] sm:$0xf] %vm1438_vm1, %v1944_v5  ;;  %v2141_v11 = vpop.f32.mrb[4].mxu1  ;;  %v459_v12 = vadd.f32 %v2586_v30, %v401_v10  ;;  %v2106_v13 = vpop.f32.mrb[6].mxu0  ;;  %v1960_v20 = vpack.c.bf16 %v853_v6, %v853_v6 }
 0x104   :  { %v477_v15 = vmax.f32 %v461_v9, 0.0  ;;  %v842_v16 = vadd.f32 %v2141_v11, %v2685_v41  ;;  %1501 = vrot.lane.b32.xlu0 %v1962_v8, %s2336_s21  ;;  %v786_v17 = vpop.f32.mrb[5].mxu1  ;;  %v462_v18 = vadd.f32 %v2106_v13, %v2586_v30  ;;  %v404_v19 = vpop.f32.mrb[7].mxu0 }
 0x105   :  { %v475_v21 = vmax.f32 %v459_v12, 0.0  ;;  %v840_v22 = vadd.f32 %v2685_v41, %v786_v17  ;;  %v2142_v23 = vpop.f32.mrb[6].mxu1  ;;  %v460_v24 = vadd.f32 %v2586_v30, %v404_v19 }
 0x106   :  { %v1949_v25 = vpack.c.bf16 %v477_v15, %v477_v15  ;;  %v858_v26 = vmax.f32 %v842_v16, 0.0  ;;  %v478_v27 = vmax.f32 %v462_v18, 0.0  ;;  %v843_v28 = vadd.f32 %v2142_v23, %v2685_v41  ;;  %1495 = vrot.lane.b32.xlu1 %v1959_v14, %s2336_s21  ;;  %v789_v29 = vpop.f32.mrb[7].mxu1 }
 0x107   :  { %v1947_v31 = vpack.c.bf16 %v475_v21, %v475_v21  ;;  %v476_v32 = vmax.f32 %v460_v24, 0.0  ;;  %v841_v33 = vadd.f32 %v2685_v41, %v789_v29  ;;  %v856_v35 = vmax.f32 %v840_v22, 0.0 }
 0x108   :  { %1445 = vst.msk [vmem:[%s3078_s13 + $0x18] sm:$0xf] %vm1438_vm1, %v1949_v25  ;;  %v1965_v34 = vpack.c.bf16 %v858_v26, %v858_v26  ;;  %v1950_v36 = vpack.c.bf16 %v478_v27, %v478_v27  ;;  %v859_v37 = vmax.f32 %v843_v28, 0.0  ;;  %1497 = vrot.lane.b32.xlu0 %v1960_v20, %s2336_s21 }
 0x109   :  { %1443 = vst.msk [vmem:[%s3078_s13 + $0x10] sm:$0xf] %vm1438_vm1, %v1947_v31  ;;  %v1948_v38 = vpack.c.bf16 %v476_v32, %v476_v32  ;;  %v857_v39 = vmax.f32 %v841_v33, 0.0  ;;  %v2109_v40 = vpop.f32.mrb[8].mxu0  ;;  %v1963_v48 = vpack.c.bf16 %v856_v35, %v856_v35 }
 0x10a   :  { %1446 = vst.msk [vmem:[%s3078_s13 + $0x1c] sm:$0xf] %vm1438_vm1, %v1950_v36  ;;  %v1966_v42 = vpack.c.bf16 %v859_v37, %v859_v37  ;;  %1507 = vrot.lane.b32.xlu1 %v1965_v34, %s2336_s21  ;;  %v465_v43 = vadd.f32 %v2109_v40, %v2586_v30  ;;  %v417_v44 = vpop.f32.mrb[9].mxu0 }
 0x10b   :  { %1444 = vst.msk [vmem:[%s3078_s13 + $0x14] sm:$0xf] %vm1438_vm1, %v1948_v38  ;;  %v2145_v45 = vpop.f32.mrb[8].mxu1  ;;  %v463_v46 = vadd.f32 %v2586_v30, %v417_v44  ;;  %v2110_v47 = vpop.f32.mrb[10].mxu0  ;;  %v1964_v54 = vpack.c.bf16 %v857_v39, %v857_v39 }
 0x10c   :  { %v481_v49 = vmax.f32 %v465_v43, 0.0  ;;  %v846_v50 = vadd.f32 %v2145_v45, %v2685_v41  ;;  %1509 = vrot.lane.b32.xlu0 %v1966_v42, %s2336_s21  ;;  %v802_v51 = vpop.f32.mrb[9].mxu1  ;;  %v466_v52 = vadd.f32 %v2110_v47, %v2586_v30  ;;  %v420_v53 = vpop.f32.mrb[11].mxu0 }
 0x10d   :  { %v479_v55 = vmax.f32 %v463_v46, 0.0  ;;  %v844_v56 = vadd.f32 %v2685_v41, %v802_v51  ;;  %v2146_v57 = vpop.f32.mrb[10].mxu1  ;;  %v464_v58 = vadd.f32 %v2586_v30, %v420_v53  ;;  %v2799_v44 = vpop.permute.xlu0 %1086 }
 0x10e   :  { %v1953_v59 = vpack.c.bf16 %v481_v49, %v481_v49  ;;  %v862_v60 = vmax.f32 %v846_v50, 0.0  ;;  %v482_v61 = vmax.f32 %v466_v52, 0.0  ;;  %v847_v62 = vadd.f32 %v2146_v57, %v2685_v41  ;;  %1503 = vrot.lane.b32.xlu1 %v1963_v48, %s2336_s21  ;;  %v805_v63 = vpop.f32.mrb[11].mxu1  ;;  %v2801_v45 = vpop.permute.xlu1 %1339 }
 0x10f   :  { %v1951_v0 = vpack.c.bf16 %v479_v55, %v479_v55  ;;  %v480_v1 = vmax.f32 %v464_v58, 0.0  ;;  %v845_v2 = vadd.f32 %v2685_v41, %v805_v63  ;;  %v860_v4 = vmax.f32 %v844_v56, 0.0 }
 0x110   :  { %1449 = vst.msk [vmem:[%s3078_s13 + $0x28] sm:$0xf] %vm1438_vm1, %v1953_v59  ;;  %v1969_v3 = vpack.c.bf16 %v862_v60, %v862_v60  ;;  %v1954_v5 = vpack.c.bf16 %v482_v61, %v482_v61  ;;  %v863_v6 = vmax.f32 %v847_v62, 0.0  ;;  %1505 = vrot.lane.b32.xlu0 %v1964_v54, %s2336_s21 }
 0x111   :  { %1447 = vst.msk [vmem:[%s3078_s13 + $0x20] sm:$0xf] %vm1438_vm1, %v1951_v0  ;;  %v1952_v7 = vpack.c.bf16 %v480_v1, %v480_v1  ;;  %v861_v8 = vmax.f32 %v845_v2, 0.0  ;;  %v2113_v9 = vpop.f32.mrb[12].mxu0  ;;  %v1967_v16 = vpack.c.bf16 %v860_v4, %v860_v4 }
 0x112   :  { %1450 = vst.msk [vmem:[%s3078_s13 + $0x2c] sm:$0xf] %vm1438_vm1, %v1954_v5  ;;  %v1970_v10 = vpack.c.bf16 %v863_v6, %v863_v6  ;;  %1515 = vrot.lane.b32.xlu1 %v1969_v3, %s2336_s21  ;;  %v469_v11 = vadd.f32 %v2113_v9, %v2586_v30  ;;  %v433_v12 = vpop.f32.mrb[13].mxu0 }
 0x113   :  { %1448 = vst.msk [vmem:[%s3078_s13 + $0x24] sm:$0xf] %vm1438_vm1, %v1952_v7  ;;  %v2149_v13 = vpop.f32.mrb[12].mxu1  ;;  %v467_v14 = vadd.f32 %v2586_v30, %v433_v12  ;;  %v2114_v15 = vpop.f32.mrb[14].mxu0  ;;  %v1968_v22 = vpack.c.bf16 %v861_v8, %v861_v8 }
 0x114   :  { %v485_v17 = vmax.f32 %v469_v11, 0.0  ;;  %v850_v18 = vadd.f32 %v2149_v13, %v2685_v41  ;;  %1517 = vrot.lane.b32.xlu0 %v1970_v10, %s2336_s21  ;;  %v818_v19 = vpop.f32.mrb[13].mxu1  ;;  %v470_v20 = vadd.f32 %v2114_v15, %v2586_v30  ;;  %v436_v21 = vpop.f32.mrb[15].mxu0 }
 0x115   :  { %v483_v23 = vmax.f32 %v467_v14, 0.0  ;;  %v848_v24 = vadd.f32 %v2685_v41, %v818_v19  ;;  %v2150_v25 = vpop.f32.mrb[14].mxu1  ;;  %v468_v26 = vadd.f32 %v2586_v30, %v436_v21 }
 0x116   :  { %v1957_v27 = vpack.c.bf16 %v485_v17, %v485_v17  ;;  %v866_v28 = vmax.f32 %v850_v18, 0.0  ;;  %v486_v29 = vmax.f32 %v470_v20, 0.0  ;;  %v851_v31 = vadd.f32 %v2150_v25, %v2685_v41  ;;  %1511 = vrot.lane.b32.xlu1 %v1967_v16, %s2336_s21  ;;  %v821_v32 = vpop.f32.mrb[15].mxu1 }
 0x117   :  { %v1955_v33 = vpack.c.bf16 %v483_v23, %v483_v23  ;;  %v484_v34 = vmax.f32 %v468_v26, 0.0  ;;  %v849_v35 = vadd.f32 %v2685_v41, %v821_v32  ;;  %v864_v37 = vmax.f32 %v848_v24, 0.0 }
 0x118   :  { %1453 = vst.msk [vmem:[%s3078_s13 + $0x38] sm:$0xf] %vm1438_vm1, %v1957_v27  ;;  %v1973_v36 = vpack.c.bf16 %v866_v28, %v866_v28  ;;  %v1958_v30 = vpack.c.bf16 %v486_v29, %v486_v29  ;;  %v867_v38 = vmax.f32 %v851_v31, 0.0  ;;  %1513 = vrot.lane.b32.xlu0 %v1968_v22, %s2336_s21 }
 0x119   :  { %1451 = vst.msk [vmem:[%s3078_s13 + $0x30] sm:$0xf] %vm1438_vm1, %v1955_v33  ;;  %v1956_v39 = vpack.c.bf16 %v484_v34, %v484_v34  ;;  %v865_v40 = vmax.f32 %v849_v35, 0.0  ;;  %v1971_v42 = vpack.c.bf16 %v864_v37, %v864_v37 }
 0x11a   :  { %1454 = vst.msk [vmem:[%s3078_s13 + $0x3c] sm:$0xf] %vm1438_vm1, %v1958_v30  ;;  %v1974_v41 = vpack.c.bf16 %v867_v38, %v867_v38  ;;  %1523 = vrot.lane.b32.xlu1 %v1973_v36, %s2336_s21 }
 0x11b   :  { %1452 = vst.msk [vmem:[%s3078_s13 + $0x34] sm:$0xf] %vm1438_vm1, %v1956_v39  ;;  %v1972_v43 = vpack.c.bf16 %v865_v40, %v865_v40 }
 0x11c   :  { %1525 = vrot.lane.b32.xlu0 %v1974_v41, %s2336_s21 }
 0x11e   :  { %1519 = vrot.lane.b32.xlu1 %v1971_v42, %s2336_s21 }
 0x120   :  { %1521 = vrot.lane.b32.xlu0 %v1972_v43, %s2336_s21 }
 0x139   :  { %v2173_v46 = vpop.f32.mrb[16].mxu0 }
 0x13a   :  { %v1091_v47 = vadd.f32 %v2173_v46, %v2799_v44  ;;  %v1023_v48 = vpop.f32.mrb[17].mxu0 }
 0x13b   :  { %v2209_v49 = vpop.f32.mrb[16].mxu1  ;;  %v2174_v50 = vpop.f32.mrb[18].mxu0  ;;  %v1089_v56 = vadd.f32 %v2799_v44, %v1023_v48 }
 0x13c   :  { %v1107_v51 = vmax.f32 %v1091_v47, 0.0  ;;  %v1344_v52 = vadd.f32 %v2209_v49, %v2801_v45  ;;  %v1276_v53 = vpop.f32.mrb[17].mxu1  ;;  %v1092_v54 = vadd.f32 %v2174_v50, %v2799_v44  ;;  %v1026_v55 = vpop.f32.mrb[19].mxu0 }
 0x13d   :  { %v2210_v57 = vpop.f32.mrb[18].mxu1  ;;  %v1090_v1 = vadd.f32 %v2799_v44, %v1026_v55  ;;  %v1105_v4 = vmax.f32 %v1089_v56, 0.0  ;;  %v1342_v5 = vadd.f32 %v2801_v45, %v1276_v53 }
 0x13e   :  { %v1977_v58 = vpack.c.bf16 %v1107_v51, %v1107_v51  ;;  %v1360_v59 = vmax.f32 %v1344_v52, 0.0  ;;  %v1108_v60 = vmax.f32 %v1092_v54, 0.0  ;;  %v1345_v61 = vadd.f32 %v2210_v57, %v2801_v45  ;;  %v1279_v62 = vpop.f32.mrb[19].mxu1 }
 0x13f   :  { %v1106_v10 = vmax.f32 %v1090_v1, 0.0  ;;  %v1343_v11 = vadd.f32 %v2801_v45, %v1279_v62  ;;  %v1975_v15 = vpack.c.bf16 %v1105_v4, %v1105_v4  ;;  %v1358_v16 = vmax.f32 %v1342_v5, 0.0 }
 0x140   :  { %v1978_v63 = vpack.c.bf16 %v1108_v60, %v1108_v60  ;;  %v1361_v0 = vmax.f32 %v1345_v61, 0.0  ;;  %1604 = vrot.lane.b32.xlu1 %v1977_v58, %s2337_s18  ;;  %v1993_v3 = vpack.c.bf16 %v1360_v59, %v1360_v59 }
 0x141   :  { %v2177_v2 = vpop.f32.mrb[20].mxu0  ;;  %v1976_v19 = vpack.c.bf16 %v1106_v10, %v1106_v10  ;;  %v1359_v20 = vmax.f32 %v1343_v11, 0.0  ;;  %v1991_v23 = vpack.c.bf16 %v1358_v16, %v1358_v16 }
 0x142   :  { %1606 = vrot.lane.b32.xlu0 %v1978_v63, %s2337_s18  ;;  %v1039_v6 = vpop.f32.mrb[21].mxu0  ;;  %v1994_v9 = vpack.c.bf16 %v1361_v0, %v1361_v0  ;;  %v1095_v17 = vadd.f32 %v2177_v2, %v2799_v44 }
 0x143   :  { %v2213_v7 = vpop.f32.mrb[20].mxu1  ;;  %v2178_v8 = vpop.f32.mrb[22].mxu0  ;;  %v1992_v29 = vpack.c.bf16 %v1359_v20, %v1359_v20  ;;  %v1093_v30 = vadd.f32 %v2799_v44, %v1039_v6 }
 0x144   :  { %v1292_v12 = vpop.f32.mrb[21].mxu1  ;;  %1709 = vrot.lane.b32.xlu1 %v1993_v3, %s2338_s19  ;;  %v1042_v13 = vpop.f32.mrb[23].mxu0  ;;  %v1096_v21 = vadd.f32 %v2178_v8, %v2799_v44  ;;  %v1111_v24 = vmax.f32 %v1095_v17, 0.0  ;;  %v1348_v25 = vadd.f32 %v2213_v7, %v2801_v45 }
 0x145   :  { %v2214_v14 = vpop.f32.mrb[22].mxu1  ;;  %v1094_v40 = vadd.f32 %v2799_v44, %v1042_v13  ;;  %v1346_v46 = vadd.f32 %v2801_v45, %v1292_v12  ;;  %v1109_v47 = vmax.f32 %v1093_v30, 0.0 }
 0x146   :  { %v1295_v18 = vpop.f32.mrb[23].mxu1  ;;  %1711 = vrot.lane.b32.xlu0 %v1994_v9, %s2338_s19  ;;  %v1112_v31 = vmax.f32 %v1096_v21, 0.0  ;;  %v1349_v32 = vadd.f32 %v2214_v14, %v2801_v45  ;;  %v1981_v36 = vpack.c.bf16 %v1111_v24, %v1111_v24  ;;  %v1364_v37 = vmax.f32 %v1348_v25, 0.0 }
 0x147   :  { %v1347_v52 = vadd.f32 %v2801_v45, %v1295_v18  ;;  %v1110_v53 = vmax.f32 %v1094_v40, 0.0  ;;  %v1362_v57 = vmax.f32 %v1346_v46, 0.0  ;;  %v1979_v58 = vpack.c.bf16 %v1109_v47, %v1109_v47 }
 0x148   :  { %1600 = vrot.lane.b32.xlu1 %v1975_v15, %s2337_s18  ;;  %v1982_v39 = vpack.c.bf16 %v1112_v31, %v1112_v31  ;;  %v1365_v41 = vmax.f32 %v1349_v32, 0.0  ;;  %v1997_v43 = vpack.c.bf16 %v1364_v37, %v1364_v37 }
 0x149   :  { %v2181_v22 = vpop.f32.mrb[24].mxu0  ;;  %v1363_v61 = vmax.f32 %v1347_v52, 0.0  ;;  %v1980_v62 = vpack.c.bf16 %v1110_v53, %v1110_v53  ;;  %v1995_v0 = vpack.c.bf16 %v1362_v57, %v1362_v57 }
 0x14a   :  { %1602 = vrot.lane.b32.xlu0 %v1976_v19, %s2337_s18  ;;  %v1055_v26 = vpop.f32.mrb[25].mxu0  ;;  %v1998_v51 = vpack.c.bf16 %v1365_v41, %v1365_v41  ;;  %v1099_v59 = vadd.f32 %v2181_v22, %v2799_v44 }
 0x14b   :  { %v2217_v27 = vpop.f32.mrb[24].mxu1  ;;  %v2182_v28 = vpop.f32.mrb[26].mxu0  ;;  %v1996_v3 = vpack.c.bf16 %v1363_v61, %v1363_v61  ;;  %v1097_v8 = vadd.f32 %v2799_v44, %v1055_v26 }
 0x14c   :  { %v1308_v33 = vpop.f32.mrb[25].mxu1  ;;  %1705 = vrot.lane.b32.xlu1 %v1991_v23, %s2338_s19  ;;  %v1058_v34 = vpop.f32.mrb[27].mxu0  ;;  %v1100_v63 = vadd.f32 %v2182_v28, %v2799_v44  ;;  %v1115_v1 = vmax.f32 %v1099_v59, 0.0  ;;  %v1352_v2 = vadd.f32 %v2217_v27, %v2801_v45 }
 0x14d   :  { %v2218_v35 = vpop.f32.mrb[26].mxu1  ;;  %v1098_v11 = vadd.f32 %v2799_v44, %v1058_v34  ;;  %v1350_v13 = vadd.f32 %v2801_v45, %v1308_v33  ;;  %v1113_v14 = vmax.f32 %v1097_v8, 0.0 }
 0x14e   :  { %v1311_v38 = vpop.f32.mrb[27].mxu1  ;;  %1707 = vrot.lane.b32.xlu0 %v1992_v29, %s2338_s19  ;;  %v1116_v4 = vmax.f32 %v1100_v63, 0.0  ;;  %v1353_v5 = vadd.f32 %v2218_v35, %v2801_v45  ;;  %v1985_v6 = vpack.c.bf16 %v1115_v1, %v1115_v1  ;;  %v1368_v7 = vmax.f32 %v1352_v2, 0.0 }
 0x14f   :  { %v1351_v16 = vadd.f32 %v2801_v45, %v1311_v38  ;;  %v1114_v17 = vmax.f32 %v1098_v11, 0.0  ;;  %v1366_v18 = vmax.f32 %v1350_v13, 0.0  ;;  %v1983_v19 = vpack.c.bf16 %v1113_v14, %v1113_v14 }
 0x150   :  { %1612 = vrot.lane.b32.xlu1 %v1981_v36, %s2337_s18  ;;  %v1986_v9 = vpack.c.bf16 %v1116_v4, %v1116_v4  ;;  %v1369_v10 = vmax.f32 %v1353_v5, 0.0  ;;  %v2001_v12 = vpack.c.bf16 %v1368_v7, %v1368_v7 }
 0x151   :  { %v2185_v42 = vpop.f32.mrb[28].mxu0  ;;  %v1367_v21 = vmax.f32 %v1351_v16, 0.0  ;;  %v1984_v22 = vpack.c.bf16 %v1114_v17, %v1114_v17  ;;  %v1999_v24 = vpack.c.bf16 %v1366_v18, %v1366_v18 }
 0x152   :  { %1614 = vrot.lane.b32.xlu0 %v1982_v39, %s2337_s18  ;;  %v1071_v48 = vpop.f32.mrb[29].mxu0  ;;  %v2002_v15 = vpack.c.bf16 %v1369_v10, %v1369_v10  ;;  %v1103_v20 = vadd.f32 %v2185_v42, %v2799_v44 }
 0x153   :  { %v2828_v49 = vpop.f32.mrb[28].mxu1  ;;  %v2186_v50 = vpop.f32.mrb[30].mxu0  ;;  %v1101_v26 = vadd.f32 %v2799_v44, %v1071_v48  ;;  %v2000_v27 = vpack.c.bf16 %v1367_v21, %v1367_v21 }
 0x154   :  { %v1324_v54 = vpop.f32.mrb[29].mxu1  ;;  %1717 = vrot.lane.b32.xlu1 %v1997_v43, %s2338_s19  ;;  %v1074_v55 = vpop.f32.mrb[31].mxu0  ;;  %v1104_v23 = vadd.f32 %v2186_v50, %v2799_v44  ;;  %v1119_v25 = vmax.f32 %v1103_v20, 0.0  ;;  %v1356_v37 = vadd.f32 %v2828_v49, %v2801_v45 }
 0x155   :  { %v2832_v56 = vpop.f32.mrb[30].mxu1  ;;  %v1102_v29 = vadd.f32 %v2799_v44, %v1074_v55  ;;  %v1354_v32 = vadd.f32 %v2801_v45, %v1324_v54  ;;  %v1117_v33 = vmax.f32 %v1101_v26, 0.0 }
 0x156   :  { %v1327_v60 = vpop.f32.mrb[31].mxu1  ;;  %1719 = vrot.lane.b32.xlu0 %v1998_v51, %s2338_s19  ;;  %v1120_v28 = vmax.f32 %v1104_v23, 0.0  ;;  %v1989_v31 = vpack.c.bf16 %v1119_v25, %v1119_v25  ;;  %v1357_v44 = vadd.f32 %v2832_v56, %v2801_v45  ;;  %v1372_v42 = vmax.f32 %v1356_v37, 0.0 }
 0x157   :  { %v1355_v35 = vadd.f32 %v2801_v45, %v1327_v60  ;;  %v1118_v36 = vmax.f32 %v1102_v29, 0.0  ;;  %v1370_v30 = vmax.f32 %v1354_v32, 0.0  ;;  %v1987_v38 = vpack.c.bf16 %v1117_v33, %v1117_v33 }
 0x158   :  { %1608 = vrot.lane.b32.xlu1 %v1979_v58, %s2337_s18  ;;  %v1990_v34 = vpack.c.bf16 %v1120_v28, %v1120_v28  ;;  %v1373_v45 = vmax.f32 %v1357_v44, 0.0  ;;  %v2005_v49 = vpack.c.bf16 %v1372_v42, %v1372_v42 }
 0x159   :  { %v1371_v39 = vmax.f32 %v1355_v35, 0.0  ;;  %v1988_v41 = vpack.c.bf16 %v1118_v36, %v1118_v36  ;;  %v2003_v43 = vpack.c.bf16 %v1370_v30, %v1370_v30 }
 0x15a   :  { %1610 = vrot.lane.b32.xlu0 %v1980_v62, %s2337_s18  ;;  %v2006_v51 = vpack.c.bf16 %v1373_v45, %v1373_v45 }
 0x15b   :  { %v2004_v47 = vpack.c.bf16 %v1371_v39, %v1371_v39 }
 0x15c   :  { %1713 = vrot.lane.b32.xlu1 %v1995_v0, %s2338_s19 }
 0x15e   :  { %1715 = vrot.lane.b32.xlu0 %v1996_v3, %s2338_s19 }
 0x160   :  { %1620 = vrot.lane.b32.xlu1 %v1985_v6, %s2337_s18 }
 0x162   :  { %1622 = vrot.lane.b32.xlu0 %v1986_v9, %s2337_s18 }
 0x164   :  { %1725 = vrot.lane.b32.xlu1 %v2001_v12, %s2338_s19 }
 0x166   :  { %1727 = vrot.lane.b32.xlu0 %v2002_v15, %s2338_s19 }
 0x168   :  { %1616 = vrot.lane.b32.xlu1 %v1983_v19, %s2337_s18 }
 0x16a   :  { %1618 = vrot.lane.b32.xlu0 %v1984_v22, %s2337_s18 }
 0x16c   :  { %1721 = vrot.lane.b32.xlu1 %v1999_v24, %s2338_s19 }
 0x16e   :  { %1723 = vrot.lane.b32.xlu0 %v2000_v27, %s2338_s19 }
 0x170   :  { %1628 = vrot.lane.b32.xlu1 %v1989_v31, %s2337_s18 }
 0x172   :  { %1630 = vrot.lane.b32.xlu0 %v1990_v34, %s2337_s18 }
 0x174   :  { %v1500_v40 = vpop.permute.xlu1 %1499  ;;  %1624 = vrot.lane.b32.xlu1 %v1987_v38, %s2337_s18 }
 0x175   :  { %1546 = vst.msk [vmem:[%s3078_s13 + $0x8] sm:$0xf] %vm1543_vm2, %v1500_v40 }
 0x176   :  { %v1502_v46 = vpop.permute.xlu0 %1501  ;;  %1626 = vrot.lane.b32.xlu0 %v1988_v41, %s2337_s18 }
 0x177   :  { %1547 = vst.msk [vmem:[%s3078_s13 + $0xc] sm:$0xf] %vm1543_vm2, %v1502_v46 }
 0x178   :  { %v1496_v48 = vpop.permute.xlu1 %1495  ;;  %1729 = vrot.lane.b32.xlu1 %v2003_v43, %s2338_s19 }
 0x179   :  { %1544 = vst.msk [vmem:[%s3078_s13] sm:$0xf] %vm1543_vm2, %v1496_v48 }
 0x17a   :  { %v1498_v50 = vpop.permute.xlu0 %1497  ;;  %1731 = vrot.lane.b32.xlu0 %v2004_v47, %s2338_s19 }
 0x17b   :  { %1545 = vst.msk [vmem:[%s3078_s13 + $0x4] sm:$0xf] %vm1543_vm2, %v1498_v50 }
 0x17c   :  { %v1508_v52 = vpop.permute.xlu1 %1507  ;;  %1733 = vrot.lane.b32.xlu1 %v2005_v49, %s2338_s19 }
 0x17d   :  { %1550 = vst.msk [vmem:[%s3078_s13 + $0x18] sm:$0xf] %vm1543_vm2, %v1508_v52 }
 0x17e   :  { %v1510_v53 = vpop.permute.xlu0 %1509  ;;  %1735 = vrot.lane.b32.xlu0 %v2006_v51, %s2338_s19 }
 0x17f   :  { %1551 = vst.msk [vmem:[%s3078_s13 + $0x1c] sm:$0xf] %vm1543_vm2, %v1510_v53 }
 0x180   :  { %v1504_v54 = vpop.permute.xlu1 %1503 }
 0x181   :  { %1548 = vst.msk [vmem:[%s3078_s13 + $0x10] sm:$0xf] %vm1543_vm2, %v1504_v54 }
 0x182   :  { %v1506_v55 = vpop.permute.xlu0 %1505 }
 0x183   :  { %1549 = vst.msk [vmem:[%s3078_s13 + $0x14] sm:$0xf] %vm1543_vm2, %v1506_v55 }
 0x184   :  { %v1516_v56 = vpop.permute.xlu1 %1515 }
 0x185   :  { %1554 = vst.msk [vmem:[%s3078_s13 + $0x28] sm:$0xf] %vm1543_vm2, %v1516_v56 }
 0x186   :  { %v1518_v57 = vpop.permute.xlu0 %1517 }
 0x187   :  { %1555 = vst.msk [vmem:[%s3078_s13 + $0x2c] sm:$0xf] %vm1543_vm2, %v1518_v57 }
 0x188   :  { %v1512_v58 = vpop.permute.xlu1 %1511 }
 0x189   :  { %1552 = vst.msk [vmem:[%s3078_s13 + $0x20] sm:$0xf] %vm1543_vm2, %v1512_v58 }
 0x18a   :  { %v1514_v59 = vpop.permute.xlu0 %1513 }
 0x18b   :  { %1553 = vst.msk [vmem:[%s3078_s13 + $0x24] sm:$0xf] %vm1543_vm2, %v1514_v59 }
 0x18c   :  { %v1524_v60 = vpop.permute.xlu1 %1523 }
 0x18d   :  { %1558 = vst.msk [vmem:[%s3078_s13 + $0x38] sm:$0xf] %vm1543_vm2, %v1524_v60 }
 0x18e   :  { %v1526_v61 = vpop.permute.xlu0 %1525 }
 0x18f   :  { %1559 = vst.msk [vmem:[%s3078_s13 + $0x3c] sm:$0xf] %vm1543_vm2, %v1526_v61 }
 0x190   :  { %v1520_v62 = vpop.permute.xlu1 %1519 }
 0x191   :  { %1556 = vst.msk [vmem:[%s3078_s13 + $0x30] sm:$0xf] %vm1543_vm2, %v1520_v62 }
 0x192   :  { %v1522_v63 = vpop.permute.xlu0 %1521 }
 0x193   :  { %1557 = vst.msk [vmem:[%s3078_s13 + $0x34] sm:$0xf] %vm1543_vm2, %v1522_v63 }
 0x1b2   :  { %v1605_v0 = vpop.permute.xlu1 %1604 }
 0x1b3   :  { %1651 = vst.msk [vmem:[%s3078_s13 + $0x8] sm:$0xf] %vm1648_vm3, %v1605_v0 }
 0x1b4   :  { %v1607_v1 = vpop.permute.xlu0 %1606 }
 0x1b5   :  { %1652 = vst.msk [vmem:[%s3078_s13 + $0xc] sm:$0xf] %vm1648_vm3, %v1607_v1 }
 0x1b6   :  { %v1710_v2 = vpop.permute.xlu1 %1709 }
 0x1b7   :  { %1756 = vst.msk [vmem:[%s3078_s13 + $0x8] sm:$0xf] %vm1753_vm4, %v1710_v2 }
 0x1b8   :  { %v1712_v3 = vpop.permute.xlu0 %1711 }
 0x1b9   :  { %1757 = vst.msk [vmem:[%s3078_s13 + $0xc] sm:$0xf] %vm1753_vm4, %v1712_v3 }
 0x1ba   :  { %v1601_v4 = vpop.permute.xlu1 %1600 }
 0x1bb   :  { %1649 = vst.msk [vmem:[%s3078_s13] sm:$0xf] %vm1648_vm3, %v1601_v4 }
 0x1bc   :  { %v1603_v5 = vpop.permute.xlu0 %1602 }
 0x1bd   :  { %1650 = vst.msk [vmem:[%s3078_s13 + $0x4] sm:$0xf] %vm1648_vm3, %v1603_v5 }
 0x1be   :  { %v1706_v6 = vpop.permute.xlu1 %1705 }
 0x1bf   :  { %1754 = vst.msk [vmem:[%s3078_s13] sm:$0xf] %vm1753_vm4, %v1706_v6 }
 0x1c0   :  { %v1708_v7 = vpop.permute.xlu0 %1707 }
 0x1c1   :  { %1755 = vst.msk [vmem:[%s3078_s13 + $0x4] sm:$0xf] %vm1753_vm4, %v1708_v7 }
 0x1c2   :  { %v1613_v8 = vpop.permute.xlu1 %1612 }
 0x1c3   :  { %1655 = vst.msk [vmem:[%s3078_s13 + $0x18] sm:$0xf] %vm1648_vm3, %v1613_v8 }
 0x1c4   :  { %v1615_v9 = vpop.permute.xlu0 %1614 }
 0x1c5   :  { %1656 = vst.msk [vmem:[%s3078_s13 + $0x1c] sm:$0xf] %vm1648_vm3, %v1615_v9 }
 0x1c6   :  { %v1718_v10 = vpop.permute.xlu1 %1717 }
 0x1c7   :  { %1760 = vst.msk [vmem:[%s3078_s13 + $0x18] sm:$0xf] %vm1753_vm4, %v1718_v10 }
 0x1c8   :  { %v1720_v11 = vpop.permute.xlu0 %1719 }
 0x1c9   :  { %1761 = vst.msk [vmem:[%s3078_s13 + $0x1c] sm:$0xf] %vm1753_vm4, %v1720_v11 }
 0x1ca   :  { %v1609_v12 = vpop.permute.xlu1 %1608 }
 0x1cb   :  { %1653 = vst.msk [vmem:[%s3078_s13 + $0x10] sm:$0xf] %vm1648_vm3, %v1609_v12 }
 0x1cc   :  { %v1611_v13 = vpop.permute.xlu0 %1610 }
 0x1cd   :  { %1654 = vst.msk [vmem:[%s3078_s13 + $0x14] sm:$0xf] %vm1648_vm3, %v1611_v13 }
 0x1ce   :  { %v1714_v14 = vpop.permute.xlu1 %1713 }
 0x1cf   :  { %1758 = vst.msk [vmem:[%s3078_s13 + $0x10] sm:$0xf] %vm1753_vm4, %v1714_v14 }
 0x1d0   :  { %v1716_v15 = vpop.permute.xlu0 %1715 }
 0x1d1   :  { %1759 = vst.msk [vmem:[%s3078_s13 + $0x14] sm:$0xf] %vm1753_vm4, %v1716_v15 }
 0x1d2   :  { %v1621_v16 = vpop.permute.xlu1 %1620 }
 0x1d3   :  { %1659 = vst.msk [vmem:[%s3078_s13 + $0x28] sm:$0xf] %vm1648_vm3, %v1621_v16 }
 0x1d4   :  { %v1623_v17 = vpop.permute.xlu0 %1622 }
 0x1d5   :  { %1660 = vst.msk [vmem:[%s3078_s13 + $0x2c] sm:$0xf] %vm1648_vm3, %v1623_v17 }
 0x1d6   :  { %v1726_v18 = vpop.permute.xlu1 %1725 }
 0x1d7   :  { %1764 = vst.msk [vmem:[%s3078_s13 + $0x28] sm:$0xf] %vm1753_vm4, %v1726_v18 }
 0x1d8   :  { %v1728_v19 = vpop.permute.xlu0 %1727 }
 0x1d9   :  { %1765 = vst.msk [vmem:[%s3078_s13 + $0x2c] sm:$0xf] %vm1753_vm4, %v1728_v19 }
 0x1da   :  { %v1617_v20 = vpop.permute.xlu1 %1616 }
 0x1db   :  { %1657 = vst.msk [vmem:[%s3078_s13 + $0x20] sm:$0xf] %vm1648_vm3, %v1617_v20 }
 0x1dc   :  { %v1619_v21 = vpop.permute.xlu0 %1618 }
 0x1dd   :  { %1658 = vst.msk [vmem:[%s3078_s13 + $0x24] sm:$0xf] %vm1648_vm3, %v1619_v21 }
 0x1de   :  { %v1722_v22 = vpop.permute.xlu1 %1721 }
 0x1df   :  { %1762 = vst.msk [vmem:[%s3078_s13 + $0x20] sm:$0xf] %vm1753_vm4, %v1722_v22 }
 0x1e0   :  { %v1724_v23 = vpop.permute.xlu0 %1723 }
 0x1e1   :  { %1763 = vst.msk [vmem:[%s3078_s13 + $0x24] sm:$0xf] %vm1753_vm4, %v1724_v23 }
 0x1e2   :  { %v1629_v24 = vpop.permute.xlu1 %1628 }
 0x1e3   :  { %1663 = vst.msk [vmem:[%s3078_s13 + $0x38] sm:$0xf] %vm1648_vm3, %v1629_v24 }
 0x1e4   :  { %v1631_v25 = vpop.permute.xlu0 %1630 }
 0x1e5   :  { %1664 = vst.msk [vmem:[%s3078_s13 + $0x3c] sm:$0xf] %vm1648_vm3, %v1631_v25 }
 0x1e6   :  { %v1625_v26 = vpop.permute.xlu1 %1624 }
 0x1e7   :  { %1661 = vst.msk [vmem:[%s3078_s13 + $0x30] sm:$0xf] %vm1648_vm3, %v1625_v26 }
 0x1e8   :  { %v1627_v27 = vpop.permute.xlu0 %1626 }
 0x1e9   :  { %1662 = vst.msk [vmem:[%s3078_s13 + $0x34] sm:$0xf] %vm1648_vm3, %v1627_v27 }
 0x1ea   :  { %v1730_v28 = vpop.permute.xlu1 %1729 }
 0x1eb   :  { %1766 = vst.msk [vmem:[%s3078_s13 + $0x30] sm:$0xf] %vm1753_vm4, %v1730_v28 }
 0x1ec   :  { %v1732_v29 = vpop.permute.xlu0 %1731 }
 0x1ed   :  { %1767 = vst.msk [vmem:[%s3078_s13 + $0x34] sm:$0xf] %vm1753_vm4, %v1732_v29 }
 0x1ee   :  { %v1734_v31 = vpop.permute.xlu1 %1733 }
 0x1ef   :  { %1768 = vst.msk [vmem:[%s3078_s13 + $0x38] sm:$0xf] %vm1753_vm4, %v1734_v31 }
 0x1f0   :  { %v1736_v32 = vpop.permute.xlu0 %1735 }
 0x1f1   :  { %1769 = vst.msk [vmem:[%s3078_s13 + $0x3c] sm:$0xf] %vm1753_vm4, %v1736_v32 }

// kernel: cnn_forward.17
= control target key start
LH: loop header
LB: loop body
LE: loop exit
PB: predicated region body
PF: predicated region fallthrough
CT: control target
= control target key end

     0   :  { %vm91_vm0 = vcmask 261120   ;;  %s1021_s25 = smov 112   ;;  %vm716_vm1 = vcmask 125952   ;;  %s1024_s14 = smov 16   ;;  %vm743_vm2 = vcmask 257152   ;;  %vm770_vm3 = vcmask 388352   ;;  %s1240_s5 = inlined_call_operand.vmem [shape: bf16[32,16], index: 5, kind: input, shape index: {}]   ;;  %s1241_s7 = inlined_call_operand.vmem [shape: bf16[32,16], index: 7, kind: input, shape index: {}]   ;;  %s1242_s2 = inlined_call_operand.vmem [shape: bf16[32,32], index: 2, kind: input, shape index: {}]   ;;  %s1243_s3 = inlined_call_operand.vmem [shape: bf16[32,32], index: 3, kind: input, shape index: {}]   ;;  %s1244_s4 = inlined_call_operand.vmem [shape: bf16[32,16], index: 4, kind: input, shape index: {}]   ;;  %s1245_s6 = inlined_call_operand.vmem [shape: bf16[32,16], index: 6, kind: input, shape index: {}]   ;;  %s1246_s0 = inlined_call_operand.vmem [shape: bf16[32,32], index: 0, kind: input, shape index: {}]   ;;  %s1247_s1 = inlined_call_operand.vmem [shape: bf16[32,32], index: 1, kind: input, shape index: {}]   ;;  %s1248_s9 = inlined_call_operand.vmem [shape: bf16[32,16], index: 9, kind: input, shape index: {}]   ;;  %s1249_s11 = inlined_call_operand.vmem [shape: bf16[32,16], index: 11, kind: input, shape index: {}]   ;;  %s1250_s8 = inlined_call_operand.vmem [shape: bf16[32,16], index: 8, kind: input, shape index: {}]   ;;  %s1251_s10 = inlined_call_operand.vmem [shape: bf16[32,16], index: 10, kind: input, shape index: {}]   ;;  %s1252_s12 = inlined_call_operand.vmem [shape: f32[1,64], index: 12, kind: input, shape index: {}]   ;;  %s1253_s13 = inlined_call_operand.vmem [shape: bf16[32,64], index: 13, kind: output, shape index: {}]  }
   0x1   :  { %v997_v0 = vld [vmem:[%s1240_s5] sm:$0xff]   ;;  %v999_v2 = vld [vmem:[%s1240_s5 + $0x8] sm:$0xff]   ;;  %s1025_s17 = smov 32   ;;  %s1026_s18 = smov 48   ;;  %vm797_vm4 = vcmask 519552  }
   0x2   :  { %v998_v1 = vld [vmem:[%s1241_s7] sm:$0xff]   ;;  %911 = vmatprep.subr.bf16.mxu0 %v997_v0  ;;  %v1000_v3 = vld [vmem:[%s1241_s7 + $0x8] sm:$0xff]  }
   0x3   :  { %927 = vmatprep.subr.bf16.mxu1 %v998_v1  ;;  %912 = vmatpush3.bf16.msra.mxu0 %v997_v0  ;;  %v1001_v4 = vld [vmem:[%s1242_s2] sm:$0xff]   ;;  %v1003_v6 = vld [vmem:[%s1242_s2 + $0x8] sm:$0xff]   ;;  %s1022_s2 = smov 80  }
   0x4   :  { %928 = vmatpush3.bf16.msra.mxu1 %v998_v1  ;;  %913 = vmatprep.subr.bf16.mxu0 %v999_v2  ;;  %v1002_v5 = vld [vmem:[%s1243_s3] sm:$0xff]   ;;  %v1005_v8 = vld [vmem:[%s1243_s3 + $0x8] sm:$0xff]   ;;  %s1023_s3 = smov 96  }
   0x5   :  { %929 = vmatprep.subr.bf16.mxu1 %v1000_v3  ;;  %915 = vmatprep.mubr.msk.bf16.mxu0 %vm91_vm0, %v1001_v4  ;;  %v1004_v7 = vld [vmem:[%s1244_s4] sm:$0xff]   ;;  %v1007_v10 = vld [vmem:[%s1244_s4 + $0x8] sm:$0xff]  }
   0x6   :  { %931 = vmatprep.mubr.msk.bf16.mxu1 %vm91_vm0, %v1002_v5  ;;  %v1006_v9 = vld [vmem:[%s1245_s6] sm:$0xff]   ;;  %v1008_v11 = vld [vmem:[%s1245_s6 + $0x8] sm:$0xff]  }
   0x7   :  { %914 = vmatpush3.bf16.msra.mxu0 %v999_v2  ;;  %v1009_v12 = vld [vmem:[%s1246_s0] sm:$0xff]   ;;  %v1011_v16 = vld [vmem:[%s1246_s0 + $0x8] sm:$0xff]  }
   0x8   :  { %930 = vmatpush3.bf16.msra.mxu1 %v1000_v3  ;;  %919 = vmatprep.subr.bf16.mxu0 %v1004_v7  ;;  %v1010_v13 = vld [vmem:[%s1247_s1] sm:$0xff]   ;;  %v1012_v17 = vld [vmem:[%s1247_s1 + $0x8] sm:$0xff]  }
   0x9   :  { %935 = vmatprep.subr.bf16.mxu1 %v1006_v9  ;;  %v1013_v14 = vld [vmem:[%s1248_s9] sm:$0xff]   ;;  %v1015_v18 = vld [vmem:[%s1248_s9 + $0x8] sm:$0xff]  }
   0xa   :  { %916 = vmatmul.mubr.msk.bf16.vlgmr.msra.gmra.mrb[0].mxu0 %vm91_vm0, %v1003_v6  ;;  %v1014_v15 = vld [vmem:[%s1249_s11] sm:$0xff]   ;;  %v1016_v19 = vld [vmem:[%s1249_s11 + $0x8] sm:$0xff]  }
   0xb   :  { %932 = vmatmul.mubr.msk.bf16.vlgmr.msra.gmra.mrb[0].mxu1 %vm91_vm0, %v1005_v8  ;;  %920 = vmatpush3.bf16.msra.mxu0 %v1004_v7  ;;  %v1017_v20 = vld [vmem:[%s1250_s8] sm:$0xff]   ;;  %v1019_v23 = vld [vmem:[%s1250_s8 + $0x8] sm:$0xff]  }
   0xc   :  { %921 = vmatprep.subr.bf16.mxu0 %v1007_v10  ;;  %936 = vmatpush3.bf16.msra.mxu1 %v1006_v9  ;;  %v818_v21 = vld [vmem:[%s1252_s12] ss:$0 sm:$0xff]  ;;  %v1020_v24 = vld [vmem:[%s1251_s10 + $0x8] sm:$0xff]  }
   0xd   :  { %937 = vmatprep.subr.bf16.mxu1 %v1008_v11  ;;  %923 = vmatprep.mubr.msk.bf16.mxu0 %vm91_vm0, %v1009_v12  ;;  %v1018_v22 = vld [vmem:[%s1251_s10] sm:$0xff]  }
   0xe   :  { %939 = vmatprep.mubr.msk.bf16.mxu1 %vm91_vm0, %v1010_v13  ;;  %403 = vrot.lane.b32.xlu0 %v818_v21, %s1021_s25 }
   0xf   :  { %922 = vmatpush3.bf16.msra.mxu0 %v1007_v10  ;;  %689 = vrot.lane.b32.xlu1 %v818_v21, %s1022_s2 }
  0x10   :  { %938 = vmatpush3.bf16.msra.mxu1 %v1008_v11  ;;  %943 = vmatprep.subr.bf16.mxu0 %v1013_v14 }
  0x11   :  { %959 = vmatprep.subr.bf16.mxu1 %v1014_v15 }
  0x12   :  { %546 = vrot.lane.b32.xlu0 %v818_v21, %s1023_s3 }
  0x16   :  { %924 = vmatmul.mubr.msk.bf16.vlgmr.msra.gmra.mrb[0].mxu0 %vm91_vm0, %v1011_v16 }
  0x17   :  { %940 = vmatmul.mubr.msk.bf16.vlgmr.msra.gmra.mrb[0].mxu1 %vm91_vm0, %v1012_v17  ;;  %944 = vmatpush3.bf16.msra.mxu0 %v1013_v14 }
  0x18   :  { %960 = vmatpush3.bf16.msra.mxu1 %v1014_v15  ;;  %945 = vmatprep.subr.bf16.mxu0 %v1015_v18 }
  0x19   :  { %961 = vmatprep.subr.bf16.mxu1 %v1016_v19  ;;  %947 = vmatprep.mubr.msk.bf16.mxu0 %vm91_vm0, %v1001_v4 }
  0x1a   :  { %963 = vmatprep.mubr.msk.bf16.mxu1 %vm91_vm0, %v1002_v5 }
  0x1b   :  { %946 = vmatpush3.bf16.msra.mxu0 %v1015_v18 }
  0x1c   :  { %962 = vmatpush3.bf16.msra.mxu1 %v1016_v19  ;;  %951 = vmatprep.subr.bf16.mxu0 %v1017_v20 }
  0x1d   :  { %967 = vmatprep.subr.bf16.mxu1 %v1018_v22 }
  0x1e   :  { %948 = vmatmul.mubr.msk.bf16.vlgmr.msra.gmra.mrb[4].mxu0 %vm91_vm0, %v1003_v6 }
  0x1f   :  { %964 = vmatmul.mubr.msk.bf16.vlgmr.msra.gmra.mrb[4].mxu1 %vm91_vm0, %v1005_v8  ;;  %952 = vmatpush3.bf16.msra.mxu0 %v1017_v20 }
  0x20   :  { %968 = vmatpush3.bf16.msra.mxu1 %v1018_v22  ;;  %953 = vmatprep.subr.bf16.mxu0 %v1019_v23 }
  0x21   :  { %969 = vmatprep.subr.bf16.mxu1 %v1020_v24  ;;  %955 = vmatprep.mubr.msk.bf16.mxu0 %vm91_vm0, %v1009_v12 }
  0x22   :  { %971 = vmatprep.mubr.msk.bf16.mxu1 %vm91_vm0, %v1010_v13 }
  0x23   :  { %954 = vmatpush3.bf16.msra.mxu0 %v1019_v23 }
  0x24   :  { %970 = vmatpush3.bf16.msra.mxu1 %v1020_v24 }
  0x2a   :  { %956 = vmatmul.mubr.msk.bf16.vlgmr.msra.gmra.mrb[4].mxu0 %vm91_vm0, %v1011_v16 }
  0x2b   :  { %972 = vmatmul.mubr.msk.bf16.vlgmr.msra.gmra.mrb[4].mxu1 %vm91_vm0, %v1012_v17 }
  0x80   :  { %v404_v25 = vpop.permute.xlu0 %403 }
  0x81   :  { %v690_v59 = vpop.permute.xlu1 %689 }
  0x84   :  { %v547_v58 = vpop.permute.xlu0 %546 }
  0xe9   :  { %v925_v26 = vpop.f32.mrb[0].mxu0 }
  0xea   :  { %v233_v27 = vadd.f32 %v925_v26, %v818_v21  ;;  %v941_v28 = vpop.f32.mrb[0].mxu1  ;;  %v209_v29 = vpop.f32.mrb[1].mxu0 }
  0xeb   :  { %v408_v30 = vadd.f32 %v941_v28, %v404_v25  ;;  %v231_v31 = vadd.f32 %v818_v21, %v209_v29  ;;  %v388_v32 = vpop.f32.mrb[1].mxu1  ;;  %v926_v33 = vpop.f32.mrb[2].mxu0 }
  0xec   :  { %v237_v34 = vmax.f32 %v233_v27, 0.0  ;;  %v406_v35 = vadd.f32 %v404_v25, %v388_v32  ;;  %v234_v36 = vadd.f32 %v926_v33, %v818_v21  ;;  %v942_v37 = vpop.f32.mrb[2].mxu1  ;;  %v212_v38 = vpop.f32.mrb[3].mxu0 }
  0xed   :  { %v412_v39 = vmax.f32 %v408_v30, 0.0  ;;  %v235_v40 = vmax.f32 %v231_v31, 0.0  ;;  %v409_v41 = vadd.f32 %v942_v37, %v404_v25  ;;  %v232_v42 = vadd.f32 %v818_v21, %v212_v38  ;;  %v391_v43 = vpop.f32.mrb[3].mxu1 }
  0xee   :  { %v865_v44 = vpack.c.bf16 %v237_v34, %v237_v34  ;;  %v410_v45 = vmax.f32 %v406_v35, 0.0  ;;  %v238_v46 = vmax.f32 %v234_v36, 0.0  ;;  %v407_v47 = vadd.f32 %v404_v25, %v391_v43 }
  0xef   :  { %v869_v48 = vpack.c.bf16 %v412_v39, %v412_v39  ;;  %v863_v49 = vpack.c.bf16 %v235_v40, %v235_v40  ;;  %v413_v50 = vmax.f32 %v409_v41, 0.0  ;;  %v236_v51 = vmax.f32 %v232_v42, 0.0 }
  0xf0   :  { %719 = vst.msk [vmem:[%s1253_s13 + $0x8] sm:$0xf] %vm716_vm1, %v865_v44  ;;  %v866_v52 = vpack.c.bf16 %v238_v46, %v238_v46  ;;  %v411_v55 = vmax.f32 %v407_v47, 0.0  ;;  %v867_v56 = vpack.c.bf16 %v410_v45, %v410_v45 }
  0xf1   :  { %717 = vst.msk [vmem:[%s1253_s13] sm:$0xf] %vm716_vm1, %v863_v49  ;;  %v870_v53 = vpack.c.bf16 %v413_v50, %v413_v50  ;;  %v864_v54 = vpack.c.bf16 %v236_v51, %v236_v51  ;;  %735 = vrot.lane.b32.xlu1 %v869_v48, %s1024_s14 }
  0xf2   :  { %720 = vst.msk [vmem:[%s1253_s13 + $0xc] sm:$0xf] %vm716_vm1, %v866_v52  ;;  %v868_v57 = vpack.c.bf16 %v411_v55, %v411_v55 }
  0xf3   :  { %718 = vst.msk [vmem:[%s1253_s13 + $0x4] sm:$0xf] %vm716_vm1, %v864_v54  ;;  %737 = vrot.lane.b32.xlu0 %v870_v53, %s1024_s14 }
  0xf5   :  { %731 = vrot.lane.b32.xlu1 %v867_v56, %s1024_s14 }
  0xf7   :  { %733 = vrot.lane.b32.xlu0 %v868_v57, %s1024_s14 }
  0xfd   :  { %v957_v60 = vpop.f32.mrb[4].mxu0 }
  0xfe   :  { %v551_v61 = vadd.f32 %v957_v60, %v547_v58  ;;  %v973_v62 = vpop.f32.mrb[4].mxu1  ;;  %v531_v63 = vpop.f32.mrb[5].mxu0 }
  0xff   :  { %v549_v0 = vadd.f32 %v547_v58, %v531_v63  ;;  %v674_v1 = vpop.f32.mrb[5].mxu1  ;;  %v958_v2 = vpop.f32.mrb[6].mxu0  ;;  %v694_v16 = vadd.f32 %v973_v62, %v690_v59 }
 0x100   :  { %v555_v3 = vmax.f32 %v551_v61, 0.0  ;;  %v552_v4 = vadd.f32 %v958_v2, %v547_v58  ;;  %v974_v5 = vpop.f32.mrb[6].mxu1  ;;  %v534_v6 = vpop.f32.mrb[7].mxu0  ;;  %v692_v11 = vadd.f32 %v690_v59, %v674_v1 }
 0x101   :  { %v550_v7 = vadd.f32 %v547_v58, %v534_v6  ;;  %v677_v8 = vpop.f32.mrb[7].mxu1  ;;  %v553_v10 = vmax.f32 %v549_v0, 0.0  ;;  %v695_v19 = vadd.f32 %v974_v5, %v690_v59  ;;  %v698_v22 = vmax.f32 %v694_v16, 0.0 }
 0x102   :  { %v873_v9 = vpack.c.bf16 %v555_v3, %v555_v3  ;;  %v556_v12 = vmax.f32 %v552_v4, 0.0  ;;  %v693_v15 = vadd.f32 %v690_v59, %v677_v8  ;;  %v696_v18 = vmax.f32 %v692_v11, 0.0 }
 0x103   :  { %v554_v14 = vmax.f32 %v550_v7, 0.0  ;;  %v871_v17 = vpack.c.bf16 %v553_v10, %v553_v10  ;;  %v699_v24 = vmax.f32 %v695_v19, 0.0  ;;  %v877_v26 = vpack.c.bf16 %v698_v22, %v698_v22 }
 0x104   :  { %v874_v13 = vpack.c.bf16 %v556_v12, %v556_v12  ;;  %762 = vrot.lane.b32.xlu1 %v873_v9, %s1025_s17  ;;  %v697_v21 = vmax.f32 %v693_v15, 0.0  ;;  %v875_v23 = vpack.c.bf16 %v696_v18, %v696_v18 }
 0x105   :  { %v872_v20 = vpack.c.bf16 %v554_v14, %v554_v14  ;;  %v878_v27 = vpack.c.bf16 %v699_v24, %v699_v24 }
 0x106   :  { %764 = vrot.lane.b32.xlu0 %v874_v13, %s1025_s17  ;;  %v876_v25 = vpack.c.bf16 %v697_v21, %v697_v21 }
 0x108   :  { %758 = vrot.lane.b32.xlu1 %v871_v17, %s1025_s17 }
 0x10a   :  { %760 = vrot.lane.b32.xlu0 %v872_v20, %s1025_s17 }
 0x10c   :  { %785 = vrot.lane.b32.xlu1 %v875_v23, %s1026_s18 }
 0x10e   :  { %787 = vrot.lane.b32.xlu0 %v876_v25, %s1026_s18 }
 0x110   :  { %789 = vrot.lane.b32.xlu1 %v877_v26, %s1026_s18 }
 0x112   :  { %791 = vrot.lane.b32.xlu0 %v878_v27, %s1026_s18 }
 0x163   :  { %v736_v28 = vpop.permute.xlu1 %735 }
 0x164   :  { %746 = vst.msk [vmem:[%s1253_s13 + $0x8] sm:$0xf] %vm743_vm2, %v736_v28 }
 0x165   :  { %v738_v29 = vpop.permute.xlu0 %737 }
 0x166   :  { %747 = vst.msk [vmem:[%s1253_s13 + $0xc] sm:$0xf] %vm743_vm2, %v738_v29 }
 0x167   :  { %v732_v30 = vpop.permute.xlu1 %731 }
 0x168   :  { %744 = vst.msk [vmem:[%s1253_s13] sm:$0xf] %vm743_vm2, %v732_v30 }
 0x169   :  { %v734_v31 = vpop.permute.xlu0 %733 }
 0x16a   :  { %745 = vst.msk [vmem:[%s1253_s13 + $0x4] sm:$0xf] %vm743_vm2, %v734_v31 }
 0x176   :  { %v763_v32 = vpop.permute.xlu1 %762 }
 0x177   :  { %773 = vst.msk [vmem:[%s1253_s13 + $0x8] sm:$0xf] %vm770_vm3, %v763_v32 }
 0x178   :  { %v765_v33 = vpop.permute.xlu0 %764 }
 0x179   :  { %774 = vst.msk [vmem:[%s1253_s13 + $0xc] sm:$0xf] %vm770_vm3, %v765_v33 }
 0x17a   :  { %v759_v34 = vpop.permute.xlu1 %758 }
 0x17b   :  { %771 = vst.msk [vmem:[%s1253_s13] sm:$0xf] %vm770_vm3, %v759_v34 }
 0x17c   :  { %v761_v35 = vpop.permute.xlu0 %760 }
 0x17d   :  { %772 = vst.msk [vmem:[%s1253_s13 + $0x4] sm:$0xf] %vm770_vm3, %v761_v35 }
 0x17e   :  { %v786_v36 = vpop.permute.xlu1 %785 }
 0x17f   :  { %798 = vst.msk [vmem:[%s1253_s13] sm:$0xf] %vm797_vm4, %v786_v36 }
 0x180   :  { %v788_v37 = vpop.permute.xlu0 %787 }
 0x181   :  { %799 = vst.msk [vmem:[%s1253_s13 + $0x4] sm:$0xf] %vm797_vm4, %v788_v37 }
 0x182   :  { %v790_v38 = vpop.permute.xlu1 %789 }
 0x183   :  { %800 = vst.msk [vmem:[%s1253_s13 + $0x8] sm:$0xf] %vm797_vm4, %v790_v38 }
 0x184   :  { %v792_v39 = vpop.permute.xlu0 %791 }
 0x185   :  { %801 = vst.msk [vmem:[%s1253_s13 + $0xc] sm:$0xf] %vm797_vm4, %v792_v39 }

// kernel: cnn_forward.18
= control target key start
LH: loop header
LB: loop body
LE: loop exit
PB: predicated region body
PF: predicated region fallthrough
CT: control target
= control target key end

     0   :  { %vm88_vm0 = vcmask 523264   ;;  %vm166_vm1 = vcmask 261120   ;;  %vm420_vm2 = vcmask 125952   ;;  %s624_s18 = smov 16   ;;  %s626_s23 = smov 48   ;;  %vm447_vm3 = vcmask 257152   ;;  %s797_s5 = inlined_call_operand.vmem [shape: bf16[64,16], index: 5, kind: input, shape index: {}]   ;;  %s798_s6 = inlined_call_operand.vmem [shape: bf16[64,16], index: 6, kind: input, shape index: {}]   ;;  %s799_s2 = inlined_call_operand.vmem [shape: bf16[32,64], index: 2, kind: input, shape index: {}]   ;;  %s800_s4 = inlined_call_operand.vmem [shape: bf16[32,16], index: 4, kind: input, shape index: {}]   ;;  %s801_s3 = inlined_call_operand.vmem [shape: bf16[32,16], index: 3, kind: input, shape index: {}]   ;;  %s802_s0 = inlined_call_operand.vmem [shape: bf16[32,32], index: 0, kind: input, shape index: {}]   ;;  %s803_s1 = inlined_call_operand.vmem [shape: bf16[32,32], index: 1, kind: input, shape index: {}]   ;;  %s804_s7 = inlined_call_operand.vmem [shape: f32[1,32], index: 7, kind: input, shape index: {}]   ;;  %s805_s8 = inlined_call_operand.vmem [shape: bf16[32,64], index: 8, kind: output, shape index: {}]  }
   0x1   :  { %v605_v0 = vld [vmem:[%s797_s5] sm:$0xff]   ;;  %v607_v2 = vld [vmem:[%s797_s5 + $0x8] sm:$0xff]   ;;  %v609_v4 = vld [vmem:[%s797_s5 + $0x10] sm:$0xff]   ;;  %vm464_vm4 = vcmask 388352   ;;  %vm481_vm5 = vcmask 519552  }
   0x2   :  { %v606_v1 = vld [vmem:[%s798_s6] sm:$0xff]   ;;  %553 = vmatprep.subr.bf16.mxu0 %v605_v0  ;;  %v608_v3 = vld [vmem:[%s798_s6 + $0x8] sm:$0xff]   ;;  %v610_v5 = vld [vmem:[%s798_s6 + $0x10] sm:$0xff]  }
   0x3   :  { %573 = vmatprep.subr.bf16.mxu1 %v606_v1  ;;  %554 = vmatpush3.bf16.msra.mxu0 %v605_v0  ;;  %v611_v6 = vld [vmem:[%s797_s5 + $0x18] sm:$0xff]   ;;  %v613_v7 = vld [vmem:[%s799_s2] sm:$0xff]   ;;  %v614_v11 = vld [vmem:[%s799_s2 + $0x8] sm:$0xff]   ;;  %s625_s5 = smov 32  }
   0x4   :  { %574 = vmatpush3.bf16.msra.mxu1 %v606_v1  ;;  %555 = vmatprep.subr.bf16.mxu0 %v607_v2  ;;  %v612_v8 = vld [vmem:[%s798_s6 + $0x18] sm:$0xff]   ;;  %v616_v9 = vld [vmem:[%s801_s3] sm:$0xff]   ;;  %v617_v12 = vld [vmem:[%s800_s4 + $0x8] sm:$0xff]  }
   0x5   :  { %575 = vmatprep.subr.bf16.mxu1 %v608_v3  ;;  %561 = vmatprep.mubr.msk.bf16.mxu0 %vm88_vm0, %v613_v7  ;;  %v615_v10 = vld [vmem:[%s800_s4] sm:$0xff]   ;;  %v618_v13 = vld [vmem:[%s801_s3 + $0x8] sm:$0xff]   ;;  %s623_s3 = smov 112  }
   0x6   :  { %581 = vmatprep.mubr.msk.bf16.mxu1 %vm88_vm0, %v613_v7  ;;  %v619_v14 = vld [vmem:[%s802_s0] sm:$0xff]   ;;  %v621_v17 = vld [vmem:[%s802_s0 + $0x8] sm:$0xff]  }
   0x7   :  { %556 = vmatpush3.bf16.msra.mxu0 %v607_v2  ;;  %v620_v15 = vld [vmem:[%s803_s1] sm:$0xff]   ;;  %v622_v18 = vld [vmem:[%s803_s1 + $0x8] sm:$0xff]  }
   0x8   :  { %576 = vmatpush3.bf16.msra.mxu1 %v608_v3  ;;  %557 = vmatprep.subr.bf16.mxu0 %v609_v4  ;;  %v504_v16 = vld [vmem:[%s804_s7] ss:$0 sm:$0xff] }
   0x9   :  { %577 = vmatprep.subr.bf16.mxu1 %v610_v5  ;;  %397 = vrot.lane.b32.xlu0 %v504_v16, %s623_s3 }
   0xb   :  { %558 = vmatpush3.bf16.msra.mxu0 %v609_v4 }
   0xc   :  { %578 = vmatpush3.bf16.msra.mxu1 %v610_v5  ;;  %559 = vmatprep.subr.bf16.mxu0 %v611_v6 }
   0xd   :  { %579 = vmatprep.subr.bf16.mxu1 %v612_v8 }
   0xf   :  { %560 = vmatpush3.bf16.msra.mxu0 %v611_v6 }
  0x10   :  { %580 = vmatpush3.bf16.msra.mxu1 %v612_v8  ;;  %565 = vmatprep.subr.bf16.mxu0 %v616_v9 }
  0x11   :  { %585 = vmatprep.subr.bf16.mxu1 %v615_v10 }
  0x12   :  { %562 = vmatmul.mubr.msk.bf16.vlgmr.msra.gmra.mrb[0].mxu0 %vm88_vm0, %v614_v11 }
  0x13   :  { %582 = vmatmul.mubr.msk.bf16.vlgmr.msra.gmra.mrb[0].mxu1 %vm88_vm0, %v614_v11  ;;  %566 = vmatpush3.bf16.msra.mxu0 %v616_v9 }
  0x14   :  { %586 = vmatpush3.bf16.msra.mxu1 %v615_v10  ;;  %567 = vmatprep.subr.bf16.mxu0 %v618_v13 }
  0x15   :  { %587 = vmatprep.subr.bf16.mxu1 %v617_v12  ;;  %569 = vmatprep.mubr.msk.bf16.mxu0 %vm166_vm1, %v619_v14 }
  0x16   :  { %589 = vmatprep.mubr.msk.bf16.mxu1 %vm166_vm1, %v620_v15 }
  0x17   :  { %568 = vmatpush3.bf16.msra.mxu0 %v618_v13 }
  0x18   :  { %588 = vmatpush3.bf16.msra.mxu1 %v617_v12 }
  0x1e   :  { %570 = vmatmul.mubr.msk.bf16.vlgmr.msra.gmra.mrb[0].mxu0 %vm166_vm1, %v621_v17 }
  0x1f   :  { %590 = vmatmul.mubr.msk.bf16.vlgmr.msra.gmra.mrb[0].mxu1 %vm166_vm1, %v622_v18 }
  0x7b   :  { %v398_v19 = vpop.permute.xlu0 %397 }
  0xf1   :  { %v571_v20 = vpop.f32.mrb[0].mxu0 }
  0xf2   :  { %v231_v21 = vadd.f32 %v571_v20, %v504_v16  ;;  %v591_v22 = vpop.f32.mrb[0].mxu1  ;;  %v207_v23 = vpop.f32.mrb[1].mxu0 }
  0xf3   :  { %v402_v24 = vadd.f32 %v591_v22, %v398_v19  ;;  %v229_v25 = vadd.f32 %v504_v16, %v207_v23  ;;  %v382_v26 = vpop.f32.mrb[1].mxu1  ;;  %v572_v27 = vpop.f32.mrb[2].mxu0 }
  0xf4   :  { %v527_v28 = vpack.c.bf16 %v231_v21, %v231_v21  ;;  %v400_v29 = vadd.f32 %v398_v19, %v382_v26  ;;  %v232_v30 = vadd.f32 %v572_v27, %v504_v16  ;;  %v592_v31 = vpop.f32.mrb[2].mxu1  ;;  %v210_v32 = vpop.f32.mrb[3].mxu0 }
  0xf5   :  { %v531_v33 = vpack.c.bf16 %v402_v24, %v402_v24  ;;  %v525_v34 = vpack.c.bf16 %v229_v25, %v229_v25  ;;  %v230_v35 = vadd.f32 %v504_v16, %v210_v32  ;;  %v385_v36 = vpop.f32.mrb[3].mxu1  ;;  %v403_v39 = vadd.f32 %v592_v31, %v398_v19 }
  0xf6   :  { %423 = vst.msk [vmem:[%s805_s8 + $0x8] sm:$0xf] %vm420_vm2, %v527_v28  ;;  %v529_v37 = vpack.c.bf16 %v400_v29, %v400_v29  ;;  %v528_v38 = vpack.c.bf16 %v232_v30, %v232_v30  ;;  %v401_v42 = vadd.f32 %v398_v19, %v385_v36 }
  0xf7   :  { %421 = vst.msk [vmem:[%s805_s8] sm:$0xf] %vm420_vm2, %v525_v34  ;;  %v526_v40 = vpack.c.bf16 %v230_v35, %v230_v35  ;;  %439 = vrot.lane.b32.xlu1 %v531_v33, %s624_s18  ;;  %v532_v41 = vpack.c.bf16 %v403_v39, %v403_v39 }
  0xf8   :  { %424 = vst.msk [vmem:[%s805_s8 + $0xc] sm:$0xf] %vm420_vm2, %v528_v38  ;;  %435 = vrot.lane.b32.xlu0 %v529_v37, %s624_s18  ;;  %v530_v43 = vpack.c.bf16 %v401_v42, %v401_v42 }
  0xf9   :  { %422 = vst.msk [vmem:[%s805_s8 + $0x4] sm:$0xf] %vm420_vm2, %v526_v40 }
  0xfb   :  { %456 = vrot.lane.b32.xlu1 %v527_v28, %s625_s5 }
  0xfc   :  { %441 = vrot.lane.b32.xlu0 %v532_v41, %s624_s18 }
  0xff   :  { %452 = vrot.lane.b32.xlu1 %v525_v34, %s625_s5 }
 0x100   :  { %458 = vrot.lane.b32.xlu0 %v528_v38, %s625_s5 }
 0x103   :  { %469 = vrot.lane.b32.xlu1 %v529_v37, %s626_s23 }
 0x104   :  { %454 = vrot.lane.b32.xlu0 %v526_v40, %s625_s5 }
 0x107   :  { %437 = vrot.lane.b32.xlu1 %v530_v43, %s624_s18 }
 0x108   :  { %471 = vrot.lane.b32.xlu0 %v530_v43, %s626_s23 }
 0x10b   :  { %473 = vrot.lane.b32.xlu1 %v531_v33, %s626_s23 }
 0x10c   :  { %475 = vrot.lane.b32.xlu0 %v532_v41, %s626_s23 }
 0x169   :  { %v440_v44 = vpop.permute.xlu1 %439 }
 0x16a   :  { %450 = vst.msk [vmem:[%s805_s8 + $0x8] sm:$0xf] %vm447_vm3, %v440_v44  ;;  %v436_v45 = vpop.permute.xlu0 %435 }
 0x16b   :  { %448 = vst.msk [vmem:[%s805_s8] sm:$0xf] %vm447_vm3, %v436_v45 }
 0x16d   :  { %v457_v46 = vpop.permute.xlu1 %456 }
 0x16e   :  { %467 = vst.msk [vmem:[%s805_s8 + $0x8] sm:$0xf] %vm464_vm4, %v457_v46  ;;  %v442_v47 = vpop.permute.xlu0 %441 }
 0x16f   :  { %451 = vst.msk [vmem:[%s805_s8 + $0xc] sm:$0xf] %vm447_vm3, %v442_v47 }
 0x171   :  { %v453_v48 = vpop.permute.xlu1 %452 }
 0x172   :  { %465 = vst.msk [vmem:[%s805_s8] sm:$0xf] %vm464_vm4, %v453_v48  ;;  %v459_v49 = vpop.permute.xlu0 %458 }
 0x173   :  { %468 = vst.msk [vmem:[%s805_s8 + $0xc] sm:$0xf] %vm464_vm4, %v459_v49 }
 0x175   :  { %v470_v50 = vpop.permute.xlu1 %469 }
 0x176   :  { %482 = vst.msk [vmem:[%s805_s8] sm:$0xf] %vm481_vm5, %v470_v50  ;;  %v455_v51 = vpop.permute.xlu0 %454 }
 0x179   :  { %v438_v52 = vpop.permute.xlu1 %437 }
 0x17a   :  { %449 = vst.msk [vmem:[%s805_s8 + $0x4] sm:$0xf] %vm447_vm3, %v438_v52  ;;  %v472_v53 = vpop.permute.xlu0 %471 }
 0x17b   :  { %466 = vst.msk [vmem:[%s805_s8 + $0x4] sm:$0xf] %vm464_vm4, %v455_v51 }
 0x17c   :  { %483 = vst.msk [vmem:[%s805_s8 + $0x4] sm:$0xf] %vm481_vm5, %v472_v53 }
 0x17d   :  { %v474_v54 = vpop.permute.xlu1 %473 }
 0x17e   :  { %484 = vst.msk [vmem:[%s805_s8 + $0x8] sm:$0xf] %vm481_vm5, %v474_v54  ;;  %v476_v55 = vpop.permute.xlu0 %475 }
 0x17f   :  { %485 = vst.msk [vmem:[%s805_s8 + $0xc] sm:$0xf] %vm481_vm5, %v476_v55 }

// kernel: cnn_forward.19
= control target key start
LH: loop header
LB: loop body
LE: loop exit
PB: predicated region body
PF: predicated region fallthrough
CT: control target
= control target key end

     0   :  { %v307_v1 = vmov 0.0   ;;  %vm308_vm0 = vmmov 0   ;;  %vm20_vm1 = vcmask 523264   ;;  %s384_s0 = inlined_call_operand.vmem [shape: bf16[2,16,64], index: 0, kind: input, shape index: {}]   ;;  %s385_s1 = inlined_call_operand.vmem [shape: bf16[64,10], index: 1, kind: input, shape index: {}]   ;;  %s386_s2 = inlined_call_operand.vmem [shape: f32[1,10], index: 2, kind: input, shape index: {}]   ;;  %s387_s3 = inlined_call_operand.hbm [shape: f32[2,10], index: 3, kind: output, shape index: {}]  }
   0x1   :  { %v275_v0 = vld [vmem:[%s385_s1] sm:$0xff]   ;;  %248 = vmatprep.subr.bf16.mxu0 %v307_v1  ;;  %260 = vmatprep.subr.bf16.mxu1 %v307_v1  ;;  %v277_v3 = vld [vmem:[%s385_s1 + $0x8] sm:$0xff]   ;;  %v279_v5 = vld [vmem:[%s385_s1 + $0x10] sm:$0xff]  }
   0x2   :  { %v276_v2 = vld [vmem:[%s385_s1] sm:$0xff]   ;;  %249 = vmatpush3.bf16.msra.mxu0 %v275_v0  ;;  %256 = vmatprep.mubr.msk.bf16.mxu0 %vm308_vm0, %v307_v1  ;;  %v278_v4 = vld [vmem:[%s385_s1 + $0x8] sm:$0xff]   ;;  %v280_v6 = vld [vmem:[%s385_s1 + $0x10] sm:$0xff]  }
   0x3   :  { %261 = vmatpush3.bf16.msra.mxu1 %v276_v2  ;;  %250 = vmatprep.subr.bf16.mxu0 %v307_v1  ;;  %v230_v7 = vld [vmem:[%s384_s0] sm:$0xff]   ;;  %v237_v8 = vld [vmem:[%s384_s0 + $0x8] sm:$0xff]  }
   0x4   :  { %262 = vmatprep.subr.bf16.mxu1 %v307_v1  ;;  %268 = vmatprep.mubr.msk.bf16.mxu1 %vm308_vm0, %v307_v1  ;;  %v231_v9 = vunpack.c.l.bf16 %v230_v7  ;;  %v232_v10 = vunpack.c.h.bf16 %v230_v7  ;;  %v235_v11 = vunpack.c.l.bf16 %v237_v8  ;;  %v236_v12 = vunpack.c.h.bf16 %v237_v8 }
   0x6   :  { %251 = vmatpush3.bf16.msra.mxu0 %v277_v3 }
   0x7   :  { %263 = vmatpush3.bf16.msra.mxu1 %v278_v4  ;;  %252 = vmatprep.subr.bf16.mxu0 %v307_v1 }
   0x8   :  { %264 = vmatprep.subr.bf16.mxu1 %v307_v1 }
   0x9   :  { %8 = vsyncpa [#allocation3], 0  ;;  %v281_v13 = vld [vmem:[%s385_s1 + $0x18] sm:$0xff]   ;;  %v21_v15 = vsel %vm20_vm1, %v231_v9, 0.0  ;;  %v22_v16 = vsel %vm20_vm1, %v232_v10, 0.0  ;;  %v115_v17 = vsel %vm20_vm1, %v235_v11, 0.0 }
   0xa   :  { %253 = vmatpush3.bf16.msra.mxu0 %v279_v5  ;;  %v282_v14 = vld [vmem:[%s385_s1 + $0x18] sm:$0xff]   ;;  %v116_v18 = vsel %vm20_vm1, %v236_v12, 0.0  ;;  %v23_v19 = vadd.f32 %v22_v16, %v21_v15  ;;  %v40_v37 = vld [vmem:[%s386_s2] sm:$0x1]  ;;  %s309_s7 = smov [#allocation2]   ;;  %vm108_vm2 = vcmask 73728  }
   0xb   :  { %265 = vmatpush3.bf16.msra.mxu1 %v280_v6  ;;  %254 = vmatprep.subr.bf16.mxu0 %v307_v1  ;;  %v117_v20 = vadd.f32 %v116_v18, %v115_v17  ;;  %v134_v38 = vld [vmem:[%s386_s2] sm:$0x1]  ;;  %s209_s8 = sshll.u32 %s309_s7, 4  ;;  %s210_s8 = int_to_ptr.vmem [resolvable:$true] %s209_s8 }
   0xc   :  { %266 = vmatprep.subr.bf16.mxu1 %v307_v1  ;;  %v24_v21 = vrot.slane %v23_v19, 4  ;;  %s283_s9 = scalar_lea.vmem %s210_s8, 32  ;;  %p288_p1 = scmp.lt.s32.totalorder %s210_s8, %s210_s8 }
   0xd   :  { %v118_v22 = vrot.slane %v117_v20, 4  ;;  %p284_p0 = scmp.ne.s32.totalorder %s210_s8, %s283_s9  ;;  %p289_p2 = scmp.lt.s32.totalorder %s283_s9, %s283_s9 }
   0xe   :  { %255 = vmatpush3.bf16.msra.mxu0 %v281_v13  ;;  %v25_v23 = vadd.f32 %v24_v21, %v23_v19 }
   0xf   :  { %267 = vmatpush3.bf16.msra.mxu1 %v282_v14  ;;  %v119_v24 = vadd.f32 %v118_v22, %v117_v20  ;;  %p290_p3 = por %p289_p2, %p288_p1 }
  0x10   :  { %v26_v25 = vrot.slane %v25_v23, 2 }
  0x11   :  { %v120_v26 = vrot.slane %v119_v24, 2  ;;  %p291_p4 = pnand %p290_p3, %p284_p0 }
  0x12   :  { %v27_v27 = vadd.f32 %v26_v25, %v25_v23 }
  0x13   :  { %v121_v28 = vadd.f32 %v120_v26, %v119_v24 }
  0x14   :  { %v28_v29 = vrot.slane %v27_v27, 1 }
  0x15   :  { %v122_v30 = vrot.slane %v121_v28, 1 }
  0x16   :  { %v29_v31 = vadd.f32 %v28_v29, %v27_v27 }
  0x17   :  { %v123_v32 = vadd.f32 %v122_v30, %v121_v28 }
  0x18   :  { %v30_v33 = vmul.f32 0.0625, %v29_v31 }
  0x19   :  { %v124_v34 = vmul.f32 0.0625, %v123_v32 }
  0x1a   :  { %v31_v35 = vpack.c.bf16 %v30_v33, %v30_v33 }
  0x1b   :  { %v125_v36 = vpack.c.bf16 %v124_v34, %v124_v34 }
  0x1c   :  { %257 = vmatmul.mubr.msk.bf16.vlgmr.msra.gmra.mrb[0].mxu0 %vm20_vm1, %v31_v35 }
  0x1d   :  { %269 = vmatmul.mubr.msk.bf16.vlgmr.msra.gmra.mrb[0].mxu1 %vm20_vm1, %v125_v36 }
  0xef   :  { %v102_v39 = vpop.f32.mrb[0].mxu0 }
  0xf0   :  { %v196_v40 = vpop.f32.mrb[0].mxu1  ;;  %v103_v41 = vadd.f32 %v102_v39, %v40_v37  ;;  %v258_v43 = vpop.f32.mrb[1].mxu0 }
  0xf1   :  { %v197_v42 = vadd.f32 %v196_v40, %v134_v38  ;;  %v270_v44 = vpop.f32.mrb[1].mxu1  ;;  %v105_v45 = vpop.f32.mrb[2].mxu0 }
  0xf2   :  { %v199_v46 = vpop.f32.mrb[2].mxu1  ;;  %109 = vst.msk [vmem:[#allocation2] sm:$0x1] %vm108_vm2, %v103_v41  ;;  %v259_v47 = vpop.f32.mrb[3].mxu0 }
  0xf3   :  { %202 = vst.msk [vmem:[#allocation2 + $0x1] sm:$0x1] %vm108_vm2, %v197_v42  ;;  %v271_v48 = vpop.f32.mrb[3].mxu1 }
  0xf4   :  { %294 = shalt.err (!%p291_p4)
}
  0xf5   :  { %s295_s11 = scalar_lea.hbm %s387_s3, 32 }
  0xf6   :  { %p296_p5 = scmp.ne.s32.totalorder %s387_s3, %s295_s11  ;;  %p299_p6 = scmp.lt.u32.totalorder %s295_s11, %s387_s3 }
  0xf8   :  { %p301_p7 = pnand %p299_p6, %p296_p5 }
  0xfa   :  { %304 = shalt.err (!%p301_p7)
}
  0xfb   :  { %212 = dma.vmem_to_hbm [thread:$0]  %s210_s8, 32, %s387_s3, [#allocation3]  }
  0xfc   :  { %305 = dma.done.wait [#allocation3], 32  }
  0xfd   :  { %306 = vsyncadd [#allocation3], 4294967264 }
  0xfe   :  { %216 = vsyncpa [#allocation3], 1 }

</bundles_post_ra>
